<compile_context>
chip_gen: v5e
topology: v5e:2x2
jax: 0.10.0
libtpu: 0.0.40
codegen_flags: <defaults>
</compile_context>

<pallas_src>
import functools

import jax
import jax.numpy as jnp
from jax.experimental import pallas as pl
from jax.experimental.pallas import tpu as pltpu

# Logical sizes from the PyTorch module.
IN_FEATURES = 784
HIDDEN = 256
OUT_FEATURES = 10

# Padded, (8,128)-aligned sizes used inside the kernel.
IN_PAD = 896        # 7 * 128 : K dim of the first matmul
OUT_PAD = 128       # lane-dense output width; wrapper slices [:, :10]
TILE_B = 256        # batch tile (fits comfortably in VMEM on v5e/v6e/v7x)


def _mlp_kernel(x_ref, w0_ref, b0_ref, w1_ref, b1_ref, w2_ref, b2_ref,
                *rest, training: bool):
    """One batch tile of the 3-layer MLP. Weights are VMEM-resident bf16."""
    if training:
        m1_ref, m2_ref, o_ref = rest
    else:
        (o_ref,) = rest

    # fc0 + relu (+ dropout): bf16 MXU inputs, f32 accumulation, f32 elementwise.
    h1 = jnp.dot(x_ref[...], w0_ref[...], preferred_element_type=jnp.float32)
    h1 = jnp.maximum(h1 + b0_ref[...], 0.0)
    if training:
        h1 = h1 * m1_ref[...]            # mask values are pre-scaled {0, 1/(1-p)}

    # fc1 + relu (+ dropout)
    h2 = jnp.dot(h1.astype(jnp.bfloat16), w1_ref[...],
                 preferred_element_type=jnp.float32)
    h2 = jnp.maximum(h2 + b1_ref[...], 0.0)
    if training:
        h2 = h2 * m2_ref[...]

    # fc2 (padded to 128 lanes)
    h3 = jnp.dot(h2.astype(jnp.bfloat16), w2_ref[...],
                 preferred_element_type=jnp.float32)
    o_ref[...] = (h3 + b2_ref[...]).astype(o_ref.dtype)


def _prepare_params(params):
    """Pad to lane-dense shapes and cast matmul operands to bf16."""
    w0, b0, w1, b1, w2, b2 = params
    w0p = jnp.zeros((IN_PAD, HIDDEN), jnp.float32).at[:IN_FEATURES, :].set(w0)
    w2p = jnp.zeros((HIDDEN, OUT_PAD), jnp.float32).at[:, :OUT_FEATURES].set(w2)
    b2p = jnp.zeros((1, OUT_PAD), jnp.float32).at[:, :OUT_FEATURES].set(b2)
    return (w0p.astype(jnp.bfloat16), b0.astype(jnp.float32),
            w1.astype(jnp.bfloat16), b1.astype(jnp.float32),
            w2p.astype(jnp.bfloat16), b2p)


def mlp_forward(x, params, *, training: bool = False, p: float = 0.5, rng=None):
    """x: (B, 1, 28, 28) or (B, 784) float32. Returns (B, 10) float32."""
    B = x.shape[0]
    x2d = x.reshape(B, -1).astype(jnp.float32)
    assert x2d.shape[1] == IN_FEATURES, f"expected 784 features, got {x2d.shape[1]}"

    # Pad batch to a multiple of TILE_B and features to IN_PAD (zeros), cast bf16.
    Bp = pl.cdiv(B, TILE_B) * TILE_B
    xp = jnp.zeros((Bp, IN_PAD), jnp.float32).at[:B, :IN_FEATURES].set(x2d)
    xp = xp.astype(jnp.bfloat16)

    w0, b0, w1, b1, w2, b2 = _prepare_params(params)

    use_dropout = bool(training) and p > 0.0
    grid = (Bp // TILE_B,)
    row_tile = lambda i: (i, 0)     # batch-tiled arrays
    pinned = lambda i: (0, 0)       # weights/biases resident across grid steps

    in_specs = [
        pl.BlockSpec((TILE_B, IN_PAD), row_tile),
        pl.BlockSpec((IN_PAD, HIDDEN), pinned),
        pl.BlockSpec((1, HIDDEN), pinned),
        pl.BlockSpec((HIDDEN, HIDDEN), pinned),
        pl.BlockSpec((1, HIDDEN), pinned),
        pl.BlockSpec((HIDDEN, OUT_PAD), pinned),
        pl.BlockSpec((1, OUT_PAD), pinned),
    ]
    args = [xp, w0, b0, w1, b1, w2, b2]

    if use_dropout:
        # TODO(synk): switch to on-chip pltpu.prng_random_bits (seeded per tile via
        # scalar prefetch) once CPU-interpret compatibility is not required.
        if rng is None:
            rng = jax.random.PRNGKey(0)
        k1, k2 = jax.random.split(rng)
        scale = 1.0 / (1.0 - p)
        m1 = jax.random.bernoulli(k1, 1.0 - p, (Bp, HIDDEN)).astype(jnp.float32) * scale
        m2 = jax.random.bernoulli(k2, 1.0 - p, (Bp, HIDDEN)).astype(jnp.float32) * scale
        in_specs += [pl.BlockSpec((TILE_B, HIDDEN), row_tile),
                     pl.BlockSpec((TILE_B, HIDDEN), row_tile)]
        args += [m1, m2]

    out = pl.pallas_call(
        functools.partial(_mlp_kernel, training=use_dropout),
        out_shape=jax.ShapeDtypeStruct((Bp, OUT_PAD), jnp.float32),
        grid=grid,
        in_specs=in_specs,
        out_specs=pl.BlockSpec((TILE_B, OUT_PAD), row_tile),
        compiler_params=pltpu.CompilerParams(
            dimension_semantics=("parallel",)),
    )(*args)

    return out[:B, :OUT_FEATURES]


def init_params(key):
    """nn.Linear-style init U(-1/sqrt(fan_in), 1/sqrt(fan_in)).

    Weights stored as (in_features, out_features) so the kernel computes x @ W;
    biases stored as (1, out_features).
    """
    dims = [(IN_FEATURES, HIDDEN), (HIDDEN, HIDDEN), (HIDDEN, OUT_FEATURES)]
    params = []
    for i, (fan_in, fan_out) in enumerate(dims):
        kw, kb = jax.random.split(jax.random.fold_in(key, i))
        bound = 1.0 / jnp.sqrt(jnp.float32(fan_in))
        w = jax.random.uniform(kw, (fan_in, fan_out), jnp.float32, -bound, bound)
        b = jax.random.uniform(kb, (1, fan_out), jnp.float32, -bound, bound)
        params += [w, b]
    return tuple(params)


def mlp_reference(x, params):
    """Pure-JAX eval-mode reference using the same bf16-in/f32-acc matmuls."""
    w0, b0, w1, b1, w2, b2 = params
    x2d = x.reshape(x.shape[0], -1).astype(jnp.float32)
    bf = lambda a: a.astype(jnp.bfloat16)
    dot = lambda a, b: jnp.dot(bf(a), bf(b), preferred_element_type=jnp.float32)
    h1 = jnp.maximum(dot(x2d, w0) + b0, 0.0)
    h2 = jnp.maximum(dot(h1, w1) + b1, 0.0)
    return dot(h2, w2) + b2


if __name__ == "__main__":
    key = jax.random.PRNGKey(0)
    params = init_params(key)

    # MNIST-like input: batch=2, NCHW (2, 1, 28, 28) -> flattens to (2, 784).
    x = jax.random.normal(jax.random.fold_in(key, 100), (2, 1, 28, 28), jnp.float32)

    # Eval-mode forward (dropout is identity).
    out = jax.block_until_ready(mlp_forward(x, params, training=False))
    ref = mlp_reference(x, params)
    assert out.shape == (2, 10)
    assert jnp.allclose(out, ref, atol=2e-2, rtol=2e-2), "mismatch vs reference"

    # Training-mode forward (dropout via host-generated mask; RNG stream
    # necessarily differs from torch's).
    out_train = jax.block_until_ready(
        mlp_forward(x, params, training=True, p=0.5, rng=jax.random.PRNGKey(42)))
    assert out_train.shape == (2, 10)
    assert bool(jnp.all(jnp.isfinite(out_train)))

    print("KERNEL_OK")
</pallas_src>

<mosaic_0001>
module attributes {stable_mosaic.version = 11 : i64} {
  func.func @_mlp_kernel(%arg0: i32, %arg1: memref<256x896xbf16, #tpu.memory_space<vmem>>, %arg2: memref<896x256xbf16, #tpu.memory_space<vmem>>, %arg3: memref<1x256xf32, #tpu.memory_space<vmem>>, %arg4: memref<256x256xbf16, #tpu.memory_space<vmem>>, %arg5: memref<1x256xf32, #tpu.memory_space<vmem>>, %arg6: memref<256x128xbf16, #tpu.memory_space<vmem>>, %arg7: memref<1x128xf32, #tpu.memory_space<vmem>>, %arg8: memref<256x128xf32, #tpu.memory_space<vmem>>) attributes {dimension_semantics = [#tpu.dimension_semantics<parallel>], iteration_bounds = array<i64: 1>, scalar_prefetch = 0 : i64, scratch_operands = 0 : i64, tpu.core_type = #tpu.core_type<tc>, window_params = [{transform_indices = @transform_0, window_bounds = array<i64: 256, 896>}, {pipeline_mode = #tpu.pipeline_mode<synchronous>, transform_indices = @transform_1, window_bounds = array<i64: 896, 256>}, {pipeline_mode = #tpu.pipeline_mode<synchronous>, transform_indices = @transform_2, window_bounds = array<i64: 1, 256>}, {pipeline_mode = #tpu.pipeline_mode<synchronous>, transform_indices = @transform_3, window_bounds = array<i64: 256, 256>}, {pipeline_mode = #tpu.pipeline_mode<synchronous>, transform_indices = @transform_4, window_bounds = array<i64: 1, 256>}, {pipeline_mode = #tpu.pipeline_mode<synchronous>, transform_indices = @transform_5, window_bounds = array<i64: 256, 128>}, {pipeline_mode = #tpu.pipeline_mode<synchronous>, transform_indices = @transform_6, window_bounds = array<i64: 1, 128>}, {transform_indices = @transform_7, window_bounds = array<i64: 256, 128>}]} {
    %c0 = arith.constant 0 : index
    %c0_0 = arith.constant 0 : index
    %0 = vector.load %arg1[%c0, %c0_0] : memref<256x896xbf16, #tpu.memory_space<vmem>>, vector<256x896xbf16>
    %c0_1 = arith.constant 0 : index
    %c0_2 = arith.constant 0 : index
    %1 = vector.load %arg2[%c0_1, %c0_2] : memref<896x256xbf16, #tpu.memory_space<vmem>>, vector<896x256xbf16>
    %cst = arith.constant dense<0.000000e+00> : vector<256x256xf32>
    %2 = tpu.matmul %0, %1, %cst {dimension_numbers = #tpu.dot_dimension_numbers<[1], [0], [0], [1], [0, 0, 1, 1], [], []>} : vector<256x896xbf16>, vector<896x256xbf16>, vector<256x256xf32> -> vector<256x256xf32>
    %c0_3 = arith.constant 0 : index
    %c0_4 = arith.constant 0 : index
    %3 = vector.load %arg3[%c0_3, %c0_4] : memref<1x256xf32, #tpu.memory_space<vmem>>, vector<1x256xf32>
    %4 = vector.broadcast %3 : vector<1x256xf32> to vector<256x256xf32>
    %5 = arith.addf %2, %4 : vector<256x256xf32>
    %cst_5 = arith.constant 0.000000e+00 : f32
    %6 = vector.broadcast %cst_5 : f32 to vector<256x256xf32>
    %7 = arith.maximumf %5, %6 : vector<256x256xf32>
    %8 = arith.truncf %7 : vector<256x256xf32> to vector<256x256xbf16>
    %c0_6 = arith.constant 0 : index
    %c0_7 = arith.constant 0 : index
    %9 = vector.load %arg4[%c0_6, %c0_7] : memref<256x256xbf16, #tpu.memory_space<vmem>>, vector<256x256xbf16>
    %cst_8 = arith.constant dense<0.000000e+00> : vector<256x256xf32>
    %10 = tpu.matmul %8, %9, %cst_8 {dimension_numbers = #tpu.dot_dimension_numbers<[1], [0], [0], [1], [0, 0, 1, 1], [], []>} : vector<256x256xbf16>, vector<256x256xbf16>, vector<256x256xf32> -> vector<256x256xf32>
    %c0_9 = arith.constant 0 : index
    %c0_10 = arith.constant 0 : index
    %11 = vector.load %arg5[%c0_9, %c0_10] : memref<1x256xf32, #tpu.memory_space<vmem>>, vector<1x256xf32>
    %12 = vector.broadcast %11 : vector<1x256xf32> to vector<256x256xf32>
    %13 = arith.addf %10, %12 : vector<256x256xf32>
    %cst_11 = arith.constant 0.000000e+00 : f32
    %14 = vector.broadcast %cst_11 : f32 to vector<256x256xf32>
    %15 = arith.maximumf %13, %14 : vector<256x256xf32>
    %16 = arith.truncf %15 : vector<256x256xf32> to vector<256x256xbf16>
    %c0_12 = arith.constant 0 : index
    %c0_13 = arith.constant 0 : index
    %17 = vector.load %arg6[%c0_12, %c0_13] : memref<256x128xbf16, #tpu.memory_space<vmem>>, vector<256x128xbf16>
    %cst_14 = arith.constant dense<0.000000e+00> : vector<256x128xf32>
    %18 = tpu.matmul %16, %17, %cst_14 {dimension_numbers = #tpu.dot_dimension_numbers<[1], [0], [0], [1], [0, 0, 1, 1], [], []>} : vector<256x256xbf16>, vector<256x128xbf16>, vector<256x128xf32> -> vector<256x128xf32>
    %c0_15 = arith.constant 0 : index
    %c0_16 = arith.constant 0 : index
    %19 = vector.load %arg7[%c0_15, %c0_16] : memref<1x128xf32, #tpu.memory_space<vmem>>, vector<1x128xf32>
    %20 = vector.broadcast %19 : vector<1x128xf32> to vector<256x128xf32>
    %21 = arith.addf %18, %20 : vector<256x128xf32>
    %c0_17 = arith.constant 0 : index
    %c0_18 = arith.constant 0 : index
    %22 = vector.load %arg8[%c0_17, %c0_18] : memref<256x128xf32, #tpu.memory_space<vmem>>, vector<256x128xf32>
    tpu.vector_store %arg8[%c0_17, %c0_18], %21 {strides = array<i32>} : memref<256x128xf32, #tpu.memory_space<vmem>>, vector<256x128xf32>,
    return
  }
  func.func @transform_0(%arg0: i32) -> (i32, i32) {
    %c0_i32 = arith.constant 0 : i32
    %c0_i32_0 = arith.constant 0 : i32
    return %arg0, %c0_i32 : i32, i32
  }
  func.func @transform_1(%arg0: i32) -> (i32, i32) {
    %c0_i32 = arith.constant 0 : i32
    %c0_i32_0 = arith.constant 0 : i32
    %c0_i32_1 = arith.constant 0 : i32
    return %c0_i32, %c0_i32_0 : i32, i32
  }
  func.func @transform_2(%arg0: i32) -> (i32, i32) {
    %c0_i32 = arith.constant 0 : i32
    %c0_i32_0 = arith.constant 0 : i32
    %c0_i32_1 = arith.constant 0 : i32
    return %c0_i32, %c0_i32_0 : i32, i32
  }
  func.func @transform_3(%arg0: i32) -> (i32, i32) {
    %c0_i32 = arith.constant 0 : i32
    %c0_i32_0 = arith.constant 0 : i32
    %c0_i32_1 = arith.constant 0 : i32
    return %c0_i32, %c0_i32_0 : i32, i32
  }
  func.func @transform_4(%arg0: i32) -> (i32, i32) {
    %c0_i32 = arith.constant 0 : i32
    %c0_i32_0 = arith.constant 0 : i32
    %c0_i32_1 = arith.constant 0 : i32
    return %c0_i32, %c0_i32_0 : i32, i32
  }
  func.func @transform_5(%arg0: i32) -> (i32, i32) {
    %c0_i32 = arith.constant 0 : i32
    %c0_i32_0 = arith.constant 0 : i32
    %c0_i32_1 = arith.constant 0 : i32
    return %c0_i32, %c0_i32_0 : i32, i32
  }
  func.func @transform_6(%arg0: i32) -> (i32, i32) {
    %c0_i32 = arith.constant 0 : i32
    %c0_i32_0 = arith.constant 0 : i32
    %c0_i32_1 = arith.constant 0 : i32
    return %c0_i32, %c0_i32_0 : i32, i32
  }
  func.func @transform_7(%arg0: i32) -> (i32, i32) {
    %c0_i32 = arith.constant 0 : i32
    %c0_i32_0 = arith.constant 0 : i32
    return %arg0, %c0_i32 : i32, i32
  }
}

</mosaic_0001>

<bundles_post_ra>
// kernel: tpu_custom_call.1
= control target key start
LH: loop header
LB: loop body
LE: loop exit
PB: predicated region body
PF: predicated region fallthrough
CT: control target
= control target key end

     0   :  { %12 = vsyncpa [#allocation3], 0  ;;  %s6651_s0 = inlined_call_operand.hbm [shape: bf16[256,896], index: 0, kind: input, shape index: {}]   ;;  %s6652_s1 = inlined_call_operand.hbm [shape: bf16[896,256], index: 1, kind: input, shape index: {}]   ;;  %s6653_s2 = inlined_call_operand.hbm [shape: f32[1,256], index: 2, kind: input, shape index: {}]   ;;  %s6654_s3 = inlined_call_operand.hbm [shape: bf16[256,256], index: 3, kind: input, shape index: {}]   ;;  %s6655_s4 = inlined_call_operand.vmem [shape: f32[1,256], index: 4, kind: input, shape index: {}]   ;;  %s6656_s5 = inlined_call_operand.hbm [shape: bf16[256,128], index: 5, kind: input, shape index: {}]   ;;  %s6657_s6 = inlined_call_operand.vmem [shape: f32[1,128], index: 6, kind: input, shape index: {}]   ;;  %s6658_s7 = inlined_call_operand.hbm [shape: f32[256,128], index: 7, kind: output, shape index: {}]  }
   0x1   :  { %13 = vsyncpa [#allocation6], 0 }
   0x2   :  { %14 = vsyncpa [#allocation9], 0  ;;  %s33_s26 = sshll.u32 %s6652_s1, 4  ;;  %s34_s26 = int_to_ptr.hbm [resolvable:$true] %s33_s26 }
   0x3   :  { %15 = vsyncpa [#allocation4], 0  ;;  %s5366_s27 = smov [#allocation5]   ;;  %s57_s8 = sshll.u32 %s6654_s3, 4  ;;  %s58_s8 = int_to_ptr.hbm [resolvable:$true] %s57_s8 }
   0x4   :  { %s35_s28 = sshll.u32 %s5366_s27, 4  ;;  %s5367_s9 = smov 128   ;;  %s36_s28 = int_to_ptr.vmem [resolvable:$true] %s35_s28 }
   0x5   :  { %s5368_s10 = smov 8   ;;  %s5369_s11 = smov [#allocation8]  }
   0x6   :  { %41 = dma.hbm_to_vmem [thread:$0]  %s34_s26, 14336, %s36_s28, [#allocation6], %s5367_s9, %s5367_s9, %s5368_s10  }
   0x7   :  { %s59_s12 = sshll.u32 %s5369_s11, 4  ;;  %s20_s14 = sshll.u32 %s6651_s0, 4  ;;  %s60_s12 = int_to_ptr.vmem [resolvable:$true] %s59_s12  ;;  %s21_s14 = int_to_ptr.hbm [resolvable:$true] %s20_s14 }
   0x8   :  { %65 = dma.hbm_to_vmem [thread:$0]  %s58_s8, 4096, %s60_s12, [#allocation9], %s5367_s9, %s5367_s9, %s5368_s10  }
   0x9   :  { %s5370_s3 = smov [#allocation2]   ;;  %s47_s18 = sshll.u32 %s6653_s2, 4  ;;  %s48_s18 = int_to_ptr.hbm [resolvable:$true] %s47_s18 }
   0xa   :  { %s22_s15 = sshll.u32 %s5370_s3, 4  ;;  %s5371_s19 = smov 448   ;;  %s23_s15 = int_to_ptr.vmem [resolvable:$true] %s22_s15 }
   0xb   :  { %s5372_s20 = smov 28   ;;  %s5373_s21 = smov [#allocation7]  }
   0xc   :  { %28 = dma.hbm_to_vmem [thread:$0]  %s21_s14, 14336, %s23_s15, [#allocation3], %s5371_s19, %s5371_s19, %s5372_s20  }
   0xd   :  { %s49_s22 = sshll.u32 %s5373_s21, 4  ;;  %s72_s24 = sshll.u32 %s6656_s5, 4  ;;  %s50_s22 = int_to_ptr.vmem [resolvable:$true] %s49_s22  ;;  %s73_s24 = int_to_ptr.hbm [resolvable:$true] %s72_s24 }
   0xe   :  { %52 = dma.hbm_to_vmem [thread:$0]  %s48_s18, 32, %s50_s22, [#allocation6]  }
   0xf   :  { %s5374_s25 = smov [#allocation10]   ;;  %s5375_s27 = smov 64  }
  0x10   :  { %s74_s26 = sshll.u32 %s5374_s25, 4  ;;  %s5376_s28 = smov 4   ;;  %s75_s26 = int_to_ptr.vmem [resolvable:$true] %s74_s26 }
  0x11   :  { %80 = dma.hbm_to_vmem [thread:$0]  %s73_s24, 2048, %s75_s26, [#allocation9], %s5375_s27, %s5375_s27, %s5376_s28  }
  0x12   :  { %5358 = dma.done.wait [#allocation3], 14336  }
  0x13   :  { %5359 = vsyncadd [#allocation3], 4294952960 }
  0x14   :  { %5360 = dma.done.wait [#allocation6], 14368  }
  0x15   :  { %5361 = vsyncadd [#allocation6], 4294952928 }
  0x16   :  { %5362 = dma.done.wait [#allocation9], 6144  }
  0x17   :  { %5363 = vsyncadd [#allocation9], 4294961152  ;;  %v4346_v0 = vld [vmem:[#allocation5 + $0x70] sm:$0xf]  ;;  %v5055_v1 = vld [vmem:[#allocation5 + $0x74] sm:$0xf0] }
  0x18   :  { %v4410_v2 = vld [vmem:[#allocation5 + $0xf0] sm:$0xf]  ;;  %v4347_v3 = vor.u32 %v5055_v1, %v4346_v0  ;;  %v5071_v4 = vld [vmem:[#allocation5 + $0xf4] sm:$0xf0]  ;;  %v4338_v11 = vld [vmem:[#allocation5 + $0x60] sm:$0xf] }
  0x19   :  { %v4474_v5 = vld [vmem:[#allocation5 + $0x170] sm:$0xf]  ;;  %v5087_v6 = vld [vmem:[#allocation5 + $0x174] sm:$0xf0]  ;;  %v4411_v7 = vor.u32 %v5071_v4, %v4410_v2  ;;  %v5053_v13 = vld [vmem:[#allocation5 + $0x64] sm:$0xf0] }
  0x1a   :  { %v4475_v8 = vor.u32 %v5087_v6, %v4474_v5  ;;  %v4538_v9 = vld [vmem:[#allocation5 + $0x1f0] sm:$0xf]  ;;  %v5103_v10 = vld [vmem:[#allocation5 + $0x1f4] sm:$0xf0]  ;;  %1485 = vmatpush.bf16.msra.mxu0 %v4347_v3  ;;  %v4402_v14 = vld [vmem:[#allocation5 + $0xe0] sm:$0xf]  ;;  %v4339_v16 = vor.u32 %v5053_v13, %v4338_v11 }
  0x1b   :  { %v4539_v12 = vor.u32 %v5103_v10, %v4538_v9  ;;  %v5069_v15 = vld [vmem:[#allocation5 + $0xe4] sm:$0xf0]  ;;  %1574 = vmatpush.bf16.msra.mxu1 %v4411_v7  ;;  %v4466_v18 = vld [vmem:[#allocation5 + $0x160] sm:$0xf]  ;;  %v4330_v23 = vld [vmem:[#allocation5 + $0x50] sm:$0xf] }
  0x1c   :  { %1663 = vmatpush.bf16.msra.mxu2 %v4475_v8  ;;  %v4403_v17 = vor.u32 %v5069_v15, %v4402_v14  ;;  %v5085_v19 = vld [vmem:[#allocation5 + $0x164] sm:$0xf0]  ;;  %v4530_v20 = vld [vmem:[#allocation5 + $0x1e0] sm:$0xf]  ;;  %v5051_v24 = vld [vmem:[#allocation5 + $0x54] sm:$0xf0] }
  0x1d   :  { %1752 = vmatpush.bf16.msra.mxu3 %v4539_v12  ;;  %v4467_v21 = vor.u32 %v5085_v19, %v4466_v18  ;;  %v5101_v22 = vld [vmem:[#allocation5 + $0x1e4] sm:$0xf0]  ;;  %v4394_v26 = vld [vmem:[#allocation5 + $0xd0] sm:$0xf]  ;;  %v5067_v27 = vld [vmem:[#allocation5 + $0xd4] sm:$0xf0]  ;;  %v4331_v29 = vor.u32 %v5051_v24, %v4330_v23 }
  0x1e   :  { %v4531_v25 = vor.u32 %v5101_v22, %v4530_v20  ;;  %v4458_v28 = vld [vmem:[#allocation5 + $0x150] sm:$0xf]  ;;  %1486 = vmatpush.bf16.msra.mxu0 %v4339_v16  ;;  %v5083_v30 = vld [vmem:[#allocation5 + $0x154] sm:$0xf0]  ;;  %v4395_v33 = vor.u32 %v5067_v27, %v4394_v26  ;;  %v4322_v35 = vld [vmem:[#allocation5 + $0x40] sm:$0xf] }
  0x1f   :  { %v4522_v31 = vld [vmem:[#allocation5 + $0x1d0] sm:$0xf]  ;;  %v5099_v32 = vld [vmem:[#allocation5 + $0x1d4] sm:$0xf0]  ;;  %1575 = vmatpush.bf16.msra.mxu1 %v4403_v17  ;;  %v4459_v34 = vor.u32 %v5083_v30, %v4458_v28  ;;  %v5049_v36 = vld [vmem:[#allocation5 + $0x44] sm:$0xf0] }
  0x20   :  { %1664 = vmatpush.bf16.msra.mxu2 %v4467_v21  ;;  %v4386_v37 = vld [vmem:[#allocation5 + $0xc0] sm:$0xf]  ;;  %v4523_v38 = vor.u32 %v5099_v32, %v4522_v31  ;;  %v5065_v39 = vld [vmem:[#allocation5 + $0xc4] sm:$0xf0]  ;;  %v4323_v44 = vor.u32 %v5049_v36, %v4322_v35  ;;  %v4314_v47 = vld [vmem:[#allocation5 + $0x30] sm:$0xf] }
  0x21   :  { %1753 = vmatpush.bf16.msra.mxu3 %v4531_v25  ;;  %v4450_v40 = vld [vmem:[#allocation5 + $0x140] sm:$0xf]  ;;  %v5081_v41 = vld [vmem:[#allocation5 + $0x144] sm:$0xf0]  ;;  %v4387_v45 = vor.u32 %v5065_v39, %v4386_v37  ;;  %v5047_v48 = vld [vmem:[#allocation5 + $0x34] sm:$0xf0] }
  0x22   :  { %v4514_v42 = vld [vmem:[#allocation5 + $0x1c0] sm:$0xf]  ;;  %v5097_v43 = vld [vmem:[#allocation5 + $0x1c4] sm:$0xf0]  ;;  %1487 = vmatpush.bf16.msra.mxu0 %v4331_v29  ;;  %v4451_v46 = vor.u32 %v5081_v41, %v4450_v40  ;;  %v4378_v49 = vld [vmem:[#allocation5 + $0xb0] sm:$0xf]  ;;  %v4315_v56 = vor.u32 %v5047_v48, %v4314_v47 }
  0x23   :  { %1576 = vmatpush.bf16.msra.mxu1 %v4395_v33  ;;  %v4515_v50 = vor.u32 %v5097_v43, %v4514_v42  ;;  %v5063_v51 = vld [vmem:[#allocation5 + $0xb4] sm:$0xf0]  ;;  %v4442_v52 = vld [vmem:[#allocation5 + $0x130] sm:$0xf]  ;;  %v4306_v59 = vld [vmem:[#allocation5 + $0x20] sm:$0xf] }
  0x24   :  { %1665 = vmatpush.bf16.msra.mxu2 %v4459_v34  ;;  %v5079_v53 = vld [vmem:[#allocation5 + $0x134] sm:$0xf0]  ;;  %v4506_v54 = vld [vmem:[#allocation5 + $0x1b0] sm:$0xf]  ;;  %v4379_v57 = vor.u32 %v5063_v51, %v4378_v49  ;;  %v5045_v60 = vld [vmem:[#allocation5 + $0x24] sm:$0xf0] }
  0x25   :  { %1754 = vmatpush.bf16.msra.mxu3 %v4523_v38  ;;  %v5095_v55 = vld [vmem:[#allocation5 + $0x1b4] sm:$0xf0]  ;;  %v4443_v58 = vor.u32 %v5079_v53, %v4442_v52  ;;  %v4370_v61 = vld [vmem:[#allocation5 + $0xa0] sm:$0xf]  ;;  %v5061_v63 = vld [vmem:[#allocation5 + $0xa4] sm:$0xf0]  ;;  %v4307_v4 = vor.u32 %v5045_v60, %v4306_v59 }
  0x26   :  { %1488 = vmatpush.bf16.msra.mxu0 %v4323_v44  ;;  %v4507_v62 = vor.u32 %v5095_v55, %v4506_v54  ;;  %v4434_v0 = vld [vmem:[#allocation5 + $0x120] sm:$0xf]  ;;  %v5077_v1 = vld [vmem:[#allocation5 + $0x124] sm:$0xf0]  ;;  %v4371_v5 = vor.u32 %v5061_v63, %v4370_v61  ;;  %v4298_v7 = vld [vmem:[#allocation5 + $0x10] sm:$0xf] }
  0x27   :  { %1577 = vmatpush.bf16.msra.mxu1 %v4387_v45  ;;  %v4498_v2 = vld [vmem:[#allocation5 + $0x1a0] sm:$0xf]  ;;  %v5093_v3 = vld [vmem:[#allocation5 + $0x1a4] sm:$0xf0]  ;;  %v4435_v6 = vor.u32 %v5077_v1, %v4434_v0  ;;  %v5043_v8 = vld [vmem:[#allocation5 + $0x14] sm:$0xf0] }
  0x28   :  { %1666 = vmatpush.bf16.msra.mxu2 %v4451_v46  ;;  %v4362_v9 = vld [vmem:[#allocation5 + $0x90] sm:$0xf]  ;;  %v4499_v10 = vor.u32 %v5093_v3, %v4498_v2  ;;  %v5059_v11 = vld [vmem:[#allocation5 + $0x94] sm:$0xf0]  ;;  %v4290_v16 = vld [vmem:[#allocation5] sm:$0xf]  ;;  %v4299_v17 = vor.u32 %v5043_v8, %v4298_v7 }
  0x29   :  { %1755 = vmatpush.bf16.msra.mxu3 %v4515_v50  ;;  %v4426_v12 = vld [vmem:[#allocation5 + $0x110] sm:$0xf]  ;;  %v5075_v13 = vld [vmem:[#allocation5 + $0x114] sm:$0xf0]  ;;  %v5041_v18 = vld [vmem:[#allocation5 + $0x4] sm:$0xf0]  ;;  %v4363_v21 = vor.u32 %v5059_v11, %v4362_v9 }
  0x2a   :  { %1489 = vmatpush.bf16.msra.mxu0 %v4315_v56  ;;  %v4490_v14 = vld [vmem:[#allocation5 + $0x190] sm:$0xf]  ;;  %v5091_v15 = vld [vmem:[#allocation5 + $0x194] sm:$0xf0]  ;;  %v4354_v19 = vld [vmem:[#allocation5 + $0x80] sm:$0xf]  ;;  %v4427_v22 = vor.u32 %v5075_v13, %v4426_v12  ;;  %v4291_v33 = vor.u32 %v5041_v18, %v4290_v16 }
  0x2b   :  { %1578 = vmatpush.bf16.msra.mxu1 %v4379_v57  ;;  %v5057_v20 = vld [vmem:[#allocation5 + $0x84] sm:$0xf0]  ;;  %v4418_v23 = vld [vmem:[#allocation5 + $0x100] sm:$0xf]  ;;  %v4491_v26 = vor.u32 %v5091_v15, %v4490_v14  ;;  %v4931_v29 = vld [vmem:[#allocation2 + $0x18] sm:$0xf0] }
  0x2c   :  { %1667 = vmatpush.bf16.msra.mxu2 %v4443_v58  ;;  %v5073_v24 = vld [vmem:[#allocation5 + $0x104] sm:$0xf0]  ;;  %v4482_v25 = vld [vmem:[#allocation5 + $0x180] sm:$0xf]  ;;  %v4928_v30 = vld [vmem:[#allocation2 + $0x4] sm:$0xf]  ;;  %v4355_v37 = vor.u32 %v5057_v20, %v4354_v19 }
  0x2d   :  { %1756 = vmatpush.bf16.msra.mxu3 %v4507_v62  ;;  %v5089_v27 = vld [vmem:[#allocation5 + $0x184] sm:$0xf0]  ;;  %v3842_v28 = vld [vmem:[#allocation2] sm:$0xf]  ;;  %v4602_v31 = vld [vmem:[#allocation5 + $0x270] sm:$0xf]  ;;  %v4419_v38 = vor.u32 %v5073_v24, %v4418_v23 }
  0x2e   :  { %1490 = vmatpush.bf16.msra.mxu0 %v4307_v4  ;;  %v5119_v32 = vld [vmem:[#allocation5 + $0x274] sm:$0xf0]  ;;  %v3844_v34 = vld [vmem:[#allocation2 + $0x1c] sm:$0xf0]  ;;  %v4666_v35 = vld [vmem:[#allocation5 + $0x2f0] sm:$0xf]  ;;  %v4483_v41 = vor.u32 %v5089_v27, %v4482_v25  ;;  %v5439_v45 = vor.u32 %v4931_v29, %v3842_v28 }
  0x2f   :  { %1579 = vmatpush.bf16.msra.mxu1 %v4371_v5  ;;  %v5135_v36 = vld [vmem:[#allocation5 + $0x2f4] sm:$0xf0]  ;;  %v3850_v39 = vld [vmem:[#allocation2 + $0x8] sm:$0xf]  ;;  %v4932_v40 = vld [vmem:[#allocation2 + $0x20] sm:$0xf0]  ;;  %v4603_v42 = vor.u32 %v5119_v32, %v4602_v31  ;;  %v5441_v47 = vor.u32 %v4928_v30, %v3844_v34 }
  0x30   :  { %1668 = vmatpush.bf16.msra.mxu2 %v4435_v6  ;;  %v4929_v43 = vld [vmem:[#allocation2 + $0xc] sm:$0xf]  ;;  %v3852_v44 = vld [vmem:[#allocation2 + $0x24] sm:$0xf0]  ;;  %v4667_v46 = vor.u32 %v5135_v36, %v4666_v35  ;;  %v5443_v48 = vor.u32 %v4932_v40, %v3850_v39  ;;  %v4594_v50 = vld [vmem:[#allocation5 + $0x260] sm:$0xf] }
  0x31   :  { %1757 = vmatpush.bf16.msra.mxu3 %v4499_v10  ;;  %v5445_v49 = vor.u32 %v4929_v43, %v3852_v44  ;;  %v5117_v51 = vld [vmem:[#allocation5 + $0x264] sm:$0xf0]  ;;  %v4658_v53 = vld [vmem:[#allocation5 + $0x2e0] sm:$0xf]  ;;  %v3870_v56 = vld [vmem:[#allocation2 + $0x38] sm:$0xf] }
  0x32   :  { %1491 = vmatpush.bf16.msra.mxu0 %v4299_v17  ;;  %v4595_v52 = vor.u32 %v5117_v51, %v4594_v50  ;;  %v5133_v54 = vld [vmem:[#allocation5 + $0x2e4] sm:$0xf0]  ;;  %v4938_v57 = vld [vmem:[#allocation2 + $0x50] sm:$0xf0]  ;;  %v4935_v58 = vld [vmem:[#allocation2 + $0x3c] sm:$0xf] }
  0x33   :  { %1580 = vmatpush.bf16.msra.mxu1 %v4363_v21  ;;  %v4659_v55 = vor.u32 %v5133_v54, %v4658_v53  ;;  %v3872_v59 = vld [vmem:[#allocation2 + $0x54] sm:$0xf0]  ;;  %v3878_v60 = vld [vmem:[#allocation2 + $0x40] sm:$0xf]  ;;  %v4939_v61 = vld [vmem:[#allocation2 + $0x58] sm:$0xf0]  ;;  %v5451_v0 = vor.u32 %v4938_v57, %v3870_v56 }
  0x34   :  { %1669 = vmatpush.bf16.msra.mxu2 %v4427_v22  ;;  %v4936_v62 = vld [vmem:[#allocation2 + $0x44] sm:$0xf]  ;;  %v3880_v63 = vld [vmem:[#allocation2 + $0x5c] sm:$0xf0]  ;;  %v5453_v1 = vor.u32 %v4935_v58, %v3872_v59  ;;  %v5455_v2 = vor.u32 %v4939_v61, %v3878_v60  ;;  %v3898_v4 = vld [vmem:[#allocation2 + $0x70] sm:$0xf] }
  0x35   :  { %1758 = vmatpush.bf16.msra.mxu3 %v4491_v26  ;;  %v5457_v3 = vor.u32 %v4936_v62, %v3880_v63  ;;  %v4945_v5 = vld [vmem:[#allocation2 + $0x88] sm:$0xf0]  ;;  %v4942_v6 = vld [vmem:[#allocation2 + $0x74] sm:$0xf]  ;;  %v3900_v7 = vld [vmem:[#allocation2 + $0x8c] sm:$0xf0] }
  0x36   :  { %1492 = vmatpush.bf16.msra.mxu0 %v4291_v33  ;;  %v3906_v8 = vld [vmem:[#allocation2 + $0x78] sm:$0xf]  ;;  %v4946_v9 = vld [vmem:[#allocation2 + $0x90] sm:$0xf0]  ;;  %v4943_v10 = vld [vmem:[#allocation2 + $0x7c] sm:$0xf]  ;;  %v5463_v12 = vor.u32 %v4945_v5, %v3898_v4  ;;  %v5465_v13 = vor.u32 %v4942_v6, %v3900_v7 }
  0x37   :  { %1581 = vmatpush.bf16.msra.mxu1 %v4355_v37  ;;  %v3908_v11 = vld [vmem:[#allocation2 + $0x94] sm:$0xf0]  ;;  %v5467_v14 = vor.u32 %v4946_v9, %v3906_v8  ;;  %v4586_v16 = vld [vmem:[#allocation5 + $0x250] sm:$0xf]  ;;  %v3926_v22 = vld [vmem:[#allocation2 + $0xa8] sm:$0xf] }
  0x38   :  { %1670 = vmatpush.bf16.msra.mxu2 %v4419_v38  ;;  %v5469_v15 = vor.u32 %v4943_v10, %v3908_v11  ;;  %v5115_v17 = vld [vmem:[#allocation5 + $0x254] sm:$0xf0]  ;;  %v4650_v19 = vld [vmem:[#allocation5 + $0x2d0] sm:$0xf]  ;;  %v4952_v23 = vld [vmem:[#allocation2 + $0xc0] sm:$0xf0] }
  0x39   :  { %1759 = vmatpush.bf16.msra.mxu3 %v4483_v41  ;;  %1493 = vmatmul.bf16.vlgmr.msra.gmra.mxu0 %v5439_v45  ;;  %v4587_v18 = vor.u32 %v5115_v17, %v4586_v16  ;;  %v5131_v20 = vld [vmem:[#allocation5 + $0x2d4] sm:$0xf0]  ;;  %v4949_v24 = vld [vmem:[#allocation2 + $0xac] sm:$0xf]  ;;  %v3928_v25 = vld [vmem:[#allocation2 + $0xc4] sm:$0xf0]  ;;  %v5475_v30 = vor.u32 %v4952_v23, %v3926_v22 }
  0x3a   :  { %1841 = vmatpush.bf16.msrb.mxu0 %v4603_v42  ;;  %1582 = vmatmul.bf16.vlgmr.msra.gmra.mxu1 %v5441_v47  ;;  %6751 = vst [vmem:[#allocation16_spill] sm:$0xff] %v5469_v15  ;;  %v4651_v21 = vor.u32 %v5131_v20, %v4650_v19  ;;  %v3934_v26 = vld [vmem:[#allocation2 + $0xb0] sm:$0xf]  ;;  %v4953_v27 = vld [vmem:[#allocation2 + $0xc8] sm:$0xf0]  ;;  %v5477_v31 = vor.u32 %v4949_v24, %v3928_v25  ;;  %s3825_s12 = sshll.u32 %s6658_s7, 4  ;;  %s3826_s12 = int_to_ptr.hbm [resolvable:$true] %s3825_s12 }
  0x3b   :  { %1930 = vmatpush.bf16.msrb.mxu1 %v4667_v46  ;;  %1671 = vmatmul.bf16.vlgmr.msra.gmra.mxu2 %v5443_v48  ;;  %v4950_v28 = vld [vmem:[#allocation2 + $0xb4] sm:$0xf]  ;;  %v3936_v29 = vld [vmem:[#allocation2 + $0xcc] sm:$0xf0]  ;;  %v5479_v32 = vor.u32 %v4953_v27, %v3934_v26  ;;  %v3954_v34 = vld [vmem:[#allocation2 + $0xe0] sm:$0xf] }
  0x3c   :  { %1760 = vmatmul.bf16.vlgmr.msra.gmra.mxu3 %v5445_v49  ;;  %6752 = vst [vmem:[#allocation17_spill] sm:$0xff] %v5477_v31  ;;  %v5481_v33 = vor.u32 %v4950_v28, %v3936_v29  ;;  %v4959_v35 = vld [vmem:[#allocation2 + $0xf8] sm:$0xf0]  ;;  %v4956_v36 = vld [vmem:[#allocation2 + $0xe4] sm:$0xf] }
  0x3d   :  { %6753 = vst [vmem:[#allocation18_spill] sm:$0xff] %v5479_v32  ;;  %v3956_v37 = vld [vmem:[#allocation2 + $0xfc] sm:$0xf0]  ;;  %v3962_v38 = vld [vmem:[#allocation2 + $0xe8] sm:$0xf]  ;;  %v5487_v42 = vor.u32 %v4959_v35, %v3954_v34 }
  0x3e   :  { %1842 = vmatpush.bf16.msrb.mxu0 %v4595_v52  ;;  %6754 = vst [vmem:[#allocation19_spill] sm:$0xff] %v5481_v33  ;;  %v4960_v39 = vld [vmem:[#allocation2 + $0x100] sm:$0xf0]  ;;  %v4957_v40 = vld [vmem:[#allocation2 + $0xec] sm:$0xf]  ;;  %v5489_v43 = vor.u32 %v4956_v36, %v3956_v37 }
  0x3f   :  { %1931 = vmatpush.bf16.msrb.mxu1 %v4659_v55  ;;  %v3964_v41 = vld [vmem:[#allocation2 + $0x104] sm:$0xf0]  ;;  %v5491_v44 = vor.u32 %v4960_v39, %v3962_v38  ;;  %v4578_v50 = vld [vmem:[#allocation5 + $0x240] sm:$0xf]  ;;  %v3982_v56 = vld [vmem:[#allocation2 + $0x118] sm:$0xf] }
  0x40   :  { %6755 = vst [vmem:[#allocation20_spill] sm:$0xff] %v5489_v43  ;;  %v5493_v46 = vor.u32 %v4957_v40, %v3964_v41  ;;  %v5113_v51 = vld [vmem:[#allocation5 + $0x244] sm:$0xf0]  ;;  %v4642_v53 = vld [vmem:[#allocation5 + $0x2c0] sm:$0xf] }
  0x41   :  { %6756 = vst [vmem:[#allocation21_spill] sm:$0xff] %v5491_v44  ;;  %v4579_v52 = vor.u32 %v5113_v51, %v4578_v50  ;;  %v5129_v54 = vld [vmem:[#allocation5 + $0x2c4] sm:$0xf0]  ;;  %v4966_v57 = vld [vmem:[#allocation2 + $0x130] sm:$0xf0] }
  0x42   :  { %1843 = vmatpush.bf16.msrb.mxu0 %v4587_v18  ;;  %6757 = vst [vmem:[#allocation22_spill] sm:$0xff] %v5493_v46  ;;  %v4643_v55 = vor.u32 %v5129_v54, %v4642_v53  ;;  %v4963_v58 = vld [vmem:[#allocation2 + $0x11c] sm:$0xf]  ;;  %v3984_v59 = vld [vmem:[#allocation2 + $0x134] sm:$0xf0]  ;;  %v5499_v4 = vor.u32 %v4966_v57, %v3982_v56 }
  0x43   :  { %1932 = vmatpush.bf16.msrb.mxu1 %v4651_v21  ;;  %v3990_v60 = vld [vmem:[#allocation2 + $0x120] sm:$0xf]  ;;  %v4967_v61 = vld [vmem:[#allocation2 + $0x138] sm:$0xf0]  ;;  %v4964_v62 = vld [vmem:[#allocation2 + $0x124] sm:$0xf]  ;;  %v5501_v5 = vor.u32 %v4963_v58, %v3984_v59 }
  0x44   :  { %v3992_v63 = vld [vmem:[#allocation2 + $0x13c] sm:$0xf0]  ;;  %v5503_v6 = vor.u32 %v4967_v61, %v3990_v60  ;;  %v4010_v8 = vld [vmem:[#allocation2 + $0x150] sm:$0xf]  ;;  %v4973_v9 = vld [vmem:[#allocation2 + $0x168] sm:$0xf0] }
  0x45   :  { %6758 = vst [vmem:[#allocation23_spill] sm:$0xff] %v5501_v5  ;;  %v5505_v7 = vor.u32 %v4964_v62, %v3992_v63  ;;  %v4970_v10 = vld [vmem:[#allocation2 + $0x154] sm:$0xf]  ;;  %v4012_v11 = vld [vmem:[#allocation2 + $0x16c] sm:$0xf0]  ;;  %v5511_v20 = vor.u32 %v4973_v9, %v4010_v8 }
  0x46   :  { %1844 = vmatpush.bf16.msrb.mxu0 %v4579_v52  ;;  %6759 = vst [vmem:[#allocation24_spill] sm:$0xff] %v5503_v6  ;;  %v4018_v16 = vld [vmem:[#allocation2 + $0x158] sm:$0xf]  ;;  %v4974_v17 = vld [vmem:[#allocation2 + $0x170] sm:$0xf0]  ;;  %v5513_v21 = vor.u32 %v4970_v10, %v4012_v11 }
  0x47   :  { %1933 = vmatpush.bf16.msrb.mxu1 %v4643_v55  ;;  %6760 = vst [vmem:[#allocation25_spill] sm:$0xff] %v5505_v7  ;;  %v4971_v18 = vld [vmem:[#allocation2 + $0x15c] sm:$0xf]  ;;  %v4020_v19 = vld [vmem:[#allocation2 + $0x174] sm:$0xf0]  ;;  %v5515_v22 = vor.u32 %v4974_v17, %v4018_v16 }
  0x48   :  { %6761 = vst [vmem:[#allocation26_spill] sm:$0xff] %v5513_v21  ;;  %v5517_v23 = vor.u32 %v4971_v18, %v4020_v19  ;;  %v4570_v24 = vld [vmem:[#allocation5 + $0x230] sm:$0xf]  ;;  %v5111_v25 = vld [vmem:[#allocation5 + $0x234] sm:$0xf0] }
  0x49   :  { %1498 = vmatmul.bf16.gmra.mxu0 %v5451_v0  ;;  %6762 = vst [vmem:[#allocation27_spill] sm:$0xff] %v5515_v22  ;;  %v4571_v26 = vor.u32 %v5111_v25, %v4570_v24  ;;  %v4634_v27 = vld [vmem:[#allocation5 + $0x2b0] sm:$0xf]  ;;  %v5127_v28 = vld [vmem:[#allocation5 + $0x2b4] sm:$0xf0] }
  0x4a   :  { %1587 = vmatmul.bf16.gmra.mxu1 %v5453_v1  ;;  %6763 = vst [vmem:[#allocation28_spill] sm:$0xff] %v5517_v23  ;;  %v4635_v29 = vor.u32 %v5127_v28, %v4634_v27  ;;  %v4038_v34 = vld [vmem:[#allocation2 + $0x188] sm:$0xf]  ;;  %v4980_v35 = vld [vmem:[#allocation2 + $0x1a0] sm:$0xf0] }
  0x4b   :  { %1676 = vmatmul.bf16.gmra.mxu2 %v5455_v2  ;;  %1845 = vmatpush.bf16.msrb.mxu0 %v4571_v26  ;;  %v4977_v36 = vld [vmem:[#allocation2 + $0x18c] sm:$0xf]  ;;  %v4040_v37 = vld [vmem:[#allocation2 + $0x1a4] sm:$0xf0]  ;;  %v4046_v38 = vld [vmem:[#allocation2 + $0x190] sm:$0xf]  ;;  %v5523_v50 = vor.u32 %v4980_v35, %v4038_v34 }
  0x4c   :  { %1765 = vmatmul.bf16.gmra.mxu3 %v5457_v3  ;;  %1934 = vmatpush.bf16.msrb.mxu1 %v4635_v29  ;;  %v4981_v39 = vld [vmem:[#allocation2 + $0x1a8] sm:$0xf0]  ;;  %v4978_v40 = vld [vmem:[#allocation2 + $0x194] sm:$0xf]  ;;  %v4048_v41 = vld [vmem:[#allocation2 + $0x1ac] sm:$0xf0]  ;;  %v5525_v51 = vor.u32 %v4977_v36, %v4040_v37 }
  0x4d   :  { %v5527_v52 = vor.u32 %v4981_v39, %v4046_v38  ;;  %v4730_v53 = vld [vmem:[#allocation5 + $0x370] sm:$0xf]  ;;  %v5151_v54 = vld [vmem:[#allocation5 + $0x374] sm:$0xf0]  ;;  %v5529_v55 = vor.u32 %v4978_v40, %v4048_v41  ;;  %v5054_v57 = vld [vmem:[#allocation5 + $0x74] sm:$0xf] }
  0x4e   :  { %6764 = vst [vmem:[#allocation29_spill] sm:$0xff] %v5525_v51  ;;  %v4731_v56 = vor.u32 %v5151_v54, %v4730_v53  ;;  %v4348_v58 = vld [vmem:[#allocation5 + $0x78] sm:$0xf0]  ;;  %v343_v60 = vld [vmem:[#allocation7] sm:$0x3] }
  0x4f   :  { %6765 = vst [vmem:[#allocation30_spill] sm:$0xff] %v5527_v52  ;;  %v4351_v59 = vor.u32 %v5054_v57, %v4348_v58  ;;  %v5535_v61 = vperm.slane %v343_v60, 0  ;;  %v4066_v62 = vld [vmem:[#allocation2 + $0x1c0] sm:$0xf]  ;;  %v4987_v63 = vld [vmem:[#allocation2 + $0x1d8] sm:$0xf0] }
  0x50   :  { %6766 = vst [vmem:[#allocation31_spill] sm:$0xff] %v5529_v55  ;;  %2019 = vmatpush.bf16.msrb.mxu2 %v4731_v56  ;;  %v4984_v8 = vld [vmem:[#allocation2 + $0x1c4] sm:$0xf]  ;;  %v4068_v9 = vld [vmem:[#allocation2 + $0x1dc] sm:$0xf0]  ;;  %v5537_v18 = vor.u32 %v4987_v63, %v4066_v62 }
  0x51   :  { %2108 = vmatpush.bf16.msrb.mxu3 %v4351_v59  ;;  %v4074_v10 = vld [vmem:[#allocation2 + $0x1c8] sm:$0xf]  ;;  %v4988_v11 = vld [vmem:[#allocation2 + $0x1e0] sm:$0xf0]  ;;  %v4985_v16 = vld [vmem:[#allocation2 + $0x1cc] sm:$0xf]  ;;  %v5539_v24 = vor.u32 %v4984_v8, %v4068_v9 }
  0x52   :  { %v4076_v17 = vld [vmem:[#allocation2 + $0x1e4] sm:$0xf0]  ;;  %v5541_v25 = vor.u32 %v4988_v11, %v4074_v10  ;;  %v4562_v34 = vld [vmem:[#allocation5 + $0x220] sm:$0xf]  ;;  %v4094_v60 = vld [vmem:[#allocation2 + $0x1f8] sm:$0xf] }
  0x53   :  { %6767 = vst [vmem:[#allocation32_spill] sm:$0xff] %v5539_v24  ;;  %v5544_v28 = vor.u32 %v4985_v16, %v4076_v17  ;;  %v5109_v35 = vld [vmem:[#allocation5 + $0x224] sm:$0xf0]  ;;  %v4626_v37 = vld [vmem:[#allocation5 + $0x2a0] sm:$0xf] }
  0x54   :  { %6768 = vst [vmem:[#allocation33_spill] sm:$0xff] %v5541_v25  ;;  %v4563_v36 = vor.u32 %v5109_v35, %v4562_v34  ;;  %v5125_v38 = vld [vmem:[#allocation5 + $0x2a4] sm:$0xf0]  ;;  %v4994_v62 = vld [vmem:[#allocation2 + $0x210] sm:$0xf0] }
  0x55   :  { %6769 = vst [vmem:[#allocation34_spill] sm:$0xff] %v5544_v28  ;;  %v4627_v39 = vor.u32 %v5125_v38, %v4626_v37  ;;  %v4991_v63 = vld [vmem:[#allocation2 + $0x1fc] sm:$0xf]  ;;  %v4096_v8 = vld [vmem:[#allocation2 + $0x214] sm:$0xf0] }
  0x56   :  { %1846 = vmatpush.bf16.msrb.mxu0 %v4563_v36  ;;  %v4102_v9 = vld [vmem:[#allocation2 + $0x200] sm:$0xf]  ;;  %v4995_v10 = vld [vmem:[#allocation2 + $0x218] sm:$0xf0]  ;;  %v4992_v11 = vld [vmem:[#allocation2 + $0x204] sm:$0xf]  ;;  %v5555_v34 = vor.u32 %v4991_v63, %v4096_v8 }
  0x57   :  { %1935 = vmatpush.bf16.msrb.mxu1 %v4627_v39  ;;  %v4104_v16 = vld [vmem:[#allocation2 + $0x21c] sm:$0xf0]  ;;  %v5557_v35 = vor.u32 %v4995_v10, %v4102_v9  ;;  %v5149_v37 = vld [vmem:[#allocation5 + $0x364] sm:$0xf0] }
  0x58   :  { %6770 = vst [vmem:[#allocation35_spill] sm:$0xff] %v5555_v34  ;;  %v4722_v36 = vld [vmem:[#allocation5 + $0x360] sm:$0xf] }
  0x59   :  { %1503 = vmatmul.bf16.gmra.mxu0 %v5463_v12  ;;  %6771 = vst [vmem:[#allocation36_spill] sm:$0xff] %v5557_v35 }
  0x5a   :  { %1592 = vmatmul.bf16.gmra.mxu1 %v5465_v13 }
  0x5b   :  { %1681 = vmatmul.bf16.gmra.mxu2 %v5467_v14 }
  0x5c   :  { %1770 = vmatmul.bf16.gmra.mxu3 %v5469_v15 }
  0x69   :  { %1508 = vmatmul.bf16.gmra.mxu0 %v5475_v30 }
  0x6a   :  { %1597 = vmatmul.bf16.gmra.mxu1 %v5477_v31 }
  0x6b   :  { %1686 = vmatmul.bf16.gmra.mxu2 %v5479_v32 }
  0x6c   :  { %1775 = vmatmul.bf16.gmra.mxu3 %v5481_v33 }
  0x79   :  { %1513 = vmatmul.bf16.gmra.mxu0 %v5487_v42 }
  0x7a   :  { %1602 = vmatmul.bf16.gmra.mxu1 %v5489_v43 }
  0x7b   :  { %1691 = vmatmul.bf16.gmra.mxu2 %v5491_v44  ;;  %v4292_v44 = vld [vmem:[#allocation5 + $0x8] sm:$0xf0] }
  0x7c   :  { %1780 = vmatmul.bf16.gmra.mxu3 %v5493_v46  ;;  %v5040_v46 = vld [vmem:[#allocation5 + $0x4] sm:$0xf] }
  0x7d   :  { %v4295_v43 = vor.u32 %v5040_v46, %v4292_v44 }
  0x89   :  { %1518 = vmatmul.bf16.gmra.mxu0 %v5499_v4 }
  0x8a   :  { %1607 = vmatmul.bf16.gmra.mxu1 %v5501_v5 }
  0x8b   :  { %1696 = vmatmul.bf16.gmra.mxu2 %v5503_v6 }
  0x8c   :  { %1785 = vmatmul.bf16.gmra.mxu3 %v5505_v7 }
  0x99   :  { %1523 = vmatmul.bf16.gmra.mxu0 %v5511_v20 }
  0x9a   :  { %1612 = vmatmul.bf16.gmra.mxu1 %v5513_v21 }
  0x9b   :  { %1701 = vmatmul.bf16.gmra.mxu2 %v5515_v22 }
  0x9c   :  { %1790 = vmatmul.bf16.gmra.mxu3 %v5517_v23 }
  0xa9   :  { %1528 = vmatmul.bf16.gmra.mxu0 %v5523_v50 }
  0xaa   :  { %1617 = vmatmul.bf16.gmra.mxu1 %v5525_v51 }
  0xab   :  { %1706 = vmatmul.bf16.gmra.mxu2 %v5527_v52  ;;  %v5020_v52 = vld [vmem:[#allocation2 + $0x2e4] sm:$0xf] }
  0xac   :  { %1795 = vmatmul.bf16.gmra.mxu3 %v5529_v55 }
  0xb6   :  { %v1494_v19 = vpop.f32.mrf.mxu0 }
  0xb7   :  { %v1495_v26 = vadd.f32 %v1494_v19, %v5535_v61  ;;  %v1583_v27 = vpop.f32.mrf.mxu1  ;;  %v5553_v19 = vor.u32 %v4994_v62, %v4094_v60 }
  0xb9   :  { %v1584_v29 = vadd.f32 %v1583_v27, %v1495_v26  ;;  %1533 = vmatmul.bf16.gmra.mxu0 %v5537_v18 }
  0xba   :  { %1622 = vmatmul.bf16.gmra.mxu1 %v5539_v24 }
  0xbb   :  { %1711 = vmatmul.bf16.gmra.mxu2 %v5541_v25 }
  0xbc   :  { %1800 = vmatmul.bf16.gmra.mxu3 %v5544_v28 }
  0xbe   :  { %v1672_v40 = vpop.f32.mrf.mxu2  ;;  %v1496_v53 = vpop.f32.mrf.mxu0 }
  0xbf   :  { %v1673_v41 = vadd.f32 %v1672_v40, %v1584_v29  ;;  %v1761_v54 = vpop.f32.mrf.mxu3  ;;  %v1497_v56 = vadd.f32 %v1496_v53, %v5535_v61  ;;  %v1585_v57 = vpop.f32.mrf.mxu1  ;;  %v5560_v40 = vor.u32 %v4992_v11, %v4104_v16 }
  0xc1   :  { %v5551_v58 = vadd.f32 %v1761_v54, %v1673_v41  ;;  %v1586_v59 = vadd.f32 %v1585_v57, %v1497_v56  ;;  %6772 = vst [vmem:[#allocation37_spill] sm:$0xff] %v5560_v40  ;;  %v4723_v41 = vor.u32 %v5149_v37, %v4722_v36  ;;  %v5052_v56 = vld [vmem:[#allocation5 + $0x64] sm:$0xf]  ;;  %v4340_v57 = vld [vmem:[#allocation5 + $0x68] sm:$0xf0] }
  0xc2   :  { %v4130_v36 = vld [vmem:[#allocation2 + $0x238] sm:$0xf]  ;;  %v5002_v37 = vld [vmem:[#allocation2 + $0x250] sm:$0xf0] }
  0xc3   :  { %2020 = vmatpush.bf16.msrb.mxu2 %v4723_v41 }
  0xc6   :  { %v1674_v17 = vpop.f32.mrf.mxu2  ;;  %v1499_v27 = vpop.f32.mrf.mxu0 }
  0xc7   :  { %v1675_v26 = vadd.f32 %v1674_v17, %v1586_v59  ;;  %v1763_v29 = vpop.f32.mrf.mxu3  ;;  %v1500_v38 = vadd.f32 %v1499_v27, %v5535_v61  ;;  %v1588_v39 = vpop.f32.mrf.mxu1  ;;  %v4343_v59 = vor.u32 %v5052_v56, %v4340_v57  ;;  %v4122_v17 = vld [vmem:[#allocation2 + $0x230] sm:$0xf]  ;;  %v4998_v27 = vld [vmem:[#allocation2 + $0x234] sm:$0xf] }
  0xc9   :  { %v5562_v53 = vadd.f32 %v1763_v29, %v1675_v26  ;;  %v1589_v54 = vadd.f32 %v1588_v39, %v1500_v38  ;;  %1538 = vmatmul.bf16.gmra.mxu0 %v5553_v19  ;;  %2109 = vmatpush.bf16.msrb.mxu3 %v4343_v59  ;;  %v5001_v26 = vld [vmem:[#allocation2 + $0x248] sm:$0xf0]  ;;  %v4124_v29 = vld [vmem:[#allocation2 + $0x24c] sm:$0xf0]  ;;  %v4999_v38 = vld [vmem:[#allocation2 + $0x23c] sm:$0xf] }
  0xca   :  { %1627 = vmatmul.bf16.gmra.mxu1 %v5555_v34  ;;  %v4132_v39 = vld [vmem:[#allocation2 + $0x254] sm:$0xf0]  ;;  %v5571_v56 = vor.u32 %v5001_v26, %v4122_v17 }
  0xcb   :  { %1716 = vmatmul.bf16.gmra.mxu2 %v5557_v35  ;;  %v5107_v17 = vld [vmem:[#allocation5 + $0x214] sm:$0xf0]  ;;  %v5006_v35 = vld [vmem:[#allocation2 + $0x274] sm:$0xf] }
  0xcc   :  { %1805 = vmatmul.bf16.gmra.mxu3 %v5560_v40 }
  0xce   :  { %v1677_v60 = vpop.f32.mrf.mxu2  ;;  %v1501_v63 = vpop.f32.mrf.mxu0 }
  0xcf   :  { %v1678_v62 = vadd.f32 %v1677_v60, %v1589_v54  ;;  %v1766_v8 = vpop.f32.mrf.mxu3  ;;  %v1502_v9 = vadd.f32 %v1501_v63, %v5535_v61  ;;  %v1590_v10 = vpop.f32.mrf.mxu1  ;;  %v5573_v60 = vor.u32 %v4998_v27, %v4124_v29  ;;  %v5575_v63 = vor.u32 %v5002_v37, %v4130_v36  ;;  %v4618_v27 = vld [vmem:[#allocation5 + $0x290] sm:$0xf]  ;;  %v5123_v29 = vld [vmem:[#allocation5 + $0x294] sm:$0xf0] }
  0xd0   :  { %v4619_v36 = vor.u32 %v5123_v29, %v4618_v27  ;;  %v4160_v27 = vld [vmem:[#allocation2 + $0x28c] sm:$0xf0] }
  0xd1   :  { %v5569_v11 = vadd.f32 %v1766_v8, %v1678_v62  ;;  %v1591_v16 = vadd.f32 %v1590_v10, %v1502_v9  ;;  %6773 = vst [vmem:[#allocation38_spill] sm:$0xff] %v5573_v60  ;;  %v5578_v9 = vor.u32 %v4999_v38, %v4132_v39  ;;  %v5596_v28 = vor.u32 %v5006_v35, %v4160_v27 }
  0xd2   :  { %6774 = vst [vmem:[#allocation39_spill] sm:$0xff] %v5575_v63  ;;  %1936 = vmatpush.bf16.msrb.mxu1 %v4619_v36 }
  0xd3   :  { %6775 = vst [vmem:[#allocation40_spill] sm:$0xff] %v5578_v9 }
  0xd4   :  { %6778 = vst [vmem:[#allocation43_spill] sm:$0xff] %v5596_v28 }
  0xd6   :  { %v1679_v41 = vpop.f32.mrf.mxu2  ;;  %v1504_v57 = vpop.f32.mrf.mxu0 }
  0xd7   :  { %v1680_v54 = vadd.f32 %v1679_v41, %v1591_v16  ;;  %v1768_v59 = vpop.f32.mrf.mxu3  ;;  %v1505_v62 = vadd.f32 %v1504_v57, %v5535_v61  ;;  %v1593_v8 = vpop.f32.mrf.mxu1  ;;  %v4554_v16 = vld [vmem:[#allocation5 + $0x210] sm:$0xf] }
  0xd8   :  { %v4555_v26 = vor.u32 %v5107_v17, %v4554_v16  ;;  %v4158_v16 = vld [vmem:[#allocation2 + $0x270] sm:$0xf]  ;;  %v5009_v17 = vld [vmem:[#allocation2 + $0x288] sm:$0xf0] }
  0xd9   :  { %v5580_v10 = vadd.f32 %v1768_v59, %v1680_v54  ;;  %v1594_v40 = vadd.f32 %v1593_v8, %v1505_v62  ;;  %1543 = vmatmul.bf16.gmra.mxu0 %v5571_v56  ;;  %v4150_v8 = vld [vmem:[#allocation2 + $0x268] sm:$0xf] }
  0xda   :  { %1632 = vmatmul.bf16.gmra.mxu1 %v5573_v60  ;;  %1847 = vmatpush.bf16.msrb.mxu0 %v4555_v26  ;;  %v5005_v60 = vld [vmem:[#allocation2 + $0x26c] sm:$0xf] }
  0xdb   :  { %1721 = vmatmul.bf16.gmra.mxu2 %v5575_v63  ;;  %v5008_v63 = vld [vmem:[#allocation2 + $0x280] sm:$0xf0] }
  0xdc   :  { %1810 = vmatmul.bf16.gmra.mxu3 %v5578_v9  ;;  %v4152_v9 = vld [vmem:[#allocation2 + $0x284] sm:$0xf0]  ;;  %v5589_v26 = vor.u32 %v5008_v63, %v4150_v8  ;;  %v5050_v63 = vld [vmem:[#allocation5 + $0x54] sm:$0xf] }
  0xdd   :  { %v5591_v34 = vor.u32 %v5005_v60, %v4152_v9 }
  0xde   :  { %v1682_v37 = vpop.f32.mrf.mxu2  ;;  %v1506_v39 = vpop.f32.mrf.mxu0 }
  0xdf   :  { %v1683_v38 = vadd.f32 %v1682_v37, %v1594_v40  ;;  %v1771_v41 = vpop.f32.mrf.mxu3  ;;  %v1507_v54 = vadd.f32 %v1506_v39, %v5535_v61  ;;  %v1595_v57 = vpop.f32.mrf.mxu1  ;;  %6776 = vst [vmem:[#allocation41_spill] sm:$0xff] %v5591_v34  ;;  %v5593_v39 = vor.u32 %v5009_v17, %v4158_v16 }
  0xe1   :  { %v5587_v59 = vadd.f32 %v1771_v41, %v1683_v38  ;;  %v1596_v62 = vadd.f32 %v1595_v57, %v1507_v54  ;;  %6777 = vst [vmem:[#allocation42_spill] sm:$0xff] %v5593_v39  ;;  %v4714_v38 = vld [vmem:[#allocation5 + $0x350] sm:$0xf]  ;;  %v5147_v41 = vld [vmem:[#allocation5 + $0x354] sm:$0xf0] }
  0xe2   :  { %v4715_v25 = vor.u32 %v5147_v41, %v4714_v38  ;;  %v4180_v38 = vld [vmem:[#allocation2 + $0x2bc] sm:$0xf0]  ;;  %v4186_v41 = vld [vmem:[#allocation2 + $0x2a8] sm:$0xf] }
  0xe4   :  { %2021 = vmatpush.bf16.msrb.mxu2 %v4715_v25 }
  0xe6   :  { %v1684_v29 = vpop.f32.mrf.mxu2  ;;  %v1509_v37 = vpop.f32.mrf.mxu0 }
  0xe7   :  { %v1685_v40 = vadd.f32 %v1684_v29, %v1596_v62  ;;  %v1773_v36 = vpop.f32.mrf.mxu3  ;;  %v1510_v54 = vadd.f32 %v1509_v37, %v5535_v61  ;;  %v1598_v57 = vpop.f32.mrf.mxu1  ;;  %v4332_v62 = vld [vmem:[#allocation5 + $0x58] sm:$0xf0] }
  0xe8   :  { %v4335_v60 = vor.u32 %v5050_v63, %v4332_v62  ;;  %v5015_v37 = vld [vmem:[#allocation2 + $0x2b8] sm:$0xf0]  ;;  %v4188_v63 = vld [vmem:[#allocation2 + $0x2c4] sm:$0xf0] }
  0xe9   :  { %v5598_v24 = vadd.f32 %v1773_v36, %v1685_v40  ;;  %v1599_v55 = vadd.f32 %v1598_v57, %v1510_v54  ;;  %1548 = vmatmul.bf16.gmra.mxu0 %v5589_v26  ;;  %v4178_v40 = vld [vmem:[#allocation2 + $0x2a0] sm:$0xf]  ;;  %v5012_v36 = vld [vmem:[#allocation2 + $0x2a4] sm:$0xf]  ;;  %v5013_v57 = vld [vmem:[#allocation2 + $0x2ac] sm:$0xf] }
  0xea   :  { %1637 = vmatmul.bf16.gmra.mxu1 %v5591_v34  ;;  %2110 = vmatpush.bf16.msrb.mxu3 %v4335_v60  ;;  %v5016_v54 = vld [vmem:[#allocation2 + $0x2c0] sm:$0xf0]  ;;  %v5607_v60 = vor.u32 %v5015_v37, %v4178_v40  ;;  %v5105_v40 = vld [vmem:[#allocation5 + $0x204] sm:$0xf0] }
  0xeb   :  { %1726 = vmatmul.bf16.gmra.mxu2 %v5593_v39  ;;  %v5609_v39 = vor.u32 %v5012_v36, %v4180_v38  ;;  %v4610_v36 = vld [vmem:[#allocation5 + $0x280] sm:$0xf]  ;;  %v5121_v38 = vld [vmem:[#allocation5 + $0x284] sm:$0xf0] }
  0xec   :  { %1815 = vmatmul.bf16.gmra.mxu3 %v5596_v28 }
  0xed   :  { %6779 = vst [vmem:[#allocation44_spill] sm:$0xff] %v5609_v39 }
  0xee   :  { %v1687_v9 = vpop.f32.mrf.mxu2  ;;  %v1511_v8 = vpop.f32.mrf.mxu0 }
  0xef   :  { %v1688_v35 = vadd.f32 %v1687_v9, %v1599_v55  ;;  %v1776_v16 = vpop.f32.mrf.mxu3  ;;  %v1512_v17 = vadd.f32 %v1511_v8, %v5535_v61  ;;  %v1600_v27 = vpop.f32.mrf.mxu1  ;;  %v5611_v8 = vor.u32 %v5016_v54, %v4186_v41  ;;  %v4611_v41 = vor.u32 %v5121_v38, %v4610_v36  ;;  %v4216_v36 = vld [vmem:[#allocation2 + $0x2fc] sm:$0xf0] }
  0xf0   :  { %v4706_v38 = vld [vmem:[#allocation5 + $0x340] sm:$0xf]  ;;  %v5632_v7 = vor.u32 %v5020_v52, %v4216_v36 }
  0xf1   :  { %v5605_v29 = vadd.f32 %v1776_v16, %v1688_v35  ;;  %v1601_v25 = vadd.f32 %v1600_v27, %v1512_v17  ;;  %6780 = vst [vmem:[#allocation45_spill] sm:$0xff] %v5611_v8  ;;  %v5614_v17 = vor.u32 %v5013_v57, %v4188_v63  ;;  %1937 = vmatpush.bf16.msrb.mxu1 %v4611_v41 }
  0xf2   :  { %6784 = vst [vmem:[#allocation49_spill] sm:$0xff] %v5632_v7 }
  0xf3   :  { %6781 = vst [vmem:[#allocation46_spill] sm:$0xff] %v5614_v17 }
  0xf6   :  { %v1689_v62 = vpop.f32.mrf.mxu2  ;;  %v1514_v9 = vpop.f32.mrf.mxu0 }
  0xf7   :  { %v1690_v55 = vadd.f32 %v1689_v62, %v1601_v25  ;;  %v1778_v28 = vpop.f32.mrf.mxu3  ;;  %v1515_v35 = vadd.f32 %v1514_v9, %v5535_v61  ;;  %v1603_v16 = vpop.f32.mrf.mxu1  ;;  %v4546_v25 = vld [vmem:[#allocation5 + $0x200] sm:$0xf] }
  0xf8   :  { %v4547_v37 = vor.u32 %v5105_v40, %v4546_v25  ;;  %v4214_v25 = vld [vmem:[#allocation2 + $0x2e0] sm:$0xf]  ;;  %v5023_v40 = vld [vmem:[#allocation2 + $0x2f8] sm:$0xf0] }
  0xf9   :  { %v5616_v27 = vadd.f32 %v1778_v28, %v1690_v55  ;;  %v1604_v34 = vadd.f32 %v1603_v16, %v1515_v35  ;;  %1553 = vmatmul.bf16.gmra.mxu0 %v5607_v60  ;;  %v4206_v16 = vld [vmem:[#allocation2 + $0x2d8] sm:$0xf] }
  0xfa   :  { %1642 = vmatmul.bf16.gmra.mxu1 %v5609_v39  ;;  %1848 = vmatpush.bf16.msrb.mxu0 %v4547_v37  ;;  %v5019_v39 = vld [vmem:[#allocation2 + $0x2dc] sm:$0xf]  ;;  %v5145_v37 = vld [vmem:[#allocation5 + $0x344] sm:$0xf0] }
  0xfb   :  { %1731 = vmatmul.bf16.gmra.mxu2 %v5611_v8  ;;  %v5022_v8 = vld [vmem:[#allocation2 + $0x2f0] sm:$0xf0]  ;;  %v4707_v41 = vor.u32 %v5145_v37, %v4706_v38  ;;  %v5044_v38 = vld [vmem:[#allocation5 + $0x24] sm:$0xf]  ;;  %v4308_v37 = vld [vmem:[#allocation5 + $0x28] sm:$0xf0] }
  0xfc   :  { %1820 = vmatmul.bf16.gmra.mxu3 %v5614_v17  ;;  %v4208_v17 = vld [vmem:[#allocation2 + $0x2f4] sm:$0xf0] }
  0xfd   :  { %2022 = vmatpush.bf16.msrb.mxu2 %v4707_v41 }
  0xfe   :  { %v1692_v54 = vpop.f32.mrf.mxu2  ;;  %v1516_v28 = vpop.f32.mrf.mxu0 }
  0xff   :  { %v1693_v57 = vadd.f32 %v1692_v54, %v1604_v34  ;;  %v1781_v63 = vpop.f32.mrf.mxu3  ;;  %v1517_v62 = vadd.f32 %v1516_v28, %v5535_v61  ;;  %v1605_v55 = vpop.f32.mrf.mxu1  ;;  %v5625_v54 = vor.u32 %v5022_v8, %v4206_v16  ;;  %v5046_v16 = vld [vmem:[#allocation5 + $0x34] sm:$0xf] }
 0x101   :  { %v5623_v9 = vadd.f32 %v1781_v63, %v1693_v57  ;;  %v1606_v35 = vadd.f32 %v1605_v55, %v1517_v62  ;;  %v5627_v57 = vor.u32 %v5019_v39, %v4208_v17  ;;  %v5629_v63 = vor.u32 %v5023_v40, %v4214_v25  ;;  %v5048_v62 = vld [vmem:[#allocation5 + $0x44] sm:$0xf]  ;;  %v4324_v55 = vld [vmem:[#allocation5 + $0x48] sm:$0xf0]  ;;  %v5143_v39 = vld [vmem:[#allocation5 + $0x334] sm:$0xf0] }
 0x102   :  { %v4327_v6 = vor.u32 %v5048_v62, %v4324_v55  ;;  %v4316_v25 = vld [vmem:[#allocation5 + $0x38] sm:$0xf0]  ;;  %v4690_v40 = vld [vmem:[#allocation5 + $0x320] sm:$0xf]  ;;  %v4682_v55 = vld [vmem:[#allocation5 + $0x310] sm:$0xf] }
 0x103   :  { %6782 = vst [vmem:[#allocation47_spill] sm:$0xff] %v5627_v57  ;;  %v4319_v52 = vor.u32 %v5046_v16, %v4316_v25  ;;  %v5029_v16 = vld [vmem:[#allocation2 + $0x328] sm:$0xf0]  ;;  %v5026_v25 = vld [vmem:[#allocation2 + $0x314] sm:$0xf] }
 0x104   :  { %6783 = vst [vmem:[#allocation48_spill] sm:$0xff] %v5629_v63  ;;  %2111 = vmatpush.bf16.msrb.mxu3 %v4327_v6 }
 0x106   :  { %v1694_v34 = vpop.f32.mrf.mxu2  ;;  %v1519_v28 = vpop.f32.mrf.mxu0 }
 0x107   :  { %v1695_v51 = vadd.f32 %v1694_v34, %v1606_v35  ;;  %v1783_v23 = vpop.f32.mrf.mxu3  ;;  %v1520_v22 = vadd.f32 %v1519_v28, %v5535_v61  ;;  %v1608_v21 = vpop.f32.mrf.mxu1  ;;  %v4698_v35 = vld [vmem:[#allocation5 + $0x330] sm:$0xf]  ;;  %v4311_v28 = vor.u32 %v5044_v38, %v4308_v37 }
 0x108   :  { %v4699_v17 = vor.u32 %v5143_v39, %v4698_v35  ;;  %2112 = vmatpush.bf16.msrb.mxu3 %v4319_v52  ;;  %v5139_v35 = vld [vmem:[#allocation5 + $0x314] sm:$0xf0] }
 0x109   :  { %v5634_v5 = vadd.f32 %v1783_v23, %v1695_v51  ;;  %v1609_v8 = vadd.f32 %v1608_v21, %v1520_v22  ;;  %1558 = vmatmul.bf16.gmra.mxu0 %v5625_v54  ;;  %v5141_v23 = vld [vmem:[#allocation5 + $0x324] sm:$0xf0]  ;;  %v4683_v52 = vor.u32 %v5139_v35, %v4682_v55 }
 0x10a   :  { %1647 = vmatmul.bf16.gmra.mxu1 %v5627_v57  ;;  %2023 = vmatpush.bf16.msrb.mxu2 %v4699_v17  ;;  %v4691_v21 = vor.u32 %v5141_v23, %v4690_v40  ;;  %v4234_v17 = vld [vmem:[#allocation2 + $0x310] sm:$0xf]  ;;  %v5042_v40 = vld [vmem:[#allocation5 + $0x14] sm:$0xf]  ;;  %v4300_v23 = vld [vmem:[#allocation5 + $0x18] sm:$0xf0] }
 0x10b   :  { %1736 = vmatmul.bf16.gmra.mxu2 %v5629_v63  ;;  %v5027_v63 = vld [vmem:[#allocation2 + $0x31c] sm:$0xf]  ;;  %v4244_v57 = vld [vmem:[#allocation2 + $0x334] sm:$0xf0]  ;;  %v5643_v38 = vor.u32 %v5029_v16, %v4234_v17 }
 0x10c   :  { %1825 = vmatmul.bf16.gmra.mxu3 %v5632_v7  ;;  %v5030_v7 = vld [vmem:[#allocation2 + $0x330] sm:$0xf0] }
 0x10d   :  { %2113 = vmatpush.bf16.msrb.mxu3 %v4311_v28 }
 0x10e   :  { %v1697_v51 = vpop.f32.mrf.mxu2  ;;  %v1521_v6 = vpop.f32.mrf.mxu0  ;;  %2024 = vmatpush.bf16.msrb.mxu2 %v4691_v21 }
 0x10f   :  { %v1698_v22 = vadd.f32 %v1697_v51, %v1609_v8  ;;  %v1786_v36 = vpop.f32.mrf.mxu3  ;;  %v1522_v34 = vadd.f32 %v1521_v6, %v5535_v61  ;;  %v1610_v41 = vpop.f32.mrf.mxu1  ;;  %v4236_v8 = vld [vmem:[#allocation2 + $0x32c] sm:$0xf0]  ;;  %v4242_v51 = vld [vmem:[#allocation2 + $0x318] sm:$0xf]  ;;  %v4303_v6 = vor.u32 %v5042_v40, %v4300_v23 }
 0x110   :  { %v5645_v55 = vor.u32 %v5026_v25, %v4236_v8  ;;  %v5647_v35 = vor.u32 %v5030_v7, %v4242_v51  ;;  %v5070_v7 = vld [vmem:[#allocation5 + $0xf4] sm:$0xf] }
 0x111   :  { %v5641_v62 = vadd.f32 %v1786_v36, %v1698_v22  ;;  %v1611_v39 = vadd.f32 %v1610_v41, %v1522_v34  ;;  %v4674_v22 = vld [vmem:[#allocation5 + $0x300] sm:$0xf]  ;;  %v5137_v36 = vld [vmem:[#allocation5 + $0x304] sm:$0xf0]  ;;  %2114 = vmatpush.bf16.msrb.mxu3 %v4303_v6  ;;  %v5086_v25 = vld [vmem:[#allocation5 + $0x174] sm:$0xf] }
 0x112   :  { %2025 = vmatpush.bf16.msrb.mxu2 %v4683_v52  ;;  %v4675_v37 = vor.u32 %v5137_v36, %v4674_v22  ;;  %6785 = vst [vmem:[#allocation50_spill] sm:$0xff] %v5645_v55  ;;  %v5650_v52 = vor.u32 %v5027_v63, %v4244_v57  ;;  %v4476_v57 = vld [vmem:[#allocation5 + $0x178] sm:$0xf0] }
 0x113   :  { %6786 = vst [vmem:[#allocation51_spill] sm:$0xff] %v5647_v35  ;;  %v4479_v63 = vor.u32 %v5086_v25, %v4476_v57 }
 0x114   :  { %6787 = vst [vmem:[#allocation52_spill] sm:$0xff] %v5650_v52 }
 0x115   :  { %2115 = vmatpush.bf16.msrb.mxu3 %v4295_v43  ;;  %2286 = vmatpush.bf16.msra.mxu1 %v4479_v63 }
 0x116   :  { %v1699_v21 = vpop.f32.mrf.mxu2  ;;  %v1524_v41 = vpop.f32.mrf.mxu0  ;;  %2026 = vmatpush.bf16.msrb.mxu2 %v4675_v37  ;;  %v5036_v37 = vld [vmem:[#allocation2 + $0x360] sm:$0xf0] }
 0x117   :  { %v1700_v34 = vadd.f32 %v1699_v21, %v1611_v39  ;;  %v1788_v28 = vpop.f32.mrf.mxu3  ;;  %v1525_v40 = vadd.f32 %v1524_v41, %v5535_v61  ;;  %v1613_v23 = vpop.f32.mrf.mxu1  ;;  %v4412_v39 = vld [vmem:[#allocation5 + $0xf8] sm:$0xf0]  ;;  %v4262_v21 = vld [vmem:[#allocation2 + $0x348] sm:$0xf] }
 0x118   :  { %v4415_v16 = vor.u32 %v5070_v7, %v4412_v39  ;;  %v4264_v41 = vld [vmem:[#allocation2 + $0x364] sm:$0xf0]  ;;  %v4272_v7 = vld [vmem:[#allocation2 + $0x36c] sm:$0xf0] }
 0x119   :  { %v5652_v33 = vadd.f32 %v1788_v28, %v1700_v34  ;;  %v1614_v17 = vadd.f32 %v1613_v23, %v1525_v40  ;;  %1563 = vmatmul.bf16.gmra.mxu0 %v5643_v38  ;;  %v5033_v34 = vld [vmem:[#allocation2 + $0x34c] sm:$0xf]  ;;  %v4270_v28 = vld [vmem:[#allocation2 + $0x350] sm:$0xf]  ;;  %v5034_v23 = vld [vmem:[#allocation2 + $0x354] sm:$0xf] }
 0x11a   :  { %1652 = vmatmul.bf16.gmra.mxu1 %v5645_v55  ;;  %2197 = vmatpush.bf16.msra.mxu0 %v4415_v16  ;;  %v5037_v40 = vld [vmem:[#allocation2 + $0x368] sm:$0xf0]  ;;  %v5661_v16 = vor.u32 %v5036_v37, %v4262_v21  ;;  %v5663_v63 = vor.u32 %v5033_v34, %v4264_v41 }
 0x11b   :  { %1741 = vmatmul.bf16.gmra.mxu2 %v5647_v35  ;;  %v4937_v35 = vld [vmem:[#allocation2 + $0x4c] sm:$0xf] }
 0x11c   :  { %1830 = vmatmul.bf16.gmra.mxu3 %v5650_v52  ;;  %6788 = vst [vmem:[#allocation53_spill] sm:$0xff] %v5663_v63 }
 0x11e   :  { %v1702_v44 = vpop.f32.mrf.mxu2  ;;  %v1526_v8 = vpop.f32.mrf.mxu0 }
 0x11f   :  { %v1703_v46 = vadd.f32 %v1702_v44, %v1614_v17  ;;  %v1791_v51 = vpop.f32.mrf.mxu3  ;;  %v1527_v43 = vadd.f32 %v1526_v8, %v5535_v61  ;;  %v1615_v6 = vpop.f32.mrf.mxu1  ;;  %v5665_v44 = vor.u32 %v5037_v40, %v4270_v28 }
 0x121   :  { %v5659_v22 = vadd.f32 %v1791_v51, %v1703_v46  ;;  %v1616_v36 = vadd.f32 %v1615_v6, %v1527_v43  ;;  %6789 = vst [vmem:[#allocation54_spill] sm:$0xff] %v5665_v44  ;;  %v5668_v51 = vor.u32 %v5034_v23, %v4272_v7  ;;  %v3858_v7 = vld [vmem:[#allocation2 + $0x10] sm:$0xf] }
 0x123   :  { %6790 = vst [vmem:[#allocation55_spill] sm:$0xff] %v5668_v51 }
 0x126   :  { %v1704_v39 = vpop.f32.mrf.mxu2  ;;  %v1529_v25 = vpop.f32.mrf.mxu0 }
 0x127   :  { %v1705_v17 = vadd.f32 %v1704_v39, %v1616_v36  ;;  %v1793_v57 = vpop.f32.mrf.mxu3  ;;  %v1530_v46 = vadd.f32 %v1529_v25, %v5535_v61  ;;  %v1618_v8 = vpop.f32.mrf.mxu1  ;;  %v4933_v39 = vld [vmem:[#allocation2 + $0x28] sm:$0xf0]  ;;  %v3860_v25 = vld [vmem:[#allocation2 + $0x2c] sm:$0xf0] }
 0x129   :  { %v5670_v43 = vadd.f32 %v1793_v57, %v1705_v17  ;;  %v1619_v6 = vadd.f32 %v1618_v8, %v1530_v46  ;;  %1568 = vmatmul.bf16.gmra.mxu0 %v5661_v16  ;;  %v4930_v17 = vld [vmem:[#allocation2 + $0x14] sm:$0xf]  ;;  %v3866_v57 = vld [vmem:[#allocation2 + $0x18] sm:$0xf] }
 0x12a   :  { %1657 = vmatmul.bf16.gmra.mxu1 %v5663_v63  ;;  %v4934_v46 = vld [vmem:[#allocation2 + $0x30] sm:$0xf0] }
 0x12b   :  { %1746 = vmatmul.bf16.gmra.mxu2 %v5665_v44  ;;  %v5679_v44 = vor.u32 %v4933_v39, %v3858_v7  ;;  %v5683_v52 = vor.u32 %v4934_v46, %v3866_v57  ;;  %v5084_v39 = vld [vmem:[#allocation5 + $0x164] sm:$0xf] }
 0x12c   :  { %1835 = vmatmul.bf16.gmra.mxu3 %v5668_v51 }
 0x12d   :  { %6792 = vst [vmem:[#allocation57_spill] sm:$0xff] %v5683_v52 }
 0x12e   :  { %v1707_v36 = vpop.f32.mrf.mxu2  ;;  %v1531_v37 = vpop.f32.mrf.mxu0 }
 0x12f   :  { %v1708_v21 = vadd.f32 %v1707_v36, %v1619_v6  ;;  %v1796_v34 = vpop.f32.mrf.mxu3  ;;  %v1532_v41 = vadd.f32 %v1531_v37, %v5535_v61  ;;  %v1620_v28 = vpop.f32.mrf.mxu1  ;;  %v5681_v36 = vor.u32 %v4930_v17, %v3860_v25  ;;  %v4468_v17 = vld [vmem:[#allocation5 + $0x168] sm:$0xf0] }
 0x130   :  { %v4471_v25 = vor.u32 %v5084_v39, %v4468_v17 }
 0x131   :  { %v5677_v40 = vadd.f32 %v1796_v34, %v1708_v21  ;;  %v1621_v23 = vadd.f32 %v1620_v28, %v1532_v41  ;;  %6791 = vst [vmem:[#allocation56_spill] sm:$0xff] %v5681_v36  ;;  %v5068_v28 = vld [vmem:[#allocation5 + $0xe4] sm:$0xf] }
 0x132   :  { %2287 = vmatpush.bf16.msra.mxu1 %v4471_v25 }
 0x136   :  { %v1709_v8 = vpop.f32.mrf.mxu2  ;;  %v1534_v63 = vpop.f32.mrf.mxu0 }
 0x137   :  { %v1710_v51 = vadd.f32 %v1709_v8, %v1621_v23  ;;  %v1798_v6 = vpop.f32.mrf.mxu3  ;;  %v1535_v21 = vadd.f32 %v1534_v63, %v5535_v61  ;;  %v1623_v37 = vpop.f32.mrf.mxu1  ;;  %v4404_v23 = vld [vmem:[#allocation5 + $0xe8] sm:$0xf0] }
 0x138   :  { %v4407_v7 = vor.u32 %v5068_v28, %v4404_v23  ;;  %v3894_v28 = vld [vmem:[#allocation2 + $0x50] sm:$0xf]  ;;  %v4941_v23 = vld [vmem:[#allocation2 + $0x68] sm:$0xf0] }
 0x139   :  { %v5686_v34 = vadd.f32 %v1798_v6, %v1710_v51  ;;  %v1624_v41 = vadd.f32 %v1623_v37, %v1535_v21  ;;  %1849 = vmatmul.bf16.vlgmr.msrb.gmra.mxu0 %v5679_v44  ;;  %v5699_v25 = vor.u32 %v4941_v23, %v3894_v28  ;;  %v3914_v23 = vld [vmem:[#allocation2 + $0x80] sm:$0xf] }
 0x13a   :  { %1938 = vmatmul.bf16.vlgmr.msrb.gmra.mxu1 %v5681_v36  ;;  %2198 = vmatpush.bf16.msra.mxu0 %v4407_v7  ;;  %v4940_v36 = vld [vmem:[#allocation2 + $0x60] sm:$0xf0] }
 0x13b   :  { %2027 = vmatmul.bf16.vlgmr.msrb.gmra.mxu2 %v5683_v52  ;;  %v3886_v52 = vld [vmem:[#allocation2 + $0x48] sm:$0xf]  ;;  %6794 = vst [vmem:[#allocation59_spill] sm:$0xff] %v5699_v25 }
 0x13c   :  { %2116 = vmatmul.bf16.vlgmr.msrb.gmra.mxu3 %v5439_v45  ;;  %v3888_v45 = vld [vmem:[#allocation2 + $0x64] sm:$0xf0]  ;;  %v5695_v39 = vor.u32 %v4940_v36, %v3886_v52 }
 0x13e   :  { %v1712_v57 = vpop.f32.mrf.mxu2  ;;  %v1536_v51 = vpop.f32.mrf.mxu0 }
 0x13f   :  { %v1713_v63 = vadd.f32 %v1712_v57, %v1624_v41  ;;  %v1801_v46 = vpop.f32.mrf.mxu3  ;;  %v1537_v8 = vadd.f32 %v1536_v51, %v5535_v61  ;;  %v1625_v6 = vpop.f32.mrf.mxu1  ;;  %v5697_v57 = vor.u32 %v4937_v35, %v3888_v45 }
 0x141   :  { %v5693_v21 = vadd.f32 %v1801_v46, %v1713_v63  ;;  %v1626_v37 = vadd.f32 %v1625_v6, %v1537_v8  ;;  %6793 = vst [vmem:[#allocation58_spill] sm:$0xff] %v5697_v57 }
 0x146   :  { %v1714_v55 = vpop.f32.mrf.mxu2  ;;  %v1539_v41 = vpop.f32.mrf.mxu0 }
 0x147   :  { %v1715_v7 = vadd.f32 %v1714_v55, %v1626_v37  ;;  %v1803_v17 = vpop.f32.mrf.mxu3  ;;  %v1540_v63 = vadd.f32 %v1539_v41, %v5535_v61  ;;  %v1628_v51 = vpop.f32.mrf.mxu1  ;;  %v4944_v41 = vld [vmem:[#allocation2 + $0x84] sm:$0xf] }
 0x149   :  { %v5702_v46 = vadd.f32 %v1803_v17, %v1715_v7  ;;  %v1629_v8 = vadd.f32 %v1628_v51, %v1540_v63  ;;  %1854 = vmatmul.bf16.gmra.mxu0 %v5695_v39  ;;  %v4947_v7 = vld [vmem:[#allocation2 + $0x98] sm:$0xf0]  ;;  %v3916_v17 = vld [vmem:[#allocation2 + $0x9c] sm:$0xf0]  ;;  %v3922_v63 = vld [vmem:[#allocation2 + $0x88] sm:$0xf] }
 0x14a   :  { %1943 = vmatmul.bf16.gmra.mxu1 %v5697_v57  ;;  %v4948_v51 = vld [vmem:[#allocation2 + $0xa0] sm:$0xf0] }
 0x14b   :  { %2032 = vmatmul.bf16.gmra.mxu2 %v5699_v25  ;;  %v5711_v25 = vor.u32 %v4947_v7, %v3914_v23  ;;  %v5715_v31 = vor.u32 %v4948_v51, %v3922_v63  ;;  %v5082_v23 = vld [vmem:[#allocation5 + $0x154] sm:$0xf]  ;;  %v4460_v7 = vld [vmem:[#allocation5 + $0x158] sm:$0xf0] }
 0x14c   :  { %2121 = vmatmul.bf16.gmra.mxu3 %v5451_v0 }
 0x14d   :  { %6795 = vst [vmem:[#allocation60_spill] sm:$0xff] %v5711_v25 }
 0x14e   :  { %v1717_v55 = vpop.f32.mrf.mxu2  ;;  %v1541_v35 = vpop.f32.mrf.mxu0  ;;  %6797 = vst [vmem:[#allocation62_spill] sm:$0xff] %v5715_v31 }
 0x14f   :  { %v1718_v52 = vadd.f32 %v1717_v55, %v1629_v8  ;;  %v1806_v36 = vpop.f32.mrf.mxu3  ;;  %v1542_v6 = vadd.f32 %v1541_v35, %v5535_v61  ;;  %v1630_v37 = vpop.f32.mrf.mxu1  ;;  %v5713_v55 = vor.u32 %v4944_v41, %v3916_v17  ;;  %v4463_v41 = vor.u32 %v5082_v23, %v4460_v7 }
 0x151   :  { %v5709_v45 = vadd.f32 %v1806_v36, %v1718_v52  ;;  %v1631_v28 = vadd.f32 %v1630_v37, %v1542_v6  ;;  %6796 = vst [vmem:[#allocation61_spill] sm:$0xff] %v5713_v55  ;;  %v5066_v37 = vld [vmem:[#allocation5 + $0xd4] sm:$0xf]  ;;  %2288 = vmatpush.bf16.msra.mxu1 %v4463_v41 }
 0x156   :  { %v1719_v57 = vpop.f32.mrf.mxu2  ;;  %v1544_v32 = vpop.f32.mrf.mxu0 }
 0x157   :  { %v1720_v0 = vadd.f32 %v1719_v57, %v1631_v28  ;;  %v1808_v8 = vpop.f32.mrf.mxu3  ;;  %v1545_v52 = vadd.f32 %v1544_v32, %v5535_v61  ;;  %v1633_v35 = vpop.f32.mrf.mxu1  ;;  %v4396_v57 = vld [vmem:[#allocation5 + $0xd8] sm:$0xf0] }
 0x158   :  { %v4399_v28 = vor.u32 %v5066_v37, %v4396_v57  ;;  %v3950_v37 = vld [vmem:[#allocation2 + $0xc0] sm:$0xf]  ;;  %v4955_v57 = vld [vmem:[#allocation2 + $0xd8] sm:$0xf0] }
 0x159   :  { %v5718_v36 = vadd.f32 %v1808_v8, %v1720_v0  ;;  %v1634_v6 = vadd.f32 %v1633_v35, %v1545_v52  ;;  %1859 = vmatmul.bf16.gmra.mxu0 %v5711_v25  ;;  %v4951_v25 = vld [vmem:[#allocation2 + $0xbc] sm:$0xf]  ;;  %v5731_v41 = vor.u32 %v4955_v57, %v3950_v37  ;;  %v3970_v57 = vld [vmem:[#allocation2 + $0xf0] sm:$0xf] }
 0x15a   :  { %1948 = vmatmul.bf16.gmra.mxu1 %v5713_v55  ;;  %2199 = vmatpush.bf16.msra.mxu0 %v4399_v28  ;;  %v4954_v55 = vld [vmem:[#allocation2 + $0xd0] sm:$0xf0] }
 0x15b   :  { %2037 = vmatmul.bf16.gmra.mxu2 %v5715_v31  ;;  %v3942_v31 = vld [vmem:[#allocation2 + $0xb8] sm:$0xf]  ;;  %6800 = vst [vmem:[#allocation65_spill] sm:$0xff] %v5731_v41 }
 0x15c   :  { %2126 = vmatmul.bf16.gmra.mxu3 %v5463_v12  ;;  %v3944_v12 = vld [vmem:[#allocation2 + $0xd4] sm:$0xf0]  ;;  %v5727_v23 = vor.u32 %v4954_v55, %v3942_v31 }
 0x15e   :  { %v1722_v17 = vpop.f32.mrf.mxu2  ;;  %v1546_v63 = vpop.f32.mrf.mxu0  ;;  %6798 = vst [vmem:[#allocation63_spill] sm:$0xff] %v5727_v23 }
 0x15f   :  { %v1723_v32 = vadd.f32 %v1722_v17, %v1634_v6  ;;  %v1811_v51 = vpop.f32.mrf.mxu3  ;;  %v1547_v0 = vadd.f32 %v1546_v63, %v5535_v61  ;;  %v1635_v8 = vpop.f32.mrf.mxu1  ;;  %v5729_v17 = vor.u32 %v4951_v25, %v3944_v12 }
 0x161   :  { %v5725_v52 = vadd.f32 %v1811_v51, %v1723_v32  ;;  %v1636_v35 = vadd.f32 %v1635_v8, %v1547_v0  ;;  %6799 = vst [vmem:[#allocation64_spill] sm:$0xff] %v5729_v17 }
 0x166   :  { %v1724_v15 = vpop.f32.mrf.mxu2  ;;  %v1549_v6 = vpop.f32.mrf.mxu0 }
 0x167   :  { %v1725_v28 = vadd.f32 %v1724_v15, %v1636_v35  ;;  %v1813_v7 = vpop.f32.mrf.mxu3  ;;  %v1550_v32 = vadd.f32 %v1549_v6, %v5535_v61  ;;  %v1638_v63 = vpop.f32.mrf.mxu1  ;;  %v4958_v6 = vld [vmem:[#allocation2 + $0xf4] sm:$0xf] }
 0x169   :  { %v5734_v51 = vadd.f32 %v1813_v7, %v1725_v28  ;;  %v1639_v0 = vadd.f32 %v1638_v63, %v1550_v32  ;;  %1864 = vmatmul.bf16.gmra.mxu0 %v5727_v23  ;;  %v4961_v28 = vld [vmem:[#allocation2 + $0x108] sm:$0xf0]  ;;  %v3972_v7 = vld [vmem:[#allocation2 + $0x10c] sm:$0xf0]  ;;  %v3978_v32 = vld [vmem:[#allocation2 + $0xf8] sm:$0xf] }
 0x16a   :  { %1953 = vmatmul.bf16.gmra.mxu1 %v5729_v17  ;;  %v4962_v63 = vld [vmem:[#allocation2 + $0x110] sm:$0xf0] }
 0x16b   :  { %6801 = vst [vmem:[#allocation66_spill] sm:$0xff] %v5734_v51  ;;  %2042 = vmatmul.bf16.gmra.mxu2 %v5731_v41  ;;  %v5743_v41 = vor.u32 %v4961_v28, %v3970_v57  ;;  %v5747_v51 = vor.u32 %v4962_v63, %v3978_v32  ;;  %v5080_v57 = vld [vmem:[#allocation5 + $0x144] sm:$0xf]  ;;  %v4452_v28 = vld [vmem:[#allocation5 + $0x148] sm:$0xf0] }
 0x16c   :  { %2131 = vmatmul.bf16.gmra.mxu3 %v5475_v30 }
 0x16d   :  { %6802 = vst [vmem:[#allocation67_spill] sm:$0xff] %v5743_v41 }
 0x16e   :  { %v1727_v15 = vpop.f32.mrf.mxu2  ;;  %v1551_v25 = vpop.f32.mrf.mxu0  ;;  %6804 = vst [vmem:[#allocation69_spill] sm:$0xff] %v5747_v51 }
 0x16f   :  { %v1728_v31 = vadd.f32 %v1727_v15, %v1639_v0  ;;  %v1816_v55 = vpop.f32.mrf.mxu3  ;;  %v1552_v8 = vadd.f32 %v1551_v25, %v5535_v61  ;;  %v1640_v35 = vpop.f32.mrf.mxu1  ;;  %v5745_v15 = vor.u32 %v4958_v6, %v3972_v7  ;;  %v4455_v6 = vor.u32 %v5080_v57, %v4452_v28 }
 0x171   :  { %v5741_v12 = vadd.f32 %v1816_v55, %v1728_v31  ;;  %v1641_v37 = vadd.f32 %v1640_v35, %v1552_v8  ;;  %6803 = vst [vmem:[#allocation68_spill] sm:$0xff] %v5745_v15  ;;  %v5064_v35 = vld [vmem:[#allocation5 + $0xc4] sm:$0xf]  ;;  %2289 = vmatpush.bf16.msra.mxu1 %v4455_v6 }
 0x176   :  { %v1729_v17 = vpop.f32.mrf.mxu2  ;;  %v1554_v23 = vpop.f32.mrf.mxu0 }
 0x177   :  { %v1730_v30 = vadd.f32 %v1729_v17, %v1641_v37  ;;  %v1818_v0 = vpop.f32.mrf.mxu3  ;;  %v1555_v31 = vadd.f32 %v1554_v23, %v5535_v61  ;;  %v1643_v25 = vpop.f32.mrf.mxu1  ;;  %v4388_v17 = vld [vmem:[#allocation5 + $0xc8] sm:$0xf0] }
 0x178   :  { %v4391_v37 = vor.u32 %v5064_v35, %v4388_v17  ;;  %v4006_v35 = vld [vmem:[#allocation2 + $0x130] sm:$0xf]  ;;  %v4969_v17 = vld [vmem:[#allocation2 + $0x148] sm:$0xf0] }
 0x179   :  { %v5750_v55 = vadd.f32 %v1818_v0, %v1730_v30  ;;  %v1644_v8 = vadd.f32 %v1643_v25, %v1555_v31  ;;  %1869 = vmatmul.bf16.gmra.mxu0 %v5743_v41  ;;  %v4965_v41 = vld [vmem:[#allocation2 + $0x12c] sm:$0xf]  ;;  %v5763_v6 = vor.u32 %v4969_v17, %v4006_v35  ;;  %v4026_v17 = vld [vmem:[#allocation2 + $0x160] sm:$0xf] }
 0x17a   :  { %1958 = vmatmul.bf16.gmra.mxu1 %v5745_v15  ;;  %2200 = vmatpush.bf16.msra.mxu0 %v4391_v37  ;;  %v4968_v15 = vld [vmem:[#allocation2 + $0x140] sm:$0xf0] }
 0x17b   :  { %6805 = vst [vmem:[#allocation70_spill] sm:$0xff] %v5750_v55  ;;  %2047 = vmatmul.bf16.gmra.mxu2 %v5747_v51  ;;  %v3998_v51 = vld [vmem:[#allocation2 + $0x128] sm:$0xf] }
 0x17c   :  { %2136 = vmatmul.bf16.gmra.mxu3 %v5487_v42  ;;  %v4000_v42 = vld [vmem:[#allocation2 + $0x144] sm:$0xf0]  ;;  %v5759_v57 = vor.u32 %v4968_v15, %v3998_v51  ;;  %6808 = vst [vmem:[#allocation73_spill] sm:$0xff] %v5763_v6 }
 0x17e   :  { %v1732_v7 = vpop.f32.mrf.mxu2  ;;  %v1556_v32 = vpop.f32.mrf.mxu0  ;;  %6806 = vst [vmem:[#allocation71_spill] sm:$0xff] %v5759_v57 }
 0x17f   :  { %v1733_v23 = vadd.f32 %v1732_v7, %v1644_v8  ;;  %v1821_v63 = vpop.f32.mrf.mxu3  ;;  %v1557_v30 = vadd.f32 %v1556_v32, %v5535_v61  ;;  %v1645_v0 = vpop.f32.mrf.mxu1  ;;  %v5761_v7 = vor.u32 %v4965_v41, %v4000_v42 }
 0x181   :  { %v5757_v31 = vadd.f32 %v1821_v63, %v1733_v23  ;;  %v1646_v25 = vadd.f32 %v1645_v0, %v1557_v30  ;;  %6807 = vst [vmem:[#allocation72_spill] sm:$0xff] %v5761_v7 }
 0x186   :  { %v1734_v55 = vpop.f32.mrf.mxu2  ;;  %v1559_v8 = vpop.f32.mrf.mxu0 }
 0x187   :  { %v1735_v37 = vadd.f32 %v1734_v55, %v1646_v25  ;;  %v1823_v28 = vpop.f32.mrf.mxu3  ;;  %v1560_v23 = vadd.f32 %v1559_v8, %v5535_v61  ;;  %v1648_v32 = vpop.f32.mrf.mxu1  ;;  %v4972_v8 = vld [vmem:[#allocation2 + $0x164] sm:$0xf] }
 0x189   :  { %v5766_v63 = vadd.f32 %v1823_v28, %v1735_v37  ;;  %v1649_v30 = vadd.f32 %v1648_v32, %v1560_v23  ;;  %1874 = vmatmul.bf16.gmra.mxu0 %v5759_v57  ;;  %v4975_v37 = vld [vmem:[#allocation2 + $0x178] sm:$0xf0]  ;;  %v4028_v28 = vld [vmem:[#allocation2 + $0x17c] sm:$0xf0]  ;;  %v4034_v23 = vld [vmem:[#allocation2 + $0x168] sm:$0xf] }
 0x18a   :  { %1963 = vmatmul.bf16.gmra.mxu1 %v5761_v7  ;;  %v4976_v32 = vld [vmem:[#allocation2 + $0x180] sm:$0xf0] }
 0x18b   :  { %6809 = vst [vmem:[#allocation74_spill] sm:$0xff] %v5766_v63  ;;  %2052 = vmatmul.bf16.gmra.mxu2 %v5763_v6  ;;  %v5775_v6 = vor.u32 %v4975_v37, %v4026_v17  ;;  %v5779_v63 = vor.u32 %v4976_v32, %v4034_v23  ;;  %v5078_v17 = vld [vmem:[#allocation5 + $0x134] sm:$0xf]  ;;  %v4444_v37 = vld [vmem:[#allocation5 + $0x138] sm:$0xf0] }
 0x18c   :  { %2141 = vmatmul.bf16.gmra.mxu3 %v5499_v4 }
 0x18d   :  { %6810 = vst [vmem:[#allocation75_spill] sm:$0xff] %v5775_v6 }
 0x18e   :  { %v1737_v51 = vpop.f32.mrf.mxu2  ;;  %v1561_v41 = vpop.f32.mrf.mxu0  ;;  %6812 = vst [vmem:[#allocation77_spill] sm:$0xff] %v5779_v63 }
 0x18f   :  { %v1738_v15 = vadd.f32 %v1737_v51, %v1649_v30  ;;  %v1826_v55 = vpop.f32.mrf.mxu3  ;;  %v1562_v0 = vadd.f32 %v1561_v41, %v5535_v61  ;;  %v1650_v25 = vpop.f32.mrf.mxu1  ;;  %v5777_v51 = vor.u32 %v4972_v8, %v4028_v28  ;;  %v4447_v8 = vor.u32 %v5078_v17, %v4444_v37 }
 0x191   :  { %v5773_v42 = vadd.f32 %v1826_v55, %v1738_v15  ;;  %v1651_v35 = vadd.f32 %v1650_v25, %v1562_v0  ;;  %6811 = vst [vmem:[#allocation76_spill] sm:$0xff] %v5777_v51  ;;  %v5062_v25 = vld [vmem:[#allocation5 + $0xb4] sm:$0xf]  ;;  %2290 = vmatpush.bf16.msra.mxu1 %v4447_v8 }
 0x196   :  { %v1739_v7 = vpop.f32.mrf.mxu2  ;;  %v1564_v57 = vpop.f32.mrf.mxu0 }
 0x197   :  { %v1740_v4 = vadd.f32 %v1739_v7, %v1651_v35  ;;  %v1828_v30 = vpop.f32.mrf.mxu3  ;;  %v1565_v15 = vadd.f32 %v1564_v57, %v5535_v61  ;;  %v1653_v41 = vpop.f32.mrf.mxu1  ;;  %v4380_v7 = vld [vmem:[#allocation5 + $0xb8] sm:$0xf0] }
 0x198   :  { %v4383_v35 = vor.u32 %v5062_v25, %v4380_v7  ;;  %v4062_v25 = vld [vmem:[#allocation2 + $0x1a0] sm:$0xf]  ;;  %v4983_v7 = vld [vmem:[#allocation2 + $0x1b8] sm:$0xf0] }
 0x199   :  { %v5782_v55 = vadd.f32 %v1828_v30, %v1740_v4  ;;  %v1654_v0 = vadd.f32 %v1653_v41, %v1565_v15  ;;  %1879 = vmatmul.bf16.gmra.mxu0 %v5775_v6  ;;  %v4979_v6 = vld [vmem:[#allocation2 + $0x19c] sm:$0xf]  ;;  %v5795_v8 = vor.u32 %v4983_v7, %v4062_v25 }
 0x19a   :  { %1968 = vmatmul.bf16.gmra.mxu1 %v5777_v51  ;;  %2201 = vmatpush.bf16.msra.mxu0 %v4383_v35  ;;  %v4982_v51 = vld [vmem:[#allocation2 + $0x1b0] sm:$0xf0] }
 0x19b   :  { %6813 = vst [vmem:[#allocation78_spill] sm:$0xff] %v5782_v55  ;;  %2057 = vmatmul.bf16.gmra.mxu2 %v5779_v63  ;;  %v4054_v63 = vld [vmem:[#allocation2 + $0x198] sm:$0xf] }
 0x19c   :  { %2146 = vmatmul.bf16.gmra.mxu3 %v5511_v20  ;;  %v4056_v20 = vld [vmem:[#allocation2 + $0x1b4] sm:$0xf0]  ;;  %v5791_v17 = vor.u32 %v4982_v51, %v4054_v63  ;;  %6816 = vst [vmem:[#allocation81_spill] sm:$0xff] %v5795_v8  ;;  %v5102_v63 = vld [vmem:[#allocation5 + $0x1f4] sm:$0xf] }
 0x19d   :  { %v4540_v51 = vld [vmem:[#allocation5 + $0x1f8] sm:$0xf0] }
 0x19e   :  { %v1742_v28 = vpop.f32.mrf.mxu2  ;;  %v1566_v23 = vpop.f32.mrf.mxu0  ;;  %6814 = vst [vmem:[#allocation79_spill] sm:$0xff] %v5791_v17 }
 0x19f   :  { %v1743_v57 = vadd.f32 %v1742_v28, %v1654_v0  ;;  %v1831_v32 = vpop.f32.mrf.mxu3  ;;  %v1567_v4 = vadd.f32 %v1566_v23, %v5535_v61  ;;  %v1655_v30 = vpop.f32.mrf.mxu1  ;;  %v5793_v28 = vor.u32 %v4979_v6, %v4056_v20  ;;  %v4543_v6 = vor.u32 %v5102_v63, %v4540_v51  ;;  %v4990_v63 = vld [vmem:[#allocation2 + $0x1f0] sm:$0xf0] }
 0x1a1   :  { %v5789_v15 = vadd.f32 %v1831_v32, %v1743_v57  ;;  %v1656_v41 = vadd.f32 %v1655_v30, %v1567_v4  ;;  %6815 = vst [vmem:[#allocation80_spill] sm:$0xff] %v5793_v28  ;;  %v4604_v30 = vld [vmem:[#allocation5 + $0x278] sm:$0xf0]  ;;  %2375 = vmatpush.bf16.msra.mxu2 %v4543_v6 }
 0x1a6   :  { %v1744_v55 = vpop.f32.mrf.mxu2  ;;  %v1569_v0 = vpop.f32.mrf.mxu0 }
 0x1a7   :  { %v1745_v35 = vadd.f32 %v1744_v55, %v1656_v41  ;;  %v1833_v37 = vpop.f32.mrf.mxu3  ;;  %v1570_v57 = vadd.f32 %v1569_v0, %v5535_v61  ;;  %v1658_v23 = vpop.f32.mrf.mxu1  ;;  %v5118_v55 = vld [vmem:[#allocation5 + $0x274] sm:$0xf] }
 0x1a8   :  { %v4607_v41 = vor.u32 %v5118_v55, %v4604_v30 }
 0x1a9   :  { %v5798_v32 = vadd.f32 %v1833_v37, %v1745_v35  ;;  %v1659_v4 = vadd.f32 %v1658_v23, %v1570_v57  ;;  %1884 = vmatmul.bf16.gmra.mxu0 %v5791_v17  ;;  %v4986_v17 = vld [vmem:[#allocation2 + $0x1d4] sm:$0xf] }
 0x1aa   :  { %1973 = vmatmul.bf16.gmra.mxu1 %v5793_v28  ;;  %2464 = vmatpush.bf16.msra.mxu3 %v4607_v41  ;;  %v4989_v28 = vld [vmem:[#allocation2 + $0x1e8] sm:$0xf0] }
 0x1ab   :  { %6817 = vst [vmem:[#allocation82_spill] sm:$0xff] %v5798_v32  ;;  %2062 = vmatmul.bf16.gmra.mxu2 %v5795_v8  ;;  %v4082_v8 = vld [vmem:[#allocation2 + $0x1d0] sm:$0xf] }
 0x1ac   :  { %2151 = vmatmul.bf16.gmra.mxu3 %v5523_v50  ;;  %v4084_v32 = vld [vmem:[#allocation2 + $0x1ec] sm:$0xf0]  ;;  %v4090_v50 = vld [vmem:[#allocation2 + $0x1d8] sm:$0xf]  ;;  %v5807_v55 = vor.u32 %v4989_v28, %v4082_v8  ;;  %v5060_v28 = vld [vmem:[#allocation5 + $0xa4] sm:$0xf] }
 0x1ad   :  { %v5811_v41 = vor.u32 %v4990_v63, %v4090_v50  ;;  %v4372_v8 = vld [vmem:[#allocation5 + $0xa8] sm:$0xf0] }
 0x1ae   :  { %v1747_v20 = vpop.f32.mrf.mxu2  ;;  %v1571_v7 = vpop.f32.mrf.mxu0  ;;  %6818 = vst [vmem:[#allocation83_spill] sm:$0xff] %v5807_v55 }
 0x1af   :  { %v1748_v25 = vadd.f32 %v1747_v20, %v1659_v4  ;;  %v1836_v35 = vpop.f32.mrf.mxu3  ;;  %v1572_v0 = vadd.f32 %v1571_v7, %v5535_v61  ;;  %v1660_v37 = vpop.f32.mrf.mxu1  ;;  %v5809_v20 = vor.u32 %v4986_v17, %v4084_v32  ;;  %6820 = vst [vmem:[#allocation85_spill] sm:$0xff] %v5811_v41  ;;  %v4375_v17 = vor.u32 %v5060_v28, %v4372_v8  ;;  %v5076_v32 = vld [vmem:[#allocation5 + $0x124] sm:$0xf]  ;;  %v4997_v28 = vld [vmem:[#allocation2 + $0x228] sm:$0xf0] }
 0x1b1   :  { %v5805_v57 = vadd.f32 %v1836_v35, %v1748_v25  ;;  %v1661_v23 = vadd.f32 %v1660_v37, %v1572_v0  ;;  %6819 = vst [vmem:[#allocation84_spill] sm:$0xff] %v5809_v20  ;;  %v4436_v0 = vld [vmem:[#allocation5 + $0x128] sm:$0xf0]  ;;  %2202 = vmatpush.bf16.msra.mxu0 %v4375_v17 }
 0x1b2   :  { %v4439_v37 = vor.u32 %v5076_v32, %v4436_v0 }
 0x1b4   :  { %2291 = vmatpush.bf16.msra.mxu1 %v4439_v37 }
 0x1b6   :  { %v1749_v51 = vpop.f32.mrf.mxu2  ;;  %v1850_v30 = vpop.f32.mrf.mxu0 }
 0x1b7   :  { %v1750_v6 = vadd.f32 %v1749_v51, %v1661_v23  ;;  %v1838_v4 = vpop.f32.mrf.mxu3  ;;  %v1851_v61 = vadd.f32 %v1850_v30, %v5551_v58  ;;  %v1939_v25 = vpop.f32.mrf.mxu1  ;;  %v4110_v30 = vld [vmem:[#allocation2 + $0x208] sm:$0xf] }
 0x1b9   :  { %v5814_v7 = vadd.f32 %v1838_v4, %v1750_v6  ;;  %v1940_v35 = vadd.f32 %v1939_v25, %v1851_v61  ;;  %1889 = vmatmul.bf16.gmra.mxu0 %v5807_v55  ;;  %v4996_v61 = vld [vmem:[#allocation2 + $0x220] sm:$0xf0]  ;;  %v4993_v25 = vld [vmem:[#allocation2 + $0x20c] sm:$0xf] }
 0x1ba   :  { %1978 = vmatmul.bf16.gmra.mxu1 %v5809_v20  ;;  %v5823_v20 = vor.u32 %v4996_v61, %v4110_v30  ;;  %v4532_v55 = vld [vmem:[#allocation5 + $0x1e8] sm:$0xf0]  ;;  %v5116_v61 = vld [vmem:[#allocation5 + $0x264] sm:$0xf] }
 0x1bb   :  { %2067 = vmatmul.bf16.gmra.mxu2 %v5811_v41  ;;  %v4112_v41 = vld [vmem:[#allocation2 + $0x224] sm:$0xf0] }
 0x1bc   :  { %2156 = vmatmul.bf16.gmra.mxu3 %v5537_v18  ;;  %v4118_v18 = vld [vmem:[#allocation2 + $0x210] sm:$0xf]  ;;  %v5827_v0 = vor.u32 %v4993_v25, %v4112_v41 }
 0x1bd   :  { %v5829_v37 = vor.u32 %v4997_v28, %v4118_v18 }
 0x1be   :  { %v2028_v23 = vpop.f32.mrf.mxu2  ;;  %v1852_v50 = vpop.f32.mrf.mxu0  ;;  %6822 = vst [vmem:[#allocation87_spill] sm:$0xff] %v5827_v0 }
 0x1bf   :  { %v2029_v58 = vadd.f32 %v2028_v23, %v1940_v35  ;;  %v5820_v63 = vpop.f32.mrf.mxu3  ;;  %v1853_v51 = vadd.f32 %v1852_v50, %v5562_v53  ;;  %v1941_v6 = vpop.f32.mrf.mxu1  ;;  %6823 = vst [vmem:[#allocation88_spill] sm:$0xff] %v5829_v37 }
 0x1c0   :  { %6821 = vst [vmem:[#allocation86_spill] sm:$0xff] %v5820_v63 }
 0x1c1   :  { %v1942_v4 = vadd.f32 %v1941_v6, %v1853_v51  ;;  %v2731_v50 = vmax.f32 %v2029_v58, 0.0  ;;  %v5100_v6 = vld [vmem:[#allocation5 + $0x1e4] sm:$0xf] }
 0x1c2   :  { %v4535_v30 = vor.u32 %v5100_v6, %v4532_v55  ;;  %v5004_v6 = vld [vmem:[#allocation2 + $0x260] sm:$0xf0] }
 0x1c4   :  { %2376 = vmatpush.bf16.msra.mxu2 %v4535_v30 }
 0x1c6   :  { %v2030_v8 = vpop.f32.mrf.mxu2  ;;  %v1855_v17 = vpop.f32.mrf.mxu0 }
 0x1c7   :  { %v2031_v32 = vadd.f32 %v2030_v8, %v1942_v4  ;;  %v5825_v35 = vpop.f32.mrf.mxu3  ;;  %v1856_v53 = vadd.f32 %v1855_v17, %v5569_v11  ;;  %v1944_v23 = vpop.f32.mrf.mxu1  ;;  %v4596_v4 = vld [vmem:[#allocation5 + $0x268] sm:$0xf0]  ;;  %v4138_v17 = vld [vmem:[#allocation2 + $0x240] sm:$0xf] }
 0x1c8   :  { %v4599_v41 = vor.u32 %v5116_v61, %v4596_v4 }
 0x1c9   :  { %v2733_v51 = vmax.f32 %v2031_v32, 0.0  ;;  %v1945_v63 = vadd.f32 %v1944_v23, %v1856_v53  ;;  %1894 = vmatmul.bf16.gmra.mxu0 %v5823_v20  ;;  %v5003_v53 = vld [vmem:[#allocation2 + $0x258] sm:$0xf0]  ;;  %v5000_v23 = vld [vmem:[#allocation2 + $0x244] sm:$0xf] }
 0x1ca   :  { %1983 = vmatmul.bf16.gmra.mxu1 %v5827_v0  ;;  %2465 = vmatpush.bf16.msra.mxu3 %v4599_v41  ;;  %v5841_v4 = vor.u32 %v5003_v53, %v4138_v17  ;;  %v4364_v17 = vld [vmem:[#allocation5 + $0x98] sm:$0xf0] }
 0x1cb   :  { %v5833_v8 = vpack.c.bf16 %v2733_v51, %v2731_v50  ;;  %2072 = vmatmul.bf16.gmra.mxu2 %v5829_v37  ;;  %v4140_v50 = vld [vmem:[#allocation2 + $0x25c] sm:$0xf0]  ;;  %v4146_v51 = vld [vmem:[#allocation2 + $0x248] sm:$0xf] }
 0x1cc   :  { %2161 = vmatmul.bf16.gmra.mxu3 %v5553_v19 }
 0x1cd   :  { %6824 = vst [vmem:[#allocation89_spill] sm:$0xff] %v5833_v8 }
 0x1ce   :  { %v2033_v11 = vpop.f32.mrf.mxu2  ;;  %v1857_v25 = vpop.f32.mrf.mxu0 }
 0x1cf   :  { %v2034_v58 = vadd.f32 %v2033_v11, %v1945_v63  ;;  %v5838_v18 = vpop.f32.mrf.mxu3  ;;  %v1858_v55 = vadd.f32 %v1857_v25, %v5580_v10  ;;  %v1946_v28 = vpop.f32.mrf.mxu1  ;;  %v5845_v63 = vor.u32 %v5000_v23, %v4140_v50  ;;  %v5847_v11 = vor.u32 %v5004_v6, %v4146_v51  ;;  %v5074_v50 = vld [vmem:[#allocation5 + $0x114] sm:$0xf]  ;;  %v4428_v51 = vld [vmem:[#allocation5 + $0x118] sm:$0xf0] }
 0x1d1   :  { %v1947_v32 = vadd.f32 %v1946_v28, %v1858_v55  ;;  %6825 = vst [vmem:[#allocation90_spill] sm:$0xff] %v5845_v63  ;;  %v2735_v55 = vmax.f32 %v2034_v58, 0.0 }
 0x1d2   :  { %6826 = vst [vmem:[#allocation91_spill] sm:$0xff] %v5847_v11 }
 0x1d6   :  { %v2035_v61 = vpop.f32.mrf.mxu2  ;;  %v1860_v30 = vpop.f32.mrf.mxu0 }
 0x1d7   :  { %v2036_v19 = vadd.f32 %v2035_v61, %v1947_v32  ;;  %v5843_v41 = vpop.f32.mrf.mxu3  ;;  %v1861_v10 = vadd.f32 %v1860_v30, %v5587_v59  ;;  %v1949_v25 = vpop.f32.mrf.mxu1  ;;  %v5058_v32 = vld [vmem:[#allocation5 + $0x94] sm:$0xf]  ;;  %v4431_v59 = vor.u32 %v5074_v50, %v4428_v51 }
 0x1d8   :  { %v4367_v23 = vor.u32 %v5058_v32, %v4364_v17  ;;  %v5011_v32 = vld [vmem:[#allocation2 + $0x298] sm:$0xf0] }
 0x1d9   :  { %v2737_v28 = vmax.f32 %v2036_v19, 0.0  ;;  %v1950_v37 = vadd.f32 %v1949_v25, %v1861_v10  ;;  %1899 = vmatmul.bf16.gmra.mxu0 %v5841_v4  ;;  %2292 = vmatpush.bf16.msra.mxu1 %v4431_v59 }
 0x1da   :  { %1988 = vmatmul.bf16.gmra.mxu1 %v5845_v63  ;;  %2203 = vmatpush.bf16.msra.mxu0 %v4367_v23  ;;  %v4168_v63 = vld [vmem:[#allocation2 + $0x294] sm:$0xf0] }
 0x1db   :  { %2077 = vmatmul.bf16.gmra.mxu2 %v5847_v11  ;;  %v5853_v53 = vpack.c.bf16 %v2737_v28, %v2735_v55  ;;  %v4166_v11 = vld [vmem:[#allocation2 + $0x278] sm:$0xf]  ;;  %v5010_v55 = vld [vmem:[#allocation2 + $0x290] sm:$0xf0]  ;;  %v5007_v28 = vld [vmem:[#allocation2 + $0x27c] sm:$0xf] }
 0x1dc   :  { %2166 = vmatmul.bf16.gmra.mxu3 %v5571_v56  ;;  %v4174_v56 = vld [vmem:[#allocation2 + $0x280] sm:$0xf]  ;;  %v5859_v0 = vor.u32 %v5010_v55, %v4166_v11  ;;  %v5863_v51 = vor.u32 %v5007_v28, %v4168_v63  ;;  %v5114_v55 = vld [vmem:[#allocation5 + $0x254] sm:$0xf] }
 0x1dd   :  { %6827 = vst [vmem:[#allocation92_spill] sm:$0xff] %v5853_v53  ;;  %v5865_v59 = vor.u32 %v5011_v32, %v4174_v56  ;;  %v4524_v53 = vld [vmem:[#allocation5 + $0x1d8] sm:$0xf0] }
 0x1de   :  { %v2038_v6 = vpop.f32.mrf.mxu2  ;;  %v1862_v61 = vpop.f32.mrf.mxu0  ;;  %6828 = vst [vmem:[#allocation93_spill] sm:$0xff] %v5863_v51 }
 0x1df   :  { %v2039_v58 = vadd.f32 %v2038_v6, %v1950_v37  ;;  %v5856_v19 = vpop.f32.mrf.mxu3  ;;  %v1863_v30 = vadd.f32 %v1862_v61, %v5598_v24  ;;  %v1951_v10 = vpop.f32.mrf.mxu1  ;;  %6829 = vst [vmem:[#allocation94_spill] sm:$0xff] %v5865_v59 }
 0x1e1   :  { %v1952_v25 = vadd.f32 %v1951_v10, %v1863_v30  ;;  %v2739_v61 = vmax.f32 %v2039_v58, 0.0  ;;  %v5098_v10 = vld [vmem:[#allocation5 + $0x1d4] sm:$0xf] }
 0x1e2   :  { %v4527_v11 = vor.u32 %v5098_v10, %v4524_v53  ;;  %v4196_v10 = vld [vmem:[#allocation2 + $0x2cc] sm:$0xf0] }
 0x1e4   :  { %2377 = vmatpush.bf16.msra.mxu2 %v4527_v11 }
 0x1e6   :  { %v2040_v17 = vpop.f32.mrf.mxu2  ;;  %v1865_v23 = vpop.f32.mrf.mxu0 }
 0x1e7   :  { %v2041_v50 = vadd.f32 %v2040_v17, %v1952_v25  ;;  %v5861_v37 = vpop.f32.mrf.mxu3  ;;  %v1866_v24 = vadd.f32 %v1865_v23, %v5605_v29  ;;  %v1954_v6 = vpop.f32.mrf.mxu1  ;;  %v4588_v25 = vld [vmem:[#allocation5 + $0x258] sm:$0xf0]  ;;  %v4194_v23 = vld [vmem:[#allocation2 + $0x2b0] sm:$0xf] }
 0x1e8   :  { %v4591_v63 = vor.u32 %v5114_v55, %v4588_v25  ;;  %v4202_v55 = vld [vmem:[#allocation2 + $0x2b8] sm:$0xf] }
 0x1e9   :  { %v2741_v30 = vmax.f32 %v2041_v50, 0.0  ;;  %v1955_v8 = vadd.f32 %v1954_v6, %v1866_v24  ;;  %1904 = vmatmul.bf16.gmra.mxu0 %v5859_v0  ;;  %v5017_v24 = vld [vmem:[#allocation2 + $0x2c8] sm:$0xf0]  ;;  %v5014_v6 = vld [vmem:[#allocation2 + $0x2b4] sm:$0xf] }
 0x1ea   :  { %1993 = vmatmul.bf16.gmra.mxu1 %v5863_v51  ;;  %2466 = vmatpush.bf16.msra.mxu3 %v4591_v63  ;;  %v5877_v25 = vor.u32 %v5017_v24, %v4194_v23  ;;  %v4356_v23 = vld [vmem:[#allocation5 + $0x88] sm:$0xf0] }
 0x1eb   :  { %2082 = vmatmul.bf16.gmra.mxu2 %v5865_v59  ;;  %v5871_v28 = vpack.c.bf16 %v2741_v30, %v2739_v61  ;;  %v5018_v61 = vld [vmem:[#allocation2 + $0x2d0] sm:$0xf0]  ;;  %v4516_v51 = vld [vmem:[#allocation5 + $0x1c8] sm:$0xf0] }
 0x1ec   :  { %2171 = vmatmul.bf16.gmra.mxu3 %v5589_v26  ;;  %6831 = vst [vmem:[#allocation96_spill] sm:$0xff] %v5877_v25 }
 0x1ed   :  { %6830 = vst [vmem:[#allocation95_spill] sm:$0xff] %v5871_v28 }
 0x1ee   :  { %v2043_v29 = vpop.f32.mrf.mxu2  ;;  %v1867_v56 = vpop.f32.mrf.mxu0 }
 0x1ef   :  { %v2044_v58 = vadd.f32 %v2043_v29, %v1955_v8  ;;  %v5874_v32 = vpop.f32.mrf.mxu3  ;;  %v1868_v53 = vadd.f32 %v1867_v56, %v5616_v27  ;;  %v1956_v17 = vpop.f32.mrf.mxu1  ;;  %v5881_v8 = vor.u32 %v5014_v6, %v4196_v10  ;;  %v5883_v29 = vor.u32 %v5018_v61, %v4202_v55  ;;  %v5072_v10 = vld [vmem:[#allocation5 + $0x104] sm:$0xf]  ;;  %v4420_v55 = vld [vmem:[#allocation5 + $0x108] sm:$0xf0] }
 0x1f1   :  { %v1957_v50 = vadd.f32 %v1956_v17, %v1868_v53  ;;  %6833 = vst [vmem:[#allocation98_spill] sm:$0xff] %v5881_v8  ;;  %v2743_v53 = vmax.f32 %v2044_v58, 0.0 }
 0x1f2   :  { %6834 = vst [vmem:[#allocation99_spill] sm:$0xff] %v5883_v29 }
 0x1f6   :  { %v2045_v30 = vpop.f32.mrf.mxu2  ;;  %v1870_v11 = vpop.f32.mrf.mxu0 }
 0x1f7   :  { %v2046_v26 = vadd.f32 %v2045_v30, %v1957_v50  ;;  %v5879_v63 = vpop.f32.mrf.mxu3  ;;  %v1871_v27 = vadd.f32 %v1870_v11, %v5623_v9  ;;  %v1959_v56 = vpop.f32.mrf.mxu1  ;;  %v5056_v50 = vld [vmem:[#allocation5 + $0x84] sm:$0xf]  ;;  %v4423_v9 = vor.u32 %v5072_v10, %v4420_v55 }
 0x1f8   :  { %6832 = vst [vmem:[#allocation97_spill] sm:$0xff] %v5879_v63  ;;  %v4359_v6 = vor.u32 %v5056_v50, %v4356_v23  ;;  %v5025_v50 = vld [vmem:[#allocation2 + $0x308] sm:$0xf0]  ;;  %v5096_v23 = vld [vmem:[#allocation5 + $0x1c4] sm:$0xf] }
 0x1f9   :  { %v2745_v17 = vmax.f32 %v2046_v26, 0.0  ;;  %v1960_v59 = vadd.f32 %v1959_v56, %v1871_v27  ;;  %1909 = vmatmul.bf16.gmra.mxu0 %v5877_v25  ;;  %2293 = vmatpush.bf16.msra.mxu1 %v4423_v9 }
 0x1fa   :  { %1998 = vmatmul.bf16.gmra.mxu1 %v5881_v8  ;;  %2204 = vmatpush.bf16.msra.mxu0 %v4359_v6  ;;  %v4224_v8 = vld [vmem:[#allocation2 + $0x304] sm:$0xf0] }
 0x1fb   :  { %2087 = vmatmul.bf16.gmra.mxu2 %v5883_v29  ;;  %v5889_v24 = vpack.c.bf16 %v2745_v17, %v2743_v53  ;;  %v4222_v29 = vld [vmem:[#allocation2 + $0x2e8] sm:$0xf]  ;;  %v5024_v53 = vld [vmem:[#allocation2 + $0x300] sm:$0xf0]  ;;  %v5021_v17 = vld [vmem:[#allocation2 + $0x2ec] sm:$0xf] }
 0x1fc   :  { %2176 = vmatmul.bf16.gmra.mxu3 %v5607_v60  ;;  %v4230_v60 = vld [vmem:[#allocation2 + $0x2f0] sm:$0xf]  ;;  %v5895_v55 = vor.u32 %v5024_v53, %v4222_v29  ;;  %v5899_v9 = vor.u32 %v5021_v17, %v4224_v8  ;;  %v5110_v53 = vld [vmem:[#allocation5 + $0x234] sm:$0xf]  ;;  %v4572_v17 = vld [vmem:[#allocation5 + $0x238] sm:$0xf0] }
 0x1fd   :  { %6835 = vst [vmem:[#allocation100_spill] sm:$0xff] %v5889_v24 }
 0x1fe   :  { %v2048_v61 = vpop.f32.mrf.mxu2  ;;  %v1872_v30 = vpop.f32.mrf.mxu0  ;;  %6837 = vst [vmem:[#allocation102_spill] sm:$0xff] %v5895_v55 }
 0x1ff   :  { %v2049_v58 = vadd.f32 %v2048_v61, %v1960_v59  ;;  %v5892_v26 = vpop.f32.mrf.mxu3  ;;  %v1873_v11 = vadd.f32 %v1872_v30, %v5634_v5  ;;  %v1961_v27 = vpop.f32.mrf.mxu1  ;;  %v4519_v59 = vor.u32 %v5096_v23, %v4516_v51  ;;  %6838 = vst [vmem:[#allocation103_spill] sm:$0xff] %v5899_v9  ;;  %v5901_v5 = vor.u32 %v5025_v50, %v4230_v60  ;;  %v5112_v30 = vld [vmem:[#allocation5 + $0x244] sm:$0xf]  ;;  %v5094_v51 = vld [vmem:[#allocation5 + $0x1b4] sm:$0xf] }
 0x200   :  { %6836 = vst [vmem:[#allocation101_spill] sm:$0xff] %v5892_v26 }
 0x201   :  { %v1962_v56 = vadd.f32 %v1961_v27, %v1873_v11  ;;  %6839 = vst [vmem:[#allocation104_spill] sm:$0xff] %v5901_v5  ;;  %v4580_v11 = vld [vmem:[#allocation5 + $0x248] sm:$0xf0]  ;;  %2378 = vmatpush.bf16.msra.mxu2 %v4519_v59  ;;  %v2747_v26 = vmax.f32 %v2049_v58, 0.0  ;;  %v5092_v58 = vld [vmem:[#allocation5 + $0x1a4] sm:$0xf] }
 0x202   :  { %v4583_v25 = vor.u32 %v5112_v30, %v4580_v11 }
 0x204   :  { %2467 = vmatpush.bf16.msra.mxu3 %v4583_v25 }
 0x206   :  { %v2050_v10 = vpop.f32.mrf.mxu2  ;;  %v1875_v61 = vpop.f32.mrf.mxu0 }
 0x207   :  { %v2051_v6 = vadd.f32 %v2050_v10, %v1962_v56  ;;  %v5897_v24 = vpop.f32.mrf.mxu3  ;;  %v1876_v27 = vadd.f32 %v1875_v61, %v5641_v62  ;;  %v1964_v28 = vpop.f32.mrf.mxu1  ;;  %v4508_v56 = vld [vmem:[#allocation5 + $0x1b8] sm:$0xf0]  ;;  %v4575_v62 = vor.u32 %v5110_v53, %v4572_v17  ;;  %v4564_v61 = vld [vmem:[#allocation5 + $0x228] sm:$0xf0]  ;;  %v5028_v53 = vld [vmem:[#allocation2 + $0x324] sm:$0xf] }
 0x208   :  { %v4511_v8 = vor.u32 %v5094_v51, %v4508_v56  ;;  %v4250_v51 = vld [vmem:[#allocation2 + $0x320] sm:$0xf]  ;;  %v5031_v56 = vld [vmem:[#allocation2 + $0x338] sm:$0xf0]  ;;  %v5106_v17 = vld [vmem:[#allocation5 + $0x214] sm:$0xf] }
 0x209   :  { %v2749_v63 = vmax.f32 %v2051_v6, 0.0  ;;  %v1965_v29 = vadd.f32 %v1964_v28, %v1876_v27  ;;  %1914 = vmatmul.bf16.gmra.mxu0 %v5895_v55  ;;  %v4500_v28 = vld [vmem:[#allocation5 + $0x1a8] sm:$0xf0]  ;;  %2468 = vmatpush.bf16.msra.mxu3 %v4575_v62  ;;  %v5108_v6 = vld [vmem:[#allocation5 + $0x224] sm:$0xf] }
 0x20a   :  { %2003 = vmatmul.bf16.gmra.mxu1 %v5899_v9  ;;  %2379 = vmatpush.bf16.msra.mxu2 %v4511_v8  ;;  %v4503_v25 = vor.u32 %v5092_v58, %v4500_v28  ;;  %v4252_v62 = vld [vmem:[#allocation2 + $0x33c] sm:$0xf0]  ;;  %v4258_v58 = vld [vmem:[#allocation2 + $0x328] sm:$0xf]  ;;  %v5032_v28 = vld [vmem:[#allocation2 + $0x340] sm:$0xf0] }
 0x20b   :  { %2092 = vmatmul.bf16.gmra.mxu2 %v5901_v5  ;;  %v5907_v60 = vpack.c.bf16 %v2749_v63, %v2747_v26  ;;  %v4567_v63 = vor.u32 %v5108_v6, %v4564_v61  ;;  %v5090_v26 = vld [vmem:[#allocation5 + $0x194] sm:$0xf]  ;;  %v5088_v5 = vld [vmem:[#allocation5 + $0x184] sm:$0xf]  ;;  %v5913_v6 = vor.u32 %v5031_v56, %v4250_v51  ;;  %v4548_v9 = vld [vmem:[#allocation5 + $0x208] sm:$0xf0] }
 0x20c   :  { %2181 = vmatmul.bf16.gmra.mxu3 %v5625_v54  ;;  %v4492_v54 = vld [vmem:[#allocation5 + $0x198] sm:$0xf0] }
 0x20d   :  { %6840 = vst [vmem:[#allocation105_spill] sm:$0xff] %v5907_v60  ;;  %2469 = vmatpush.bf16.msra.mxu3 %v4567_v63  ;;  %v4495_v8 = vor.u32 %v5090_v26, %v4492_v54  ;;  %v5917_v63 = vor.u32 %v5028_v53, %v4252_v62  ;;  %v5919_v26 = vor.u32 %v5032_v28, %v4258_v58  ;;  %v5104_v54 = vld [vmem:[#allocation5 + $0x204] sm:$0xf]  ;;  %v5150_v53 = vld [vmem:[#allocation5 + $0x374] sm:$0xf] }
 0x20e   :  { %v2053_v50 = vpop.f32.mrf.mxu2  ;;  %v1877_v10 = vpop.f32.mrf.mxu0  ;;  %2380 = vmatpush.bf16.msra.mxu2 %v4503_v25 }
 0x20f   :  { %v2054_v23 = vadd.f32 %v2053_v50, %v1965_v29  ;;  %v5910_v59 = vpop.f32.mrf.mxu3  ;;  %v1878_v30 = vadd.f32 %v1877_v10, %v5652_v33  ;;  %v1966_v11 = vpop.f32.mrf.mxu1  ;;  %v4556_v29 = vld [vmem:[#allocation5 + $0x218] sm:$0xf0]  ;;  %v4484_v33 = vld [vmem:[#allocation5 + $0x188] sm:$0xf0]  ;;  %6841 = vst [vmem:[#allocation106_spill] sm:$0xff] %v5919_v26 }
 0x210   :  { %v4559_v50 = vor.u32 %v5106_v17, %v4556_v29  ;;  %v4487_v25 = vor.u32 %v5088_v5, %v4484_v33  ;;  %v4551_v29 = vor.u32 %v5104_v54, %v4548_v9  ;;  %v5134_v5 = vld [vmem:[#allocation5 + $0x2f4] sm:$0xf]  ;;  %v4732_v9 = vld [vmem:[#allocation5 + $0x378] sm:$0xf0] }
 0x211   :  { %v1967_v27 = vadd.f32 %v1966_v11, %v1878_v30  ;;  %v2751_v60 = vmax.f32 %v2054_v23, 0.0  ;;  %v4735_v23 = vor.u32 %v5150_v53, %v4732_v9  ;;  %v5039_v54 = vld [vmem:[#allocation2 + $0x378] sm:$0xf0] }
 0x212   :  { %2381 = vmatpush.bf16.msra.mxu2 %v4495_v8  ;;  %2470 = vmatpush.bf16.msra.mxu3 %v4559_v50 }
 0x213   :  { %2642 = vmatpush.bf16.msrb.mxu1 %v4735_v23 }
 0x216   :  { %v2055_v10 = vpop.f32.mrf.mxu2  ;;  %v1880_v30 = vpop.f32.mrf.mxu0  ;;  %2382 = vmatpush.bf16.msra.mxu2 %v4487_v25  ;;  %2471 = vmatpush.bf16.msra.mxu3 %v4551_v29 }
 0x217   :  { %v2056_v61 = vadd.f32 %v2055_v10, %v1967_v27  ;;  %v5915_v11 = vpop.f32.mrf.mxu3  ;;  %v1881_v17 = vadd.f32 %v1880_v30, %v5659_v22  ;;  %v1969_v8 = vpop.f32.mrf.mxu1  ;;  %v4668_v27 = vld [vmem:[#allocation5 + $0x2f8] sm:$0xf0]  ;;  %v4280_v30 = vld [vmem:[#allocation2 + $0x374] sm:$0xf0] }
 0x218   :  { %v4671_v22 = vor.u32 %v5134_v5, %v4668_v27 }
 0x219   :  { %v2753_v55 = vmax.f32 %v2056_v61, 0.0  ;;  %v1970_v51 = vadd.f32 %v1969_v8, %v1881_v17  ;;  %1919 = vmatmul.bf16.gmra.mxu0 %v5913_v6  ;;  %v4278_v61 = vld [vmem:[#allocation2 + $0x358] sm:$0xf] }
 0x21a   :  { %2008 = vmatmul.bf16.gmra.mxu1 %v5917_v63  ;;  %2553 = vmatpush.bf16.msrb.mxu0 %v4671_v22 }
 0x21b   :  { %2097 = vmatmul.bf16.gmra.mxu2 %v5919_v26  ;;  %v5925_v56 = vpack.c.bf16 %v2753_v55, %v2751_v60  ;;  %v5038_v55 = vld [vmem:[#allocation2 + $0x370] sm:$0xf0]  ;;  %v5035_v60 = vld [vmem:[#allocation2 + $0x35c] sm:$0xf]  ;;  %v4692_v26 = vld [vmem:[#allocation5 + $0x328] sm:$0xf0] }
 0x21c   :  { %2186 = vmatmul.bf16.gmra.mxu3 %v5643_v38  ;;  %v4286_v38 = vld [vmem:[#allocation2 + $0x360] sm:$0xf]  ;;  %v5931_v8 = vor.u32 %v5038_v55, %v4278_v61  ;;  %v5935_v27 = vor.u32 %v5035_v60, %v4280_v30 }
 0x21d   :  { %6842 = vst [vmem:[#allocation107_spill] sm:$0xff] %v5925_v56  ;;  %v5937_v22 = vor.u32 %v5039_v54, %v4286_v38 }
 0x21e   :  { %v2058_v62 = vpop.f32.mrf.mxu2  ;;  %v1882_v28 = vpop.f32.mrf.mxu0  ;;  %6843 = vst [vmem:[#allocation108_spill] sm:$0xff] %v5935_v27 }
 0x21f   :  { %v2059_v58 = vadd.f32 %v2058_v62, %v1970_v51  ;;  %v5928_v50 = vpop.f32.mrf.mxu3  ;;  %v1883_v33 = vadd.f32 %v1882_v28, %v5670_v43  ;;  %v1971_v10 = vpop.f32.mrf.mxu1  ;;  %6844 = vst [vmem:[#allocation109_spill] sm:$0xff] %v5937_v22 }
 0x221   :  { %v1972_v25 = vadd.f32 %v1971_v10, %v1883_v33  ;;  %v2755_v9 = vmax.f32 %v2059_v58, 0.0 }
 0x226   :  { %v2060_v17 = vpop.f32.mrf.mxu2  ;;  %v1885_v5 = vpop.f32.mrf.mxu0 }
 0x227   :  { %v2061_v29 = vadd.f32 %v2060_v17, %v1972_v25  ;;  %v5933_v51 = vpop.f32.mrf.mxu3  ;;  %v1886_v43 = vadd.f32 %v1885_v5, %v5677_v40  ;;  %v1974_v53 = vpop.f32.mrf.mxu1 }
 0x229   :  { %v2757_v23 = vmax.f32 %v2061_v29, 0.0  ;;  %v1975_v62 = vadd.f32 %v1974_v53, %v1886_v43  ;;  %1924 = vmatmul.bf16.gmra.mxu0 %v5931_v8  ;;  %v4660_v53 = vld [vmem:[#allocation5 + $0x2e8] sm:$0xf0] }
 0x22a   :  { %2013 = vmatmul.bf16.gmra.mxu1 %v5935_v27  ;;  %v6872_v27 = vld [vmem:[#allocation29_spill] sm:$0xff] }
 0x22b   :  { %2102 = vmatmul.bf16.gmra.mxu2 %v5937_v22  ;;  %v5943_v28 = vpack.c.bf16 %v2757_v23, %v2755_v9 }
 0x22c   :  { %2191 = vmatmul.bf16.gmra.mxu3 %v5661_v16 }
 0x22d   :  { %6845 = vst [vmem:[#allocation110_spill] sm:$0xff] %v5943_v28 }
 0x22e   :  { %v2063_v33 = vpop.f32.mrf.mxu2  ;;  %v1887_v25 = vpop.f32.mrf.mxu0 }
 0x22f   :  { %v2064_v10 = vadd.f32 %v2063_v33, %v1975_v62  ;;  %v5946_v61 = vpop.f32.mrf.mxu3  ;;  %v1888_v40 = vadd.f32 %v1887_v25, %v5686_v34  ;;  %v1976_v58 = vpop.f32.mrf.mxu1  ;;  %v5132_v34 = vld [vmem:[#allocation5 + $0x2e4] sm:$0xf]  ;;  %v4724_v33 = vld [vmem:[#allocation5 + $0x368] sm:$0xf0] }
 0x230   :  { %v4663_v23 = vor.u32 %v5132_v34, %v4660_v53  ;;  %v5148_v62 = vld [vmem:[#allocation5 + $0x364] sm:$0xf] }
 0x231   :  { %v1977_v55 = vadd.f32 %v1976_v58, %v1888_v40  ;;  %v2759_v5 = vmax.f32 %v2064_v10, 0.0 }
 0x232   :  { %2554 = vmatpush.bf16.msrb.mxu0 %v4663_v23 }
 0x236   :  { %v2065_v60 = vpop.f32.mrf.mxu2  ;;  %v1890_v38 = vpop.f32.mrf.mxu0 }
 0x237   :  { %v2066_v30 = vadd.f32 %v2065_v60, %v1977_v55  ;;  %v5949_v54 = vpop.f32.mrf.mxu3  ;;  %v1891_v17 = vadd.f32 %v1890_v38, %v5693_v21  ;;  %v1979_v29 = vpop.f32.mrf.mxu1  ;;  %v4727_v21 = vor.u32 %v5148_v62, %v4724_v33 }
 0x239   :  { %v2761_v43 = vmax.f32 %v2066_v30, 0.0  ;;  %v1980_v16 = vadd.f32 %v1979_v29, %v1891_v17  ;;  %2205 = vmatmul.bf16.vlgmr.msra.gmra.mxu0 %v5441_v47  ;;  %2643 = vmatpush.bf16.msrb.mxu1 %v4727_v21 }
 0x23a   :  { %2294 = vmatmul.bf16.vlgmr.msra.gmra.mxu1 %v5443_v48 }
 0x23b   :  { %2383 = vmatmul.bf16.vlgmr.msra.gmra.mxu2 %v5445_v49  ;;  %v5955_v9 = vpack.c.bf16 %v2761_v43, %v2759_v5 }
 0x23c   :  { %2472 = vmatmul.bf16.vlgmr.msra.gmra.mxu3 %v5679_v44 }
 0x23e   :  { %v2068_v25 = vpop.f32.mrf.mxu2  ;;  %v1892_v40 = vpop.f32.mrf.mxu0 }
 0x23f   :  { %v2069_v10 = vadd.f32 %v2068_v25, %v1980_v16  ;;  %v5958_v58 = vpop.f32.mrf.mxu3  ;;  %v1893_v47 = vadd.f32 %v1892_v40, %v5702_v46  ;;  %v1981_v48 = vpop.f32.mrf.mxu1 }
 0x241   :  { %v1982_v49 = vadd.f32 %v1981_v48, %v1893_v47  ;;  %v2763_v29 = vmax.f32 %v2069_v10, 0.0  ;;  %v6847_v48 = vld [vmem:[#allocation16_spill] sm:$0xff] }
 0x246   :  { %v2070_v55 = vpop.f32.mrf.mxu2  ;;  %v1895_v30 = vpop.f32.mrf.mxu0 }
 0x247   :  { %v2071_v60 = vadd.f32 %v2070_v55, %v1982_v49  ;;  %v5961_v38 = vpop.f32.mrf.mxu3  ;;  %v1896_v44 = vadd.f32 %v1895_v30, %v5709_v45  ;;  %v1984_v17 = vpop.f32.mrf.mxu1  ;;  %v4652_v49 = vld [vmem:[#allocation5 + $0x2d8] sm:$0xf0] }
 0x249   :  { %v2765_v5 = vmax.f32 %v2071_v60, 0.0  ;;  %v1985_v43 = vadd.f32 %v1984_v17, %v1896_v44  ;;  %2210 = vmatmul.bf16.gmra.mxu0 %v5453_v1  ;;  %v6848_v60 = vld [vmem:[#allocation60_spill] sm:$0xff]  ;;  %v5146_v44 = vld [vmem:[#allocation5 + $0x354] sm:$0xf]  ;;  %v4716_v17 = vld [vmem:[#allocation5 + $0x358] sm:$0xf0] }
 0x24a   :  { %2299 = vmatmul.bf16.gmra.mxu1 %v5455_v2 }
 0x24b   :  { %2388 = vmatmul.bf16.gmra.mxu2 %v5457_v3  ;;  %v5967_v46 = vpack.c.bf16 %v2765_v5, %v2763_v29 }
 0x24c   :  { %2477 = vmatmul.bf16.gmra.mxu3 %v5695_v39 }
 0x24d   :  { %6846 = vst [vmem:[#allocation111_spill] sm:$0xff] %v5967_v46 }
 0x24e   :  { %v2073_v16 = vpop.f32.mrf.mxu2  ;;  %v1897_v53 = vpop.f32.mrf.mxu0 }
 0x24f   :  { %v2074_v34 = vadd.f32 %v2073_v16, %v1985_v43  ;;  %v5970_v23 = vpop.f32.mrf.mxu3  ;;  %v1898_v45 = vadd.f32 %v1897_v53, %v5718_v36  ;;  %v1986_v62 = vpop.f32.mrf.mxu1  ;;  %v5130_v36 = vld [vmem:[#allocation5 + $0x2d4] sm:$0xf] }
 0x250   :  { %v4655_v30 = vor.u32 %v5130_v36, %v4652_v49  ;;  %v6854_v49 = vld [vmem:[#allocation63_spill] sm:$0xff] }
 0x251   :  { %v1987_v33 = vadd.f32 %v1986_v62, %v1898_v45  ;;  %v2767_v40 = vmax.f32 %v2074_v34, 0.0 }
 0x252   :  { %2555 = vmatpush.bf16.msrb.mxu0 %v4655_v30 }
 0x256   :  { %v2075_v21 = vpop.f32.mrf.mxu2  ;;  %v1900_v1 = vpop.f32.mrf.mxu0 }
 0x257   :  { %v2076_v25 = vadd.f32 %v2075_v21, %v1987_v33  ;;  %v5973_v10 = vpop.f32.mrf.mxu3  ;;  %v1901_v2 = vadd.f32 %v1900_v1, %v5725_v52  ;;  %v1989_v3 = vpop.f32.mrf.mxu1  ;;  %v4719_v52 = vor.u32 %v5146_v44, %v4716_v17 }
 0x259   :  { %v2769_v47 = vmax.f32 %v2076_v25, 0.0  ;;  %v1990_v39 = vadd.f32 %v1989_v3, %v1901_v2  ;;  %2215 = vmatmul.bf16.gmra.mxu0 %v5465_v13  ;;  %2644 = vmatpush.bf16.msrb.mxu1 %v4719_v52  ;;  %v6849_v13 = vld [vmem:[#allocation66_spill] sm:$0xff] }
 0x25a   :  { %2304 = vmatmul.bf16.gmra.mxu1 %v5467_v14 }
 0x25b   :  { %2393 = vmatmul.bf16.gmra.mxu2 %v6847_v48  ;;  %v5979_v55 = vpack.c.bf16 %v2769_v47, %v2767_v40  ;;  %v6850_v47 = vld [vmem:[#allocation17_spill] sm:$0xff]  ;;  %v6852_v48 = vld [vmem:[#allocation19_spill] sm:$0xff] }
 0x25c   :  { %2482 = vmatmul.bf16.gmra.mxu3 %v6848_v60 }
 0x25e   :  { %v2078_v29 = vpop.f32.mrf.mxu2  ;;  %v1902_v43 = vpop.f32.mrf.mxu0 }
 0x25f   :  { %v2079_v5 = vadd.f32 %v2078_v29, %v1990_v39  ;;  %v5982_v16 = vpop.f32.mrf.mxu3  ;;  %v1903_v14 = vadd.f32 %v1902_v43, %v6849_v13  ;;  %v1991_v34 = vpop.f32.mrf.mxu1  ;;  %v6851_v39 = vld [vmem:[#allocation18_spill] sm:$0xff] }
 0x261   :  { %v1992_v53 = vadd.f32 %v1991_v34, %v1903_v14  ;;  %v2771_v2 = vmax.f32 %v2079_v5, 0.0 }
 0x266   :  { %v2080_v45 = vpop.f32.mrf.mxu2  ;;  %v1905_v33 = vpop.f32.mrf.mxu0 }
 0x267   :  { %v2081_v62 = vadd.f32 %v2080_v45, %v1992_v53  ;;  %v5985_v21 = vpop.f32.mrf.mxu3  ;;  %v1906_v25 = vadd.f32 %v1905_v33, %v5741_v12  ;;  %v1994_v1 = vpop.f32.mrf.mxu1  ;;  %v6855_v12 = vld [vmem:[#allocation70_spill] sm:$0xff] }
 0x269   :  { %v2773_v3 = vmax.f32 %v2081_v62, 0.0  ;;  %v1995_v40 = vadd.f32 %v1994_v1, %v1906_v25  ;;  %2220 = vmatmul.bf16.gmra.mxu0 %v6850_v47  ;;  %v6856_v1 = vld [vmem:[#allocation20_spill] sm:$0xff]  ;;  %v4644_v47 = vld [vmem:[#allocation5 + $0x2c8] sm:$0xf0] }
 0x26a   :  { %2309 = vmatmul.bf16.gmra.mxu1 %v6851_v39 }
 0x26b   :  { %2398 = vmatmul.bf16.gmra.mxu2 %v6852_v48  ;;  %v5991_v36 = vpack.c.bf16 %v2773_v3, %v2771_v2  ;;  %v6857_v2 = vld [vmem:[#allocation21_spill] sm:$0xff]  ;;  %v6858_v3 = vld [vmem:[#allocation22_spill] sm:$0xff]  ;;  %v6859_v48 = vld [vmem:[#allocation67_spill] sm:$0xff] }
 0x26c   :  { %2487 = vmatmul.bf16.gmra.mxu3 %v6854_v49 }
 0x26d   :  { %6853 = vst [vmem:[#allocation16_spill] sm:$0xff] %v5991_v36 }
 0x26e   :  { %v2083_v60 = vpop.f32.mrf.mxu2  ;;  %v1907_v44 = vpop.f32.mrf.mxu0 }
 0x26f   :  { %v2084_v30 = vadd.f32 %v2083_v60, %v1995_v40  ;;  %v5994_v17 = vpop.f32.mrf.mxu3  ;;  %v1908_v52 = vadd.f32 %v1907_v44, %v6855_v12  ;;  %v1996_v29 = vpop.f32.mrf.mxu1  ;;  %v5128_v40 = vld [vmem:[#allocation5 + $0x2c4] sm:$0xf]  ;;  %v4708_v44 = vld [vmem:[#allocation5 + $0x348] sm:$0xf0] }
 0x270   :  { %v4647_v49 = vor.u32 %v5128_v40, %v4644_v47  ;;  %v5144_v60 = vld [vmem:[#allocation5 + $0x344] sm:$0xf] }
 0x271   :  { %v1997_v5 = vadd.f32 %v1996_v29, %v1908_v52  ;;  %v2775_v62 = vmax.f32 %v2084_v30, 0.0 }
 0x272   :  { %2556 = vmatpush.bf16.msrb.mxu0 %v4647_v49  ;;  %v6863_v49 = vld [vmem:[#allocation25_spill] sm:$0xff] }
 0x276   :  { %v2085_v43 = vpop.f32.mrf.mxu2  ;;  %v1910_v14 = vpop.f32.mrf.mxu0 }
 0x277   :  { %v2086_v13 = vadd.f32 %v2085_v43, %v1997_v5  ;;  %v5997_v34 = vpop.f32.mrf.mxu3  ;;  %v1911_v53 = vadd.f32 %v1910_v14, %v5757_v31  ;;  %v1999_v45 = vpop.f32.mrf.mxu1  ;;  %v4711_v31 = vor.u32 %v5144_v60, %v4708_v44  ;;  %v6860_v5 = vld [vmem:[#allocation74_spill] sm:$0xff]  ;;  %v6865_v44 = vld [vmem:[#allocation71_spill] sm:$0xff] }
 0x279   :  { %v2777_v33 = vmax.f32 %v2086_v13, 0.0  ;;  %v2000_v25 = vadd.f32 %v1999_v45, %v1911_v53  ;;  %2225 = vmatmul.bf16.gmra.mxu0 %v6856_v1  ;;  %2645 = vmatpush.bf16.msrb.mxu1 %v4711_v31 }
 0x27a   :  { %2314 = vmatmul.bf16.gmra.mxu1 %v6857_v2 }
 0x27b   :  { %2403 = vmatmul.bf16.gmra.mxu2 %v6858_v3  ;;  %v6003_v39 = vpack.c.bf16 %v2777_v33, %v2775_v62 }
 0x27c   :  { %2492 = vmatmul.bf16.gmra.mxu3 %v6859_v48  ;;  %v6862_v48 = vld [vmem:[#allocation24_spill] sm:$0xff] }
 0x27e   :  { %v2088_v12 = vpop.f32.mrf.mxu2  ;;  %v1912_v52 = vpop.f32.mrf.mxu0 }
 0x27f   :  { %v2089_v30 = vadd.f32 %v2088_v12, %v2000_v25  ;;  %v6006_v29 = vpop.f32.mrf.mxu3  ;;  %v1913_v43 = vadd.f32 %v1912_v52, %v6860_v5  ;;  %v2001_v13 = vpop.f32.mrf.mxu1  ;;  %v6861_v25 = vld [vmem:[#allocation23_spill] sm:$0xff] }
 0x281   :  { %v2002_v14 = vadd.f32 %v2001_v13, %v1913_v43  ;;  %v2779_v3 = vmax.f32 %v2089_v30, 0.0 }
 0x286   :  { %v2090_v53 = vpop.f32.mrf.mxu2  ;;  %v1915_v62 = vpop.f32.mrf.mxu0 }
 0x287   :  { %v2091_v45 = vadd.f32 %v2090_v53, %v2002_v14  ;;  %v6009_v33 = vpop.f32.mrf.mxu3  ;;  %v1916_v1 = vadd.f32 %v1915_v62, %v5773_v42  ;;  %v2004_v2 = vpop.f32.mrf.mxu1  ;;  %v6866_v42 = vld [vmem:[#allocation78_spill] sm:$0xff] }
 0x289   :  { %v2781_v40 = vmax.f32 %v2091_v45, 0.0  ;;  %v2005_v47 = vadd.f32 %v2004_v2, %v1916_v1  ;;  %2230 = vmatmul.bf16.gmra.mxu0 %v6861_v25 }
 0x28a   :  { %2319 = vmatmul.bf16.gmra.mxu1 %v6862_v48  ;;  %v6867_v48 = vld [vmem:[#allocation26_spill] sm:$0xff] }
 0x28b   :  { %2408 = vmatmul.bf16.gmra.mxu2 %v6863_v49  ;;  %v6015_v60 = vpack.c.bf16 %v2781_v40, %v2779_v3  ;;  %v6869_v49 = vld [vmem:[#allocation28_spill] sm:$0xff] }
 0x28c   :  { %2497 = vmatmul.bf16.gmra.mxu3 %v6865_v44  ;;  %v5126_v44 = vld [vmem:[#allocation5 + $0x2b4] sm:$0xf] }
 0x28d   :  { %6864 = vst [vmem:[#allocation60_spill] sm:$0xff] %v6015_v60 }
 0x28e   :  { %v2093_v31 = vpop.f32.mrf.mxu2  ;;  %v1917_v52 = vpop.f32.mrf.mxu0 }
 0x28f   :  { %v2094_v12 = vadd.f32 %v2093_v31, %v2005_v47  ;;  %v6018_v5 = vpop.f32.mrf.mxu3  ;;  %v1918_v43 = vadd.f32 %v1917_v52, %v6866_v42  ;;  %v2006_v30 = vpop.f32.mrf.mxu1  ;;  %v6868_v47 = vld [vmem:[#allocation27_spill] sm:$0xff] }
 0x290   :  { %v4636_v31 = vld [vmem:[#allocation5 + $0x2b8] sm:$0xf0] }
 0x291   :  { %v2007_v13 = vadd.f32 %v2006_v30, %v1918_v43  ;;  %v2783_v3 = vmax.f32 %v2094_v12, 0.0  ;;  %v6870_v42 = vld [vmem:[#allocation75_spill] sm:$0xff]  ;;  %v4639_v43 = vor.u32 %v5126_v44, %v4636_v31  ;;  %v5142_v30 = vld [vmem:[#allocation5 + $0x334] sm:$0xf] }
 0x292   :  { %v4794_v44 = vld [vmem:[#allocation8 + $0x70] sm:$0xf]  ;;  %v5167_v31 = vld [vmem:[#allocation8 + $0x74] sm:$0xf0] }
 0x293   :  { %2557 = vmatpush.bf16.msrb.mxu0 %v4639_v43  ;;  %v4795_v43 = vor.u32 %v5167_v31, %v4794_v44  ;;  %v5213_v31 = vld [vmem:[#allocation7] sm:$0x3] }
 0x295   :  { %3025 = vmatpush.bf16.msrb.mxu2 %v4795_v43  ;;  %v6877_v43 = vld [vmem:[#allocation86_spill] sm:$0xff] }
 0x296   :  { %v2095_v14 = vpop.f32.mrf.mxu2  ;;  %v1920_v45 = vpop.f32.mrf.mxu0 }
 0x297   :  { %v2096_v53 = vadd.f32 %v2095_v14, %v2007_v13  ;;  %v6021_v62 = vpop.f32.mrf.mxu3  ;;  %v1921_v1 = vadd.f32 %v1920_v45, %v5789_v15  ;;  %v2009_v2 = vpop.f32.mrf.mxu1  ;;  %v4700_v13 = vld [vmem:[#allocation5 + $0x338] sm:$0xf0] }
 0x298   :  { %v4703_v15 = vor.u32 %v5142_v30, %v4700_v13 }
 0x299   :  { %v2785_v40 = vmax.f32 %v2096_v53, 0.0  ;;  %v2010_v25 = vadd.f32 %v2009_v2, %v1921_v1  ;;  %2235 = vmatmul.bf16.gmra.mxu0 %v6867_v48  ;;  %v6871_v1 = vld [vmem:[#allocation82_spill] sm:$0xff] }
 0x29a   :  { %2324 = vmatmul.bf16.gmra.mxu1 %v6868_v47 }
 0x29b   :  { %2413 = vmatmul.bf16.gmra.mxu2 %v6869_v49  ;;  %v6027_v52 = vpack.c.bf16 %v2785_v40, %v2783_v3  ;;  %2646 = vmatpush.bf16.msrb.mxu1 %v4703_v15  ;;  %v4858_v15 = vld [vmem:[#allocation8 + $0xf0] sm:$0xf] }
 0x29c   :  { %2502 = vmatmul.bf16.gmra.mxu3 %v6870_v42 }
 0x29e   :  { %v2098_v14 = vpop.f32.mrf.mxu2  ;;  %v1922_v53 = vpop.f32.mrf.mxu0 }
 0x29f   :  { %v2099_v12 = vadd.f32 %v2098_v14, %v2010_v25  ;;  %v6030_v45 = vpop.f32.mrf.mxu3  ;;  %v1923_v2 = vadd.f32 %v1922_v53, %v6871_v1  ;;  %v2011_v48 = vpop.f32.mrf.mxu1  ;;  %v5183_v53 = vld [vmem:[#allocation8 + $0xf4] sm:$0xf0]  ;;  %v6873_v1 = vld [vmem:[#allocation30_spill] sm:$0xff] }
 0x2a1   :  { %v2012_v47 = vadd.f32 %v2011_v48, %v1923_v2  ;;  %v2787_v25 = vmax.f32 %v2099_v12, 0.0  ;;  %v6874_v2 = vld [vmem:[#allocation31_spill] sm:$0xff]  ;;  %v4859_v48 = vor.u32 %v5183_v53, %v4858_v15 }
 0x2a3   :  { %3114 = vmatpush.bf16.msrb.mxu3 %v4859_v48 }
 0x2a6   :  { %v2100_v49 = vpop.f32.mrf.mxu2  ;;  %v1925_v40 = vpop.f32.mrf.mxu0 }
 0x2a7   :  { %v2101_v3 = vadd.f32 %v2100_v49, %v2012_v47  ;;  %v6033_v22 = vpop.f32.mrf.mxu3  ;;  %v1926_v42 = vadd.f32 %v1925_v40, %v5805_v57  ;;  %v2014_v30 = vpop.f32.mrf.mxu1  ;;  %v6876_v49 = vld [vmem:[#allocation79_spill] sm:$0xff] }
 0x2a9   :  { %v2789_v13 = vmax.f32 %v2101_v3, 0.0  ;;  %v2015_v14 = vadd.f32 %v2014_v30, %v1926_v42  ;;  %2240 = vmatmul.bf16.gmra.mxu0 %v6872_v27  ;;  %v6045_v42 = vperm.slane %v5213_v31, 1 }
 0x2aa   :  { %2329 = vmatmul.bf16.gmra.mxu1 %v6873_v1 }
 0x2ab   :  { %2418 = vmatmul.bf16.gmra.mxu2 %v6874_v2  ;;  %v6039_v47 = vpack.c.bf16 %v2789_v13, %v2787_v25  ;;  %v2118_v15 = vadd.f32 %v6877_v43, %v6045_v42  ;;  %v6882_v43 = vld [vmem:[#allocation83_spill] sm:$0xff] }
 0x2ac   :  { %2507 = vmatmul.bf16.gmra.mxu3 %v6876_v49 }
 0x2ad   :  { %6875 = vst [vmem:[#allocation66_spill] sm:$0xff] %v6039_v47  ;;  %v6878_v47 = vld [vmem:[#allocation32_spill] sm:$0xff] }
 0x2ae   :  { %v2103_v57 = vpop.f32.mrf.mxu2  ;;  %v1927_v12 = vpop.f32.mrf.mxu0 }
 0x2af   :  { %v2104_v40 = vadd.f32 %v2103_v57, %v2015_v14  ;;  %v6042_v3 = vpop.f32.mrf.mxu3  ;;  %v1928_v27 = vadd.f32 %v1927_v12, %v5814_v7  ;;  %v2016_v44 = vpop.f32.mrf.mxu1  ;;  %v6879_v7 = vld [vmem:[#allocation33_spill] sm:$0xff]  ;;  %v6880_v12 = vld [vmem:[#allocation34_spill] sm:$0xff] }
 0x2b1   :  { %v2017_v30 = vadd.f32 %v2016_v44, %v1928_v27  ;;  %v2791_v48 = vmax.f32 %v2104_v40, 0.0  ;;  %v5124_v27 = vld [vmem:[#allocation5 + $0x2a4] sm:$0xf]  ;;  %v4628_v44 = vld [vmem:[#allocation5 + $0x2a8] sm:$0xf0]  ;;  %v2120_v40 = vadd.f32 %v5825_v35, %v6045_v42 }
 0x2b2   :  { %v5165_v35 = vld [vmem:[#allocation8 + $0x64] sm:$0xf0] }
 0x2b6   :  { %v2105_v25 = vpop.f32.mrf.mxu2  ;;  %v2206_v1 = vpop.f32.mrf.mxu0 }
 0x2b7   :  { %v2106_v13 = vadd.f32 %v2105_v25, %v2017_v30  ;;  %v6049_v53 = vpop.f32.mrf.mxu3  ;;  %v2207_v2 = vadd.f32 %v2206_v1, %v2118_v15  ;;  %v2295_v14 = vpop.f32.mrf.mxu1  ;;  %v4631_v30 = vor.u32 %v5124_v27, %v4628_v44  ;;  %v5140_v25 = vld [vmem:[#allocation5 + $0x324] sm:$0xf] }
 0x2b8   :  { %v4695_v15 = vor.u32 %v5140_v25, %v4692_v26  ;;  %v4786_v25 = vld [vmem:[#allocation8 + $0x60] sm:$0xf] }
 0x2b9   :  { %v2793_v49 = vmax.f32 %v2106_v13, 0.0  ;;  %v2296_v57 = vadd.f32 %v2295_v14, %v2207_v2  ;;  %2245 = vmatmul.bf16.gmra.mxu0 %v6878_v47 }
 0x2ba   :  { %2334 = vmatmul.bf16.gmra.mxu1 %v6879_v7  ;;  %2558 = vmatpush.bf16.msrb.mxu0 %v4631_v30 }
 0x2bb   :  { %2423 = vmatmul.bf16.gmra.mxu2 %v6880_v12  ;;  %v6054_v31 = vpack.c.bf16 %v2793_v49, %v2791_v48  ;;  %2647 = vmatpush.bf16.msrb.mxu1 %v4695_v15  ;;  %v2123_v49 = vadd.f32 %v5838_v18, %v6045_v42  ;;  %v6885_v18 = vld [vmem:[#allocation37_spill] sm:$0xff] }
 0x2bc   :  { %2512 = vmatmul.bf16.gmra.mxu3 %v6882_v43 }
 0x2bd   :  { %6881 = vst [vmem:[#allocation17_spill] sm:$0xff] %v6054_v31 }
 0x2be   :  { %v2384_v13 = vpop.f32.mrf.mxu2  ;;  %v2208_v1 = vpop.f32.mrf.mxu0 }
 0x2bf   :  { %v2385_v47 = vadd.f32 %v2384_v13, %v2296_v57  ;;  %v2473_v2 = vpop.f32.mrf.mxu3  ;;  %v2209_v14 = vadd.f32 %v2208_v1, %v2120_v40  ;;  %v2297_v7 = vpop.f32.mrf.mxu1  ;;  %v4787_v57 = vor.u32 %v5165_v35, %v4786_v25  ;;  %v6883_v40 = vld [vmem:[#allocation35_spill] sm:$0xff]  ;;  %v5181_v1 = vld [vmem:[#allocation8 + $0xe4] sm:$0xf0]  ;;  %v2128_v35 = vadd.f32 %v5856_v19, %v6045_v42 }
 0x2c1   :  { %v6059_v12 = vadd.f32 %v2473_v2, %v2385_v47  ;;  %v2298_v48 = vadd.f32 %v2297_v7, %v2209_v14  ;;  %3026 = vmatpush.bf16.msrb.mxu2 %v4787_v57  ;;  %v4850_v47 = vld [vmem:[#allocation8 + $0xe0] sm:$0xf]  ;;  %v2125_v7 = vadd.f32 %v5843_v41, %v6045_v42 }
 0x2c2   :  { %v6884_v2 = vld [vmem:[#allocation36_spill] sm:$0xff]  ;;  %v4851_v14 = vor.u32 %v5181_v1, %v4850_v47 }
 0x2c4   :  { %3115 = vmatpush.bf16.msrb.mxu3 %v4851_v14  ;;  %v6888_v14 = vld [vmem:[#allocation40_spill] sm:$0xff] }
 0x2c6   :  { %v2386_v27 = vpop.f32.mrf.mxu2  ;;  %v2211_v26 = vpop.f32.mrf.mxu0 }
 0x2c7   :  { %v2387_v44 = vadd.f32 %v2386_v27, %v2298_v48  ;;  %v2475_v43 = vpop.f32.mrf.mxu3  ;;  %v2212_v31 = vadd.f32 %v2211_v26, %v2123_v49  ;;  %v2300_v30 = vpop.f32.mrf.mxu1 }
 0x2c9   :  { %v6063_v13 = vadd.f32 %v2475_v43, %v2387_v44  ;;  %v2301_v15 = vadd.f32 %v2300_v30, %v2212_v31  ;;  %2250 = vmatmul.bf16.gmra.mxu0 %v6883_v40 }
 0x2ca   :  { %2339 = vmatmul.bf16.gmra.mxu1 %v6884_v2 }
 0x2cb   :  { %2428 = vmatmul.bf16.gmra.mxu2 %v6885_v18  ;;  %v6887_v18 = vld [vmem:[#allocation39_spill] sm:$0xff] }
 0x2cc   :  { %2517 = vmatmul.bf16.gmra.mxu3 %v5823_v20 }
 0x2ce   :  { %v2389_v48 = vpop.f32.mrf.mxu2  ;;  %v2213_v27 = vpop.f32.mrf.mxu0 }
 0x2cf   :  { %v2390_v49 = vadd.f32 %v2389_v48, %v2301_v15  ;;  %v2478_v31 = vpop.f32.mrf.mxu3  ;;  %v2214_v44 = vadd.f32 %v2213_v27, %v2125_v7  ;;  %v2302_v26 = vpop.f32.mrf.mxu1  ;;  %v6886_v15 = vld [vmem:[#allocation38_spill] sm:$0xff]  ;;  %v4620_v48 = vld [vmem:[#allocation5 + $0x298] sm:$0xf0] }
 0x2d0   :  { %v5122_v7 = vld [vmem:[#allocation5 + $0x294] sm:$0xf]  ;;  %v4684_v27 = vld [vmem:[#allocation5 + $0x318] sm:$0xf0] }
 0x2d1   :  { %v6071_v43 = vadd.f32 %v2478_v31, %v2390_v49  ;;  %v2303_v25 = vadd.f32 %v2302_v26, %v2214_v44  ;;  %v4623_v19 = vor.u32 %v5122_v7, %v4620_v48  ;;  %v5138_v49 = vld [vmem:[#allocation5 + $0x314] sm:$0xf]  ;;  %v2130_v44 = vadd.f32 %v5861_v37, %v6045_v42  ;;  %v5163_v37 = vld [vmem:[#allocation8 + $0x54] sm:$0xf0] }
 0x2d2   :  { %v4687_v31 = vor.u32 %v5138_v49, %v4684_v27  ;;  %v4778_v7 = vld [vmem:[#allocation8 + $0x50] sm:$0xf] }
 0x2d3   :  { %2559 = vmatpush.bf16.msrb.mxu0 %v4623_v19 }
 0x2d4   :  { %2648 = vmatpush.bf16.msrb.mxu1 %v4687_v31  ;;  %v6889_v31 = vld [vmem:[#allocation41_spill] sm:$0xff] }
 0x2d6   :  { %v2391_v30 = vpop.f32.mrf.mxu2  ;;  %v2216_v40 = vpop.f32.mrf.mxu0 }
 0x2d7   :  { %v2392_v57 = vadd.f32 %v2391_v30, %v2303_v25  ;;  %v2480_v20 = vpop.f32.mrf.mxu3  ;;  %v2217_v47 = vadd.f32 %v2216_v40, %v2128_v35  ;;  %v2305_v1 = vpop.f32.mrf.mxu1 }
 0x2d9   :  { %v6075_v2 = vadd.f32 %v2480_v20, %v2392_v57  ;;  %v2306_v41 = vadd.f32 %v2305_v1, %v2217_v47  ;;  %2255 = vmatmul.bf16.gmra.mxu0 %v6886_v15 }
 0x2da   :  { %2344 = vmatmul.bf16.gmra.mxu1 %v6887_v18 }
 0x2db   :  { %2433 = vmatmul.bf16.gmra.mxu2 %v6888_v14 }
 0x2dc   :  { %2522 = vmatmul.bf16.gmra.mxu3 %v5841_v4  ;;  %v2133_v4 = vadd.f32 %v5874_v32, %v6045_v42  ;;  %v6891_v32 = vld [vmem:[#allocation43_spill] sm:$0xff] }
 0x2de   :  { %v2394_v26 = vpop.f32.mrf.mxu2  ;;  %v2218_v35 = vpop.f32.mrf.mxu0 }
 0x2df   :  { %v2395_v25 = vadd.f32 %v2394_v26, %v2306_v41  ;;  %v2483_v30 = vpop.f32.mrf.mxu3  ;;  %v2219_v57 = vadd.f32 %v2218_v35, %v2130_v44  ;;  %v2307_v40 = vpop.f32.mrf.mxu1  ;;  %v4779_v41 = vor.u32 %v5163_v37, %v4778_v7  ;;  %v4842_v44 = vld [vmem:[#allocation8 + $0xd0] sm:$0xf]  ;;  %v5179_v26 = vld [vmem:[#allocation8 + $0xd4] sm:$0xf0]  ;;  %v6893_v37 = vld [vmem:[#allocation101_spill] sm:$0xff] }
 0x2e0   :  { %v4843_v35 = vor.u32 %v5179_v26, %v4842_v44 }
 0x2e1   :  { %v6083_v20 = vadd.f32 %v2483_v30, %v2395_v25  ;;  %v2308_v47 = vadd.f32 %v2307_v40, %v2219_v57  ;;  %3027 = vmatpush.bf16.msrb.mxu2 %v4779_v41  ;;  %v6890_v25 = vld [vmem:[#allocation42_spill] sm:$0xff]  ;;  %v6892_v30 = vld [vmem:[#allocation97_spill] sm:$0xff] }
 0x2e2   :  { %3116 = vmatpush.bf16.msrb.mxu3 %v4843_v35  ;;  %v2135_v57 = vadd.f32 %v6892_v30, %v6045_v42  ;;  %v6895_v35 = vld [vmem:[#allocation45_spill] sm:$0xff]  ;;  %v6896_v30 = vld [vmem:[#allocation46_spill] sm:$0xff] }
 0x2e6   :  { %v2396_v1 = vpop.f32.mrf.mxu2  ;;  %v2221_v18 = vpop.f32.mrf.mxu0 }
 0x2e7   :  { %v2397_v15 = vadd.f32 %v2396_v1, %v2308_v47  ;;  %v2485_v14 = vpop.f32.mrf.mxu3  ;;  %v2222_v48 = vadd.f32 %v2221_v18, %v2133_v4  ;;  %v2310_v19 = vpop.f32.mrf.mxu1 }
 0x2e9   :  { %v6087_v49 = vadd.f32 %v2485_v14, %v2397_v15  ;;  %v2311_v27 = vadd.f32 %v2310_v19, %v2222_v48  ;;  %2260 = vmatmul.bf16.gmra.mxu0 %v6889_v31  ;;  %v2138_v48 = vadd.f32 %v6893_v37, %v6045_v42 }
 0x2ea   :  { %2349 = vmatmul.bf16.gmra.mxu1 %v6890_v25 }
 0x2eb   :  { %2438 = vmatmul.bf16.gmra.mxu2 %v6891_v32 }
 0x2ec   :  { %2527 = vmatmul.bf16.gmra.mxu3 %v5859_v0 }
 0x2ee   :  { %v2399_v40 = vpop.f32.mrf.mxu2  ;;  %v2223_v4 = vpop.f32.mrf.mxu0 }
 0x2ef   :  { %v2400_v47 = vadd.f32 %v2399_v40, %v2311_v27  ;;  %v2488_v1 = vpop.f32.mrf.mxu3  ;;  %v2224_v15 = vadd.f32 %v2223_v4, %v2135_v57  ;;  %v2312_v18 = vpop.f32.mrf.mxu1  ;;  %v6894_v27 = vld [vmem:[#allocation44_spill] sm:$0xff]  ;;  %v4612_v40 = vld [vmem:[#allocation5 + $0x288] sm:$0xf0] }
 0x2f0   :  { %v5120_v57 = vld [vmem:[#allocation5 + $0x284] sm:$0xf] }
 0x2f1   :  { %v6095_v14 = vadd.f32 %v2488_v1, %v2400_v47  ;;  %v2313_v7 = vadd.f32 %v2312_v18, %v2224_v15  ;;  %v6897_v47 = vld [vmem:[#allocation96_spill] sm:$0xff]  ;;  %v4615_v4 = vor.u32 %v5120_v57, %v4612_v40  ;;  %v4676_v15 = vld [vmem:[#allocation5 + $0x308] sm:$0xf0] }
 0x2f2   :  { %v5136_v1 = vld [vmem:[#allocation5 + $0x304] sm:$0xf] }
 0x2f3   :  { %v4679_v18 = vor.u32 %v5136_v1, %v4676_v15  ;;  %2560 = vmatpush.bf16.msrb.mxu0 %v4615_v4  ;;  %v4762_v15 = vld [vmem:[#allocation8 + $0x30] sm:$0xf] }
 0x2f5   :  { %2649 = vmatpush.bf16.msrb.mxu1 %v4679_v18  ;;  %v5159_v18 = vld [vmem:[#allocation8 + $0x34] sm:$0xf0] }
 0x2f6   :  { %v2401_v19 = vpop.f32.mrf.mxu2  ;;  %v2226_v31 = vpop.f32.mrf.mxu0 }
 0x2f7   :  { %v2402_v41 = vadd.f32 %v2401_v19, %v2313_v7  ;;  %v2490_v0 = vpop.f32.mrf.mxu3  ;;  %v2227_v44 = vadd.f32 %v2226_v31, %v2138_v48  ;;  %v2315_v26 = vpop.f32.mrf.mxu1  ;;  %v2140_v7 = vadd.f32 %v5897_v24, %v6045_v42 }
 0x2f9   :  { %v6099_v25 = vadd.f32 %v2490_v0, %v2402_v41  ;;  %v2316_v32 = vadd.f32 %v2315_v26, %v2227_v44  ;;  %2265 = vmatmul.bf16.gmra.mxu0 %v6894_v27  ;;  %v4770_v27 = vld [vmem:[#allocation8 + $0x40] sm:$0xf] }
 0x2fa   :  { %2354 = vmatmul.bf16.gmra.mxu1 %v6895_v35  ;;  %v5161_v35 = vld [vmem:[#allocation8 + $0x44] sm:$0xf0] }
 0x2fb   :  { %2443 = vmatmul.bf16.gmra.mxu2 %v6896_v30  ;;  %v2143_v30 = vadd.f32 %v5910_v59, %v6045_v42  ;;  %v4771_v40 = vor.u32 %v5161_v35, %v4770_v27  ;;  %v6900_v59 = vld [vmem:[#allocation49_spill] sm:$0xff]  ;;  %v4754_v27 = vld [vmem:[#allocation8 + $0x20] sm:$0xf] }
 0x2fc   :  { %2532 = vmatmul.bf16.gmra.mxu3 %v6897_v47  ;;  %v5157_v35 = vld [vmem:[#allocation8 + $0x24] sm:$0xf0] }
 0x2fd   :  { %3028 = vmatpush.bf16.msrb.mxu2 %v4771_v40  ;;  %v4755_v40 = vor.u32 %v5157_v35, %v4754_v27 }
 0x2fe   :  { %v2404_v37 = vpop.f32.mrf.mxu2  ;;  %v2228_v19 = vpop.f32.mrf.mxu0 }
 0x2ff   :  { %v2405_v48 = vadd.f32 %v2404_v37, %v2316_v32  ;;  %v2493_v41 = vpop.f32.mrf.mxu3  ;;  %v2229_v31 = vadd.f32 %v2228_v19, %v2140_v7  ;;  %v2317_v0 = vpop.f32.mrf.mxu1  ;;  %v6898_v37 = vld [vmem:[#allocation47_spill] sm:$0xff]  ;;  %v5177_v19 = vld [vmem:[#allocation8 + $0xc4] sm:$0xf0] }
 0x301   :  { %v6107_v44 = vadd.f32 %v2493_v41, %v2405_v48  ;;  %v2318_v26 = vadd.f32 %v2317_v0, %v2229_v31  ;;  %v4834_v48 = vld [vmem:[#allocation8 + $0xc0] sm:$0xf]  ;;  %v4763_v41 = vor.u32 %v5159_v18, %v4762_v15 }
 0x302   :  { %v6899_v31 = vld [vmem:[#allocation48_spill] sm:$0xff]  ;;  %v4835_v0 = vor.u32 %v5177_v19, %v4834_v48  ;;  %v4746_v48 = vld [vmem:[#allocation8 + $0x10] sm:$0xf]  ;;  %v5155_v19 = vld [vmem:[#allocation8 + $0x14] sm:$0xf0] }
 0x303   :  { %3029 = vmatpush.bf16.msrb.mxu2 %v4763_v41  ;;  %v4747_v41 = vor.u32 %v5155_v19, %v4746_v48  ;;  %v4796_v48 = vld [vmem:[#allocation8 + $0x78] sm:$0xf0] }
 0x304   :  { %3117 = vmatpush.bf16.msrb.mxu3 %v4835_v0  ;;  %v5153_v0 = vld [vmem:[#allocation8 + $0x4] sm:$0xf0] }
 0x306   :  { %v2406_v57 = vpop.f32.mrf.mxu2  ;;  %v2231_v24 = vpop.f32.mrf.mxu0 }
 0x307   :  { %v6111_v47 = vadd.f32 %v2406_v57, %v2318_v26  ;;  %v6113_v4 = vpop.f32.mrf.mxu3  ;;  %v2232_v32 = vadd.f32 %v2231_v24, %v2143_v30  ;;  %v2320_v1 = vpop.f32.mrf.mxu1  ;;  %v6901_v26 = vld [vmem:[#allocation102_spill] sm:$0xff]  ;;  %v2145_v30 = vadd.f32 %v5915_v11, %v6045_v42  ;;  %3030 = vmatpush.bf16.msrb.mxu2 %v4755_v40  ;;  %v2148_v11 = vadd.f32 %v5928_v50, %v6045_v42 }
 0x308   :  { %v5182_v50 = vld [vmem:[#allocation8 + $0xf4] sm:$0xf] }
 0x309   :  { %v2321_v7 = vadd.f32 %v2320_v1, %v2232_v32  ;;  %2270 = vmatmul.bf16.gmra.mxu0 %v6898_v37 }
 0x30a   :  { %2359 = vmatmul.bf16.gmra.mxu1 %v6899_v31 }
 0x30b   :  { %2448 = vmatmul.bf16.gmra.mxu2 %v6900_v59  ;;  %v4738_v59 = vld [vmem:[#allocation8] sm:$0xf] }
 0x30c   :  { %2537 = vmatmul.bf16.gmra.mxu3 %v6901_v26  ;;  %3031 = vmatpush.bf16.msrb.mxu2 %v4747_v41  ;;  %v4739_v27 = vor.u32 %v5153_v0, %v4738_v59  ;;  %v2150_v59 = vadd.f32 %v5933_v51, %v6045_v42 }
 0x30e   :  { %v2409_v57 = vpop.f32.mrf.mxu2  ;;  %v2233_v32 = vpop.f32.mrf.mxu0 }
 0x30f   :  { %v2410_v24 = vadd.f32 %v2409_v57, %v2321_v7  ;;  %v2498_v1 = vpop.f32.mrf.mxu3  ;;  %v2234_v15 = vadd.f32 %v2233_v32, %v2145_v30  ;;  %v2322_v18 = vpop.f32.mrf.mxu1  ;;  %v6902_v32 = vld [vmem:[#allocation50_spill] sm:$0xff] }
 0x310   :  { %3032 = vmatpush.bf16.msrb.mxu2 %v4739_v27 }
 0x311   :  { %v6121_v37 = vadd.f32 %v2498_v1, %v2410_v24  ;;  %v2323_v31 = vadd.f32 %v2322_v18, %v2234_v15  ;;  %v6903_v1 = vld [vmem:[#allocation51_spill] sm:$0xff]  ;;  %v6904_v15 = vld [vmem:[#allocation52_spill] sm:$0xff]  ;;  %v5166_v18 = vld [vmem:[#allocation8 + $0x74] sm:$0xf] }
 0x312   :  { %v4799_v19 = vor.u32 %v5166_v18, %v4796_v48 }
 0x314   :  { %3203 = vmatpush.bf16.msra.mxu0 %v4799_v19  ;;  %v6905_v19 = vld [vmem:[#allocation53_spill] sm:$0xff] }
 0x316   :  { %v2411_v26 = vpop.f32.mrf.mxu2  ;;  %v2236_v35 = vpop.f32.mrf.mxu0 }
 0x317   :  { %v6125_v7 = vadd.f32 %v2411_v26, %v2323_v31  ;;  %v6127_v30 = vpop.f32.mrf.mxu3  ;;  %v2237_v57 = vadd.f32 %v2236_v35, %v2148_v11  ;;  %v2325_v40 = vpop.f32.mrf.mxu1  ;;  %v4860_v31 = vld [vmem:[#allocation8 + $0xf8] sm:$0xf0] }
 0x318   :  { %v4863_v41 = vor.u32 %v5182_v50, %v4860_v31  ;;  %v4826_v31 = vld [vmem:[#allocation8 + $0xb0] sm:$0xf] }
 0x319   :  { %v2326_v24 = vadd.f32 %v2325_v40, %v2237_v57  ;;  %2275 = vmatmul.bf16.gmra.mxu0 %v6902_v32 }
 0x31a   :  { %2364 = vmatmul.bf16.gmra.mxu1 %v6903_v1 }
 0x31b   :  { %2453 = vmatmul.bf16.gmra.mxu2 %v6904_v15  ;;  %3292 = vmatpush.bf16.msra.mxu1 %v4863_v41  ;;  %v5175_v41 = vld [vmem:[#allocation8 + $0xb4] sm:$0xf0] }
 0x31c   :  { %2542 = vmatmul.bf16.gmra.mxu3 %v5913_v6  ;;  %v2153_v6 = vadd.f32 %v5946_v61, %v6045_v42  ;;  %v2155_v61 = vadd.f32 %v5949_v54, %v6045_v42 }
 0x31e   :  { %v2414_v0 = vpop.f32.mrf.mxu2  ;;  %v2238_v26 = vpop.f32.mrf.mxu0 }
 0x31f   :  { %v2415_v11 = vadd.f32 %v2414_v0, %v2326_v24  ;;  %v2503_v27 = vpop.f32.mrf.mxu3  ;;  %v2239_v35 = vadd.f32 %v2238_v26, %v2150_v59  ;;  %v2327_v57 = vpop.f32.mrf.mxu1  ;;  %v6906_v59 = vld [vmem:[#allocation54_spill] sm:$0xff]  ;;  %v6907_v0 = vld [vmem:[#allocation55_spill] sm:$0xff] }
 0x321   :  { %v6135_v40 = vadd.f32 %v2503_v27, %v2415_v11  ;;  %v2328_v32 = vadd.f32 %v2327_v57, %v2239_v35  ;;  %v4827_v11 = vor.u32 %v5175_v41, %v4826_v31 }
 0x323   :  { %3118 = vmatpush.bf16.msrb.mxu3 %v4827_v11  ;;  %v6910_v11 = vld [vmem:[#allocation89_spill] sm:$0xff] }
 0x326   :  { %v2416_v1 = vpop.f32.mrf.mxu2  ;;  %v2241_v18 = vpop.f32.mrf.mxu0 }
 0x327   :  { %v6139_v15 = vadd.f32 %v2416_v1, %v2328_v32  ;;  %v6141_v48 = vpop.f32.mrf.mxu3  ;;  %v2242_v51 = vadd.f32 %v2241_v18, %v2153_v6  ;;  %v2330_v50 = vpop.f32.mrf.mxu1 }
 0x329   :  { %v2331_v24 = vadd.f32 %v2330_v50, %v2242_v51  ;;  %2280 = vmatmul.bf16.gmra.mxu0 %v6905_v19  ;;  %v2158_v51 = vadd.f32 %v5958_v58, %v6045_v42  ;;  %v4852_v58 = vld [vmem:[#allocation8 + $0xe8] sm:$0xf0] }
 0x32a   :  { %2369 = vmatmul.bf16.gmra.mxu1 %v6906_v59 }
 0x32b   :  { %2458 = vmatmul.bf16.gmra.mxu2 %v6907_v0  ;;  %v6909_v0 = vld [vmem:[#allocation57_spill] sm:$0xff] }
 0x32c   :  { %2547 = vmatmul.bf16.gmra.mxu3 %v5931_v8 }
 0x32e   :  { %v2419_v26 = vpop.f32.mrf.mxu2  ;;  %v2243_v35 = vpop.f32.mrf.mxu0 }
 0x32f   :  { %v2420_v27 = vadd.f32 %v2419_v26, %v2331_v24  ;;  %v2508_v57 = vpop.f32.mrf.mxu3  ;;  %v2244_v32 = vadd.f32 %v2243_v35, %v2155_v61  ;;  %v2332_v6 = vpop.f32.mrf.mxu1  ;;  %v6908_v24 = vld [vmem:[#allocation56_spill] sm:$0xff]  ;;  %v4788_v26 = vld [vmem:[#allocation8 + $0x68] sm:$0xf0] }
 0x330   :  { %v5164_v61 = vld [vmem:[#allocation8 + $0x64] sm:$0xf] }
 0x331   :  { %v6149_v1 = vadd.f32 %v2508_v57, %v2420_v27  ;;  %v2333_v18 = vadd.f32 %v2332_v6, %v2244_v32  ;;  %v5180_v27 = vld [vmem:[#allocation8 + $0xe4] sm:$0xf]  ;;  %v4791_v35 = vor.u32 %v5164_v61, %v4788_v26  ;;  %v2160_v32 = vadd.f32 %v5961_v38, %v6045_v42 }
 0x332   :  { %v4855_v57 = vor.u32 %v5180_v27, %v4852_v58 }
 0x333   :  { %3204 = vmatpush.bf16.msra.mxu0 %v4791_v35 }
 0x334   :  { %3293 = vmatpush.bf16.msra.mxu1 %v4855_v57  ;;  %v4818_v57 = vld [vmem:[#allocation8 + $0xa0] sm:$0xf] }
 0x336   :  { %v2421_v50 = vpop.f32.mrf.mxu2  ;;  %v2246_v8 = vpop.f32.mrf.mxu0 }
 0x337   :  { %v6153_v19 = vadd.f32 %v2421_v50, %v2333_v18  ;;  %v6155_v31 = vpop.f32.mrf.mxu3  ;;  %v2247_v41 = vadd.f32 %v2246_v8, %v2158_v51  ;;  %v2335_v54 = vpop.f32.mrf.mxu1 }
 0x339   :  { %v2336_v59 = vadd.f32 %v2335_v54, %v2247_v41  ;;  %2561 = vmatmul.bf16.vlgmr.msrb.gmra.mxu0 %v6908_v24 }
 0x33a   :  { %2650 = vmatmul.bf16.vlgmr.msrb.gmra.mxu1 %v6909_v0  ;;  %v2163_v0 = vadd.f32 %v5970_v23, %v6045_v42  ;;  %v2165_v23 = vadd.f32 %v5973_v10, %v6045_v42 }
 0x33b   :  { %3033 = vmatmul.bf16.vlgmr.msrb.gmra.mxu2 %v6910_v11 }
 0x33e   :  { %v2424_v6 = vpop.f32.mrf.mxu2  ;;  %v2248_v51 = vpop.f32.mrf.mxu0 }
 0x33f   :  { %v2425_v18 = vadd.f32 %v2424_v6, %v2336_v59  ;;  %v2513_v50 = vpop.f32.mrf.mxu3  ;;  %v2249_v8 = vadd.f32 %v2248_v51, %v2160_v32  ;;  %v2337_v41 = vpop.f32.mrf.mxu1  ;;  %v6912_v6 = vld [vmem:[#allocation58_spill] sm:$0xff]  ;;  %v5173_v32 = vld [vmem:[#allocation8 + $0xa4] sm:$0xf0]  ;;  %v6913_v51 = vld [vmem:[#allocation59_spill] sm:$0xff] }
 0x341   :  { %v6162_v54 = vadd.f32 %v2513_v50, %v2425_v18  ;;  %v2338_v24 = vadd.f32 %v2337_v41, %v2249_v8  ;;  %v6914_v18 = vld [vmem:[#allocation92_spill] sm:$0xff]  ;;  %v4819_v50 = vor.u32 %v5173_v32, %v4818_v57 }
 0x343   :  { %3119 = vmatpush.bf16.msrb.mxu3 %v4819_v50 }
 0x346   :  { %v2426_v61 = vpop.f32.mrf.mxu2  ;;  %v2251_v27 = vpop.f32.mrf.mxu0 }
 0x347   :  { %v6166_v26 = vadd.f32 %v2426_v61, %v2338_v24  ;;  %v6168_v58 = vpop.f32.mrf.mxu3  ;;  %v2252_v38 = vadd.f32 %v2251_v27, %v2163_v0  ;;  %v2340_v35 = vpop.f32.mrf.mxu1 }
 0x348   :  { %6911 = vst [vmem:[#allocation18_spill] sm:$0xff] %v6168_v58 }
 0x349   :  { %v2341_v59 = vadd.f32 %v2340_v35, %v2252_v38  ;;  %2566 = vmatmul.bf16.gmra.mxu0 %v6912_v6  ;;  %v2168_v6 = vadd.f32 %v5982_v16, %v6045_v42  ;;  %v4844_v16 = vld [vmem:[#allocation8 + $0xd8] sm:$0xf0] }
 0x34a   :  { %2655 = vmatmul.bf16.gmra.mxu1 %v6913_v51 }
 0x34b   :  { %3038 = vmatmul.bf16.gmra.mxu2 %v6914_v18 }
 0x34e   :  { %v2429_v8 = vpop.f32.mrf.mxu2  ;;  %v2253_v24 = vpop.f32.mrf.mxu0 }
 0x34f   :  { %v2430_v41 = vadd.f32 %v2429_v8, %v2341_v59  ;;  %v2518_v61 = vpop.f32.mrf.mxu3  ;;  %v2254_v0 = vadd.f32 %v2253_v24, %v2165_v23  ;;  %v2342_v27 = vpop.f32.mrf.mxu1  ;;  %v6916_v59 = vld [vmem:[#allocation61_spill] sm:$0xff]  ;;  %v6917_v8 = vld [vmem:[#allocation62_spill] sm:$0xff]  ;;  %v6918_v23 = vld [vmem:[#allocation95_spill] sm:$0xff] }
 0x350   :  { %v4780_v24 = vld [vmem:[#allocation8 + $0x58] sm:$0xf0] }
 0x351   :  { %v6175_v38 = vadd.f32 %v2518_v61, %v2430_v41  ;;  %v2343_v35 = vadd.f32 %v2342_v27, %v2254_v0  ;;  %v5162_v41 = vld [vmem:[#allocation8 + $0x54] sm:$0xf] }
 0x352   :  { %v5178_v61 = vld [vmem:[#allocation8 + $0xd4] sm:$0xf]  ;;  %v4783_v0 = vor.u32 %v5162_v41, %v4780_v24 }
 0x353   :  { %v4847_v27 = vor.u32 %v5178_v61, %v4844_v16 }
 0x354   :  { %3205 = vmatpush.bf16.msra.mxu0 %v4783_v0 }
 0x355   :  { %3294 = vmatpush.bf16.msra.mxu1 %v4847_v27  ;;  %v4810_v27 = vld [vmem:[#allocation8 + $0x90] sm:$0xf] }
 0x356   :  { %v2431_v51 = vpop.f32.mrf.mxu2  ;;  %v2256_v57 = vpop.f32.mrf.mxu0 }
 0x357   :  { %v6179_v58 = vadd.f32 %v2431_v51, %v2343_v35  ;;  %v6181_v32 = vpop.f32.mrf.mxu3  ;;  %v2257_v50 = vadd.f32 %v2256_v57, %v2168_v6  ;;  %v2345_v10 = vpop.f32.mrf.mxu1  ;;  %v2170_v35 = vadd.f32 %v5985_v21, %v6045_v42 }
 0x358   :  { %6915 = vst [vmem:[#allocation19_spill] sm:$0xff] %v6181_v32  ;;  %v2173_v32 = vadd.f32 %v5994_v17, %v6045_v42  ;;  %v2175_v17 = vadd.f32 %v5997_v34, %v6045_v42 }
 0x359   :  { %v2346_v18 = vadd.f32 %v2345_v10, %v2257_v50  ;;  %2571 = vmatmul.bf16.gmra.mxu0 %v6916_v59 }
 0x35a   :  { %2660 = vmatmul.bf16.gmra.mxu1 %v6917_v8 }
 0x35b   :  { %3043 = vmatmul.bf16.gmra.mxu2 %v6918_v23 }
 0x35e   :  { %v2434_v51 = vpop.f32.mrf.mxu2  ;;  %v2258_v57 = vpop.f32.mrf.mxu0 }
 0x35f   :  { %v2435_v6 = vadd.f32 %v2434_v51, %v2346_v18  ;;  %v2523_v50 = vpop.f32.mrf.mxu3  ;;  %v2259_v10 = vadd.f32 %v2258_v57, %v2170_v35  ;;  %v2347_v59 = vpop.f32.mrf.mxu1  ;;  %v6920_v51 = vld [vmem:[#allocation64_spill] sm:$0xff]  ;;  %v5171_v35 = vld [vmem:[#allocation8 + $0x94] sm:$0xf0]  ;;  %v6921_v57 = vld [vmem:[#allocation65_spill] sm:$0xff] }
 0x361   :  { %v6188_v8 = vadd.f32 %v2523_v50, %v2435_v6  ;;  %v2348_v23 = vadd.f32 %v2347_v59, %v2259_v10  ;;  %v6922_v6 = vld [vmem:[#allocation100_spill] sm:$0xff]  ;;  %v4811_v50 = vor.u32 %v5171_v35, %v4810_v27 }
 0x363   :  { %3120 = vmatpush.bf16.msrb.mxu3 %v4811_v50 }
 0x366   :  { %v2436_v41 = vpop.f32.mrf.mxu2  ;;  %v2261_v61 = vpop.f32.mrf.mxu0 }
 0x367   :  { %v6192_v24 = vadd.f32 %v2436_v41, %v2348_v23  ;;  %v6194_v16 = vpop.f32.mrf.mxu3  ;;  %v2262_v21 = vadd.f32 %v2261_v61, %v2173_v32  ;;  %v2350_v0 = vpop.f32.mrf.mxu1 }
 0x368   :  { %6919 = vst [vmem:[#allocation63_spill] sm:$0xff] %v6194_v16 }
 0x369   :  { %v2351_v18 = vadd.f32 %v2350_v0, %v2262_v21  ;;  %2576 = vmatmul.bf16.gmra.mxu0 %v6920_v51  ;;  %v2178_v51 = vadd.f32 %v6006_v29, %v6045_v42  ;;  %v4836_v29 = vld [vmem:[#allocation8 + $0xc8] sm:$0xf0] }
 0x36a   :  { %2665 = vmatmul.bf16.gmra.mxu1 %v6921_v57 }
 0x36b   :  { %3048 = vmatmul.bf16.gmra.mxu2 %v6922_v6 }
 0x36e   :  { %v2439_v23 = vpop.f32.mrf.mxu2  ;;  %v2263_v59 = vpop.f32.mrf.mxu0 }
 0x36f   :  { %v2440_v10 = vadd.f32 %v2439_v23, %v2351_v18  ;;  %v2528_v41 = vpop.f32.mrf.mxu3  ;;  %v2264_v32 = vadd.f32 %v2263_v59, %v2175_v17  ;;  %v2352_v61 = vpop.f32.mrf.mxu1  ;;  %v6924_v18 = vld [vmem:[#allocation68_spill] sm:$0xff]  ;;  %v6925_v23 = vld [vmem:[#allocation69_spill] sm:$0xff] }
 0x370   :  { %v6926_v17 = vld [vmem:[#allocation105_spill] sm:$0xff] }
 0x371   :  { %v6201_v21 = vadd.f32 %v2528_v41, %v2440_v10  ;;  %v2353_v0 = vadd.f32 %v2352_v61, %v2264_v32  ;;  %v5160_v10 = vld [vmem:[#allocation8 + $0x44] sm:$0xf]  ;;  %v4772_v59 = vld [vmem:[#allocation8 + $0x48] sm:$0xf0] }
 0x372   :  { %v5176_v41 = vld [vmem:[#allocation8 + $0xc4] sm:$0xf]  ;;  %v4775_v32 = vor.u32 %v5160_v10, %v4772_v59 }
 0x373   :  { %v4839_v61 = vor.u32 %v5176_v41, %v4836_v29 }
 0x374   :  { %3206 = vmatpush.bf16.msra.mxu0 %v4775_v32 }
 0x375   :  { %3295 = vmatpush.bf16.msra.mxu1 %v4839_v61  ;;  %v4802_v61 = vld [vmem:[#allocation8 + $0x80] sm:$0xf] }
 0x376   :  { %v2441_v57 = vpop.f32.mrf.mxu2  ;;  %v2266_v27 = vpop.f32.mrf.mxu0 }
 0x377   :  { %v6205_v16 = vadd.f32 %v2441_v57, %v2353_v0  ;;  %v6207_v35 = vpop.f32.mrf.mxu3  ;;  %v2267_v50 = vadd.f32 %v2266_v27, %v2178_v51  ;;  %v2355_v34 = vpop.f32.mrf.mxu1  ;;  %v2180_v0 = vadd.f32 %v6009_v33, %v6045_v42 }
 0x378   :  { %6923 = vst [vmem:[#allocation70_spill] sm:$0xff] %v6207_v35  ;;  %v2183_v35 = vadd.f32 %v6018_v5, %v6045_v42  ;;  %v2185_v5 = vadd.f32 %v6021_v62, %v6045_v42 }
 0x379   :  { %v2356_v6 = vadd.f32 %v2355_v34, %v2267_v50  ;;  %2581 = vmatmul.bf16.gmra.mxu0 %v6924_v18 }
 0x37a   :  { %2670 = vmatmul.bf16.gmra.mxu1 %v6925_v23 }
 0x37b   :  { %3053 = vmatmul.bf16.gmra.mxu2 %v6926_v17 }
 0x37e   :  { %v2444_v57 = vpop.f32.mrf.mxu2  ;;  %v2268_v27 = vpop.f32.mrf.mxu0 }
 0x37f   :  { %v2445_v51 = vadd.f32 %v2444_v57, %v2356_v6  ;;  %v2533_v50 = vpop.f32.mrf.mxu3  ;;  %v2269_v34 = vadd.f32 %v2268_v27, %v2180_v0  ;;  %v2357_v18 = vpop.f32.mrf.mxu1  ;;  %v6927_v57 = vld [vmem:[#allocation72_spill] sm:$0xff]  ;;  %v5169_v0 = vld [vmem:[#allocation8 + $0x84] sm:$0xf0] }
 0x380   :  { %v6928_v27 = vld [vmem:[#allocation73_spill] sm:$0xff] }
 0x381   :  { %v6214_v23 = vadd.f32 %v2533_v50, %v2445_v51  ;;  %v2358_v17 = vadd.f32 %v2357_v18, %v2269_v34  ;;  %v4803_v51 = vor.u32 %v5169_v0, %v4802_v61 }
 0x383   :  { %3121 = vmatpush.bf16.msrb.mxu3 %v4803_v51 }
 0x386   :  { %v2446_v10 = vpop.f32.mrf.mxu2  ;;  %v2271_v41 = vpop.f32.mrf.mxu0 }
 0x387   :  { %v6218_v59 = vadd.f32 %v2446_v10, %v2358_v17  ;;  %v6220_v29 = vpop.f32.mrf.mxu3  ;;  %v2272_v33 = vadd.f32 %v2271_v41, %v2183_v35  ;;  %v2360_v32 = vpop.f32.mrf.mxu1 }
 0x389   :  { %v2361_v6 = vadd.f32 %v2360_v32, %v2272_v33  ;;  %2586 = vmatmul.bf16.gmra.mxu0 %v6927_v57  ;;  %v2188_v32 = vadd.f32 %v6030_v45, %v6045_v42  ;;  %v4828_v45 = vld [vmem:[#allocation8 + $0xb8] sm:$0xf0] }
 0x38a   :  { %2675 = vmatmul.bf16.gmra.mxu1 %v6928_v27 }
 0x38b   :  { %3058 = vmatmul.bf16.gmra.mxu2 %v5925_v56 }
 0x38e   :  { %v2449_v17 = vpop.f32.mrf.mxu2  ;;  %v2273_v34 = vpop.f32.mrf.mxu0 }
 0x38f   :  { %v2450_v50 = vadd.f32 %v2449_v17, %v2361_v6  ;;  %v2538_v18 = vpop.f32.mrf.mxu3  ;;  %v2274_v35 = vadd.f32 %v2273_v34, %v2185_v5  ;;  %v2362_v10 = vpop.f32.mrf.mxu1  ;;  %v6930_v6 = vld [vmem:[#allocation76_spill] sm:$0xff]  ;;  %v6931_v17 = vld [vmem:[#allocation77_spill] sm:$0xff]  ;;  %v5158_v5 = vld [vmem:[#allocation8 + $0x34] sm:$0xf] }
 0x390   :  { %v5174_v34 = vld [vmem:[#allocation8 + $0xb4] sm:$0xf] }
 0x391   :  { %v6227_v41 = vadd.f32 %v2538_v18, %v2450_v50  ;;  %v2363_v33 = vadd.f32 %v2362_v10, %v2274_v35  ;;  %v4764_v50 = vld [vmem:[#allocation8 + $0x38] sm:$0xf0]  ;;  %v2190_v35 = vadd.f32 %v6033_v22, %v6045_v42 }
 0x392   :  { %v4767_v18 = vor.u32 %v5158_v5, %v4764_v50 }
 0x394   :  { %3207 = vmatpush.bf16.msra.mxu0 %v4767_v18 }
 0x396   :  { %v2451_v57 = vpop.f32.mrf.mxu2  ;;  %v2276_v61 = vpop.f32.mrf.mxu0 }
 0x397   :  { %v6231_v27 = vadd.f32 %v2451_v57, %v2363_v33  ;;  %v6233_v0 = vpop.f32.mrf.mxu3  ;;  %v2277_v51 = vadd.f32 %v2276_v61, %v2188_v32  ;;  %v2365_v62 = vpop.f32.mrf.mxu1  ;;  %v4831_v33 = vor.u32 %v5174_v34, %v4828_v45  ;;  %v5191_v34 = vld [vmem:[#allocation10 + $0x38] sm:$0xff] }
 0x398   :  { %6929 = vst [vmem:[#allocation20_spill] sm:$0xff] %v6233_v0  ;;  %3609 = vmatpush.bf16.msra.mxu2 %v5191_v34 }
 0x399   :  { %v2366_v56 = vadd.f32 %v2365_v62, %v2277_v51  ;;  %2591 = vmatmul.bf16.gmra.mxu0 %v6930_v6  ;;  %3296 = vmatpush.bf16.msra.mxu1 %v4831_v33  ;;  %v5199_v33 = vld [vmem:[#allocation10 + $0x78] sm:$0xff] }
 0x39a   :  { %2680 = vmatmul.bf16.gmra.mxu1 %v6931_v17  ;;  %3698 = vmatpush.bf16.msra.mxu3 %v5199_v33 }
 0x39b   :  { %3063 = vmatmul.bf16.gmra.mxu2 %v5943_v28  ;;  %v2193_v28 = vadd.f32 %v6042_v3, %v6045_v42  ;;  %v2195_v3 = vadd.f32 %v6049_v53, %v6045_v42  ;;  %v5156_v53 = vld [vmem:[#allocation8 + $0x24] sm:$0xf] }
 0x39e   :  { %v2454_v10 = vpop.f32.mrf.mxu2  ;;  %v2278_v32 = vpop.f32.mrf.mxu0 }
 0x39f   :  { %v2455_v57 = vadd.f32 %v2454_v10, %v2366_v56  ;;  %v2543_v61 = vpop.f32.mrf.mxu3  ;;  %v2279_v51 = vadd.f32 %v2278_v32, %v2190_v35  ;;  %v2367_v62 = vpop.f32.mrf.mxu1  ;;  %v6932_v35 = vld [vmem:[#allocation80_spill] sm:$0xff]  ;;  %v6933_v10 = vld [vmem:[#allocation81_spill] sm:$0xff] }
 0x3a1   :  { %v6240_v6 = vadd.f32 %v2543_v61, %v2455_v57  ;;  %v2368_v17 = vadd.f32 %v2367_v62, %v2279_v51 }
 0x3a6   :  { %v2456_v5 = vpop.f32.mrf.mxu2  ;;  %v2281_v0 = vpop.f32.mrf.mxu0 }
 0x3a7   :  { %v6244_v50 = vadd.f32 %v2456_v5, %v2368_v17  ;;  %v6246_v22 = vpop.f32.mrf.mxu3  ;;  %v2282_v56 = vadd.f32 %v2281_v0, %v2193_v28  ;;  %v2370_v45 = vpop.f32.mrf.mxu1 }
 0x3a9   :  { %v2371_v18 = vadd.f32 %v2370_v45, %v2282_v56  ;;  %2596 = vmatmul.bf16.gmra.mxu0 %v6932_v35  ;;  %v6934_v35 = vld [vmem:[#allocation84_spill] sm:$0xff] }
 0x3aa   :  { %2685 = vmatmul.bf16.gmra.mxu1 %v6933_v10  ;;  %v6935_v10 = vld [vmem:[#allocation85_spill] sm:$0xff] }
 0x3ab   :  { %3068 = vmatmul.bf16.gmra.mxu2 %v5955_v9 }
 0x3ae   :  { %v2459_v57 = vpop.f32.mrf.mxu2  ;;  %v2283_v61 = vpop.f32.mrf.mxu0 }
 0x3af   :  { %v2460_v32 = vadd.f32 %v2459_v57, %v2371_v18  ;;  %v2548_v51 = vpop.f32.mrf.mxu3  ;;  %v2284_v62 = vadd.f32 %v2283_v61, %v2195_v3  ;;  %v2372_v28 = vpop.f32.mrf.mxu1  ;;  %v4756_v18 = vld [vmem:[#allocation8 + $0x28] sm:$0xf0]  ;;  %v5172_v3 = vld [vmem:[#allocation8 + $0xa4] sm:$0xf] }
 0x3b0   :  { %v4759_v33 = vor.u32 %v5156_v53, %v4756_v18  ;;  %v4820_v57 = vld [vmem:[#allocation8 + $0xa8] sm:$0xf0]  ;;  %v6936_v18 = vld [vmem:[#allocation87_spill] sm:$0xff] }
 0x3b1   :  { %v6253_v0 = vadd.f32 %v2548_v51, %v2460_v32  ;;  %v2373_v17 = vadd.f32 %v2372_v28, %v2284_v62  ;;  %v4823_v32 = vor.u32 %v5172_v3, %v4820_v57 }
 0x3b2   :  { %3208 = vmatpush.bf16.msra.mxu0 %v4759_v33 }
 0x3b3   :  { %3297 = vmatpush.bf16.msra.mxu1 %v4823_v32 }
 0x3b6   :  { %v2461_v5 = vpop.f32.mrf.mxu2  ;;  %v2562_v56 = vpop.f32.mrf.mxu0 }
 0x3b7   :  { %v6255_v34 = vadd.f32 %v2461_v5, %v2373_v17  ;;  %v2651_v45 = vpop.f32.mrf.mxu1  ;;  %v2563_v42 = vadd.f32 %v2562_v56, %v6059_v12  ;;  %v5190_v56 = vld [vmem:[#allocation10 + $0x30] sm:$0xff] }
 0x3b8   :  { %3610 = vmatpush.bf16.msra.mxu2 %v5190_v56 }
 0x3b9   :  { %2601 = vmatmul.bf16.gmra.mxu0 %v6934_v35  ;;  %v2652_v51 = vadd.f32 %v2651_v45, %v2563_v42  ;;  %v6937_v45 = vld [vmem:[#allocation88_spill] sm:$0xff]  ;;  %v5198_v42 = vld [vmem:[#allocation10 + $0x70] sm:$0xff] }
 0x3ba   :  { %2690 = vmatmul.bf16.gmra.mxu1 %v6935_v10  ;;  %3699 = vmatpush.bf16.msra.mxu3 %v5198_v42  ;;  %v4812_v42 = vld [vmem:[#allocation8 + $0x98] sm:$0xf0] }
 0x3bb   :  { %3073 = vmatmul.bf16.gmra.mxu2 %v5967_v46  ;;  %v2732_v5 = vmax.f32 %v2652_v51, 0.0 }
 0x3be   :  { %v2564_v61 = vpop.f32.mrf.mxu0  ;;  %v6262_v10 = vpop.f32.mrf.mxu2 }
 0x3bf   :  { %v2565_v62 = vadd.f32 %v2564_v61, %v6063_v13  ;;  %v2653_v28 = vpop.f32.mrf.mxu1 }
 0x3c1   :  { %v2654_v17 = vadd.f32 %v2653_v28, %v2565_v62 }
 0x3c3   :  { %v2734_v35 = vmax.f32 %v2654_v17, 0.0 }
 0x3c5   :  { %v6264_v46 = vpack.c.bf16 %v2734_v35, %v2732_v5 }
 0x3c6   :  { %v2567_v12 = vpop.f32.mrf.mxu0  ;;  %v6271_v3 = vpop.f32.mrf.mxu2 }
 0x3c7   :  { %v2656_v53 = vpop.f32.mrf.mxu1  ;;  %3122 = vmatmul.bf16.vlgmr.msrb.gmra.mxu3 %v6264_v46  ;;  %v2568_v13 = vadd.f32 %v2567_v12, %v6071_v43  ;;  %v6938_v43 = vld [vmem:[#allocation90_spill] sm:$0xff]  ;;  %v6939_v12 = vld [vmem:[#allocation91_spill] sm:$0xff] }
 0x3c9   :  { %2606 = vmatmul.bf16.gmra.mxu0 %v6936_v18  ;;  %v2657_v57 = vadd.f32 %v2656_v53, %v2568_v13  ;;  %v5154_v53 = vld [vmem:[#allocation8 + $0x14] sm:$0xf]  ;;  %v4748_v18 = vld [vmem:[#allocation8 + $0x18] sm:$0xf0] }
 0x3ca   :  { %2695 = vmatmul.bf16.gmra.mxu1 %v6937_v45  ;;  %v4751_v45 = vor.u32 %v5154_v53, %v4748_v18  ;;  %v5170_v13 = vld [vmem:[#allocation8 + $0x94] sm:$0xf]  ;;  %v6940_v18 = vld [vmem:[#allocation93_spill] sm:$0xff] }
 0x3cb   :  { %3078 = vmatmul.bf16.gmra.mxu2 %v5979_v55  ;;  %v2736_v62 = vmax.f32 %v2657_v57, 0.0 }
 0x3cc   :  { %3209 = vmatpush.bf16.msra.mxu0 %v4751_v45 }
 0x3ce   :  { %v2569_v33 = vpop.f32.mrf.mxu0  ;;  %v6277_v56 = vpop.f32.mrf.mxu2 }
 0x3cf   :  { %v2570_v32 = vadd.f32 %v2569_v33, %v6075_v2  ;;  %v2658_v61 = vpop.f32.mrf.mxu1  ;;  %v4815_v33 = vor.u32 %v5170_v13, %v4812_v42 }
 0x3d1   :  { %v2659_v51 = vadd.f32 %v2658_v61, %v2570_v32  ;;  %3298 = vmatpush.bf16.msra.mxu1 %v4815_v33 }
 0x3d3   :  { %v2738_v28 = vmax.f32 %v2659_v51, 0.0 }
 0x3d5   :  { %v6274_v17 = vpack.c.bf16 %v2738_v28, %v2736_v62 }
 0x3d6   :  { %v2572_v5 = vpop.f32.mrf.mxu0  ;;  %v6284_v28 = vpop.f32.mrf.mxu2 }
 0x3d7   :  { %v2661_v35 = vpop.f32.mrf.mxu1  ;;  %3127 = vmatmul.bf16.gmra.mxu3 %v6274_v17  ;;  %v2573_v2 = vadd.f32 %v2572_v5, %v6083_v20  ;;  %v5189_v5 = vld [vmem:[#allocation10 + $0x28] sm:$0xff] }
 0x3d8   :  { %3611 = vmatpush.bf16.msra.mxu2 %v5189_v5 }
 0x3d9   :  { %2611 = vmatmul.bf16.gmra.mxu0 %v6938_v43  ;;  %v2662_v32 = vadd.f32 %v2661_v35, %v2573_v2  ;;  %v6941_v35 = vld [vmem:[#allocation94_spill] sm:$0xff]  ;;  %v5197_v2 = vld [vmem:[#allocation10 + $0x68] sm:$0xff] }
 0x3da   :  { %2700 = vmatmul.bf16.gmra.mxu1 %v6939_v12  ;;  %3700 = vmatpush.bf16.msra.mxu3 %v5197_v2  ;;  %v4804_v2 = vld [vmem:[#allocation8 + $0x88] sm:$0xf0] }
 0x3db   :  { %3083 = vmatmul.bf16.gmra.mxu2 %v5991_v36  ;;  %v2740_v43 = vmax.f32 %v2662_v32, 0.0 }
 0x3de   :  { %v2574_v57 = vpop.f32.mrf.mxu0  ;;  %v6293_v45 = vpop.f32.mrf.mxu2 }
 0x3df   :  { %v2575_v61 = vadd.f32 %v2574_v57, %v6087_v49  ;;  %v2663_v51 = vpop.f32.mrf.mxu1 }
 0x3e1   :  { %v2664_v62 = vadd.f32 %v2663_v51, %v2575_v61 }
 0x3e3   :  { %v2742_v12 = vmax.f32 %v2664_v62, 0.0 }
 0x3e5   :  { %v6286_v36 = vpack.c.bf16 %v2742_v12, %v2740_v43 }
 0x3e6   :  { %v2577_v20 = vpop.f32.mrf.mxu0  ;;  %v6298_v12 = vpop.f32.mrf.mxu2 }
 0x3e7   :  { %v2666_v53 = vpop.f32.mrf.mxu1  ;;  %3132 = vmatmul.bf16.gmra.mxu3 %v6286_v36  ;;  %v2578_v49 = vadd.f32 %v2577_v20, %v6095_v14  ;;  %v6942_v14 = vld [vmem:[#allocation98_spill] sm:$0xff]  ;;  %v6943_v20 = vld [vmem:[#allocation99_spill] sm:$0xff] }
 0x3e9   :  { %2616 = vmatmul.bf16.gmra.mxu0 %v6940_v18  ;;  %v2667_v42 = vadd.f32 %v2666_v53, %v2578_v49  ;;  %v5152_v53 = vld [vmem:[#allocation8 + $0x4] sm:$0xf]  ;;  %v4740_v18 = vld [vmem:[#allocation8 + $0x8] sm:$0xf0] }
 0x3ea   :  { %2705 = vmatmul.bf16.gmra.mxu1 %v6941_v35  ;;  %v4743_v35 = vor.u32 %v5152_v53, %v4740_v18  ;;  %v5168_v49 = vld [vmem:[#allocation8 + $0x84] sm:$0xf] }
 0x3eb   :  { %3088 = vmatmul.bf16.gmra.mxu2 %v6003_v39  ;;  %v2744_v61 = vmax.f32 %v2667_v42, 0.0  ;;  %v4807_v42 = vor.u32 %v5168_v49, %v4804_v2  ;;  %v5188_v18 = vld [vmem:[#allocation10 + $0x20] sm:$0xff]  ;;  %v2501_v49 = vadd.f32 %v6127_v30, %v6125_v7  ;;  %v6947_v7 = vld [vmem:[#allocation66_spill] sm:$0xff]  ;;  %v2506_v30 = vadd.f32 %v6141_v48, %v6139_v15  ;;  %v6949_v48 = vld [vmem:[#allocation109_spill] sm:$0xff] }
 0x3ec   :  { %3210 = vmatpush.bf16.msra.mxu0 %v4743_v35  ;;  %3612 = vmatpush.bf16.msra.mxu2 %v5188_v18  ;;  %v5196_v35 = vld [vmem:[#allocation10 + $0x60] sm:$0xff] }
 0x3ed   :  { %3299 = vmatpush.bf16.msra.mxu1 %v4807_v42  ;;  %3701 = vmatpush.bf16.msra.mxu3 %v5196_v35  ;;  %v6948_v15 = vld [vmem:[#allocation108_spill] sm:$0xff] }
 0x3ee   :  { %v2579_v13 = vpop.f32.mrf.mxu0 }
 0x3ef   :  { %v2580_v33 = vadd.f32 %v2579_v13, %v6099_v25  ;;  %v2668_v57 = vpop.f32.mrf.mxu1  ;;  %v2496_v13 = vadd.f32 %v6113_v4, %v6111_v47  ;;  %v6944_v47 = vld [vmem:[#allocation103_spill] sm:$0xff]  ;;  %v6945_v4 = vld [vmem:[#allocation104_spill] sm:$0xff] }
 0x3f1   :  { %v2669_v32 = vadd.f32 %v2668_v57, %v2580_v33 }
 0x3f3   :  { %v2746_v51 = vmax.f32 %v2669_v32, 0.0 }
 0x3f5   :  { %v6296_v62 = vpack.c.bf16 %v2746_v51, %v2744_v61  ;;  %v6307_v51 = vpop.f32.mrf.mxu2 }
 0x3f6   :  { %v2582_v43 = vpop.f32.mrf.mxu0 }
 0x3f7   :  { %v2671_v5 = vpop.f32.mrf.mxu1  ;;  %3137 = vmatmul.bf16.gmra.mxu3 %v6296_v62  ;;  %v2583_v25 = vadd.f32 %v2582_v43, %v6107_v44 }
 0x3f9   :  { %2621 = vmatmul.bf16.gmra.mxu0 %v6942_v14  ;;  %v2672_v57 = vadd.f32 %v2671_v5, %v2583_v25 }
 0x3fa   :  { %2710 = vmatmul.bf16.gmra.mxu1 %v6943_v20 }
 0x3fb   :  { %3093 = vmatmul.bf16.gmra.mxu2 %v6015_v60  ;;  %v2748_v20 = vmax.f32 %v2672_v57, 0.0 }
 0x3fd   :  { %v6315_v5 = vpop.f32.mrf.mxu2 }
 0x3fe   :  { %v2584_v33 = vpop.f32.mrf.mxu0 }
 0x3ff   :  { %v2585_v32 = vadd.f32 %v2584_v33, %v2496_v13  ;;  %v2673_v61 = vpop.f32.mrf.mxu1 }
 0x401   :  { %v2674_v14 = vadd.f32 %v2673_v61, %v2585_v32 }
 0x403   :  { %v2750_v44 = vmax.f32 %v2674_v14, 0.0 }
 0x405   :  { %v6309_v43 = vpack.c.bf16 %v2750_v44, %v2748_v20  ;;  %v6320_v14 = vpop.f32.mrf.mxu2 }
 0x406   :  { %v2587_v53 = vpop.f32.mrf.mxu0 }
 0x407   :  { %v2676_v60 = vpop.f32.mrf.mxu1  ;;  %3142 = vmatmul.bf16.gmra.mxu3 %v6309_v43  ;;  %v2588_v25 = vadd.f32 %v2587_v53, %v6121_v37  ;;  %v6946_v37 = vld [vmem:[#allocation106_spill] sm:$0xff] }
 0x409   :  { %2626 = vmatmul.bf16.gmra.mxu0 %v6944_v47  ;;  %v2677_v13 = vadd.f32 %v2676_v60, %v2588_v25 }
 0x40a   :  { %2715 = vmatmul.bf16.gmra.mxu1 %v6945_v4 }
 0x40b   :  { %3098 = vmatmul.bf16.gmra.mxu2 %v6027_v52  ;;  %v2752_v32 = vmax.f32 %v2677_v13, 0.0 }
 0x40d   :  { %v6331_v47 = vpop.f32.mrf.mxu2 }
 0x40e   :  { %v2589_v2 = vpop.f32.mrf.mxu0 }
 0x40f   :  { %v2590_v42 = vadd.f32 %v2589_v2, %v2501_v49  ;;  %v2678_v33 = vpop.f32.mrf.mxu1 }
 0x411   :  { %v2679_v57 = vadd.f32 %v2678_v33, %v2590_v42  ;;  %v5187_v33 = vld [vmem:[#allocation10 + $0x18] sm:$0xff] }
 0x412   :  { %3613 = vmatpush.bf16.msra.mxu2 %v5187_v33 }
 0x413   :  { %v2754_v61 = vmax.f32 %v2679_v57, 0.0 }
 0x415   :  { %v6322_v20 = vpack.c.bf16 %v2754_v61, %v2752_v32  ;;  %v6950_v32 = vld [vmem:[#allocation17_spill] sm:$0xff] }
 0x416   :  { %v2592_v44 = vpop.f32.mrf.mxu0 }
 0x417   :  { %v2681_v18 = vpop.f32.mrf.mxu1  ;;  %3147 = vmatmul.bf16.gmra.mxu3 %v6322_v20  ;;  %v2593_v60 = vadd.f32 %v2592_v44, %v6135_v40  ;;  %v6336_v40 = vpop.f32.mrf.mxu2  ;;  %v5195_v44 = vld [vmem:[#allocation10 + $0x58] sm:$0xff] }
 0x418   :  { %3702 = vmatpush.bf16.msra.mxu3 %v5195_v44 }
 0x419   :  { %2631 = vmatmul.bf16.gmra.mxu0 %v5917_v63  ;;  %v2682_v4 = vadd.f32 %v2681_v18, %v2593_v60  ;;  %v2511_v18 = vadd.f32 %v6155_v31, %v6153_v19  ;;  %v6951_v31 = vld [vmem:[#allocation18_spill] sm:$0xff] }
 0x41a   :  { %2720 = vmatmul.bf16.gmra.mxu1 %v6946_v37  ;;  %v5186_v37 = vld [vmem:[#allocation10 + $0x10] sm:$0xff] }
 0x41b   :  { %3103 = vmatmul.bf16.gmra.mxu2 %v6947_v7  ;;  %v2756_v2 = vmax.f32 %v2682_v4, 0.0 }
 0x41c   :  { %3614 = vmatpush.bf16.msra.mxu2 %v5186_v37 }
 0x41e   :  { %v2594_v53 = vpop.f32.mrf.mxu0 }
 0x41f   :  { %v2595_v25 = vadd.f32 %v2594_v53, %v2506_v30  ;;  %v2683_v35 = vpop.f32.mrf.mxu1 }
 0x421   :  { %v2684_v49 = vadd.f32 %v2683_v35, %v2595_v25  ;;  %v5185_v35 = vld [vmem:[#allocation10 + $0x8] sm:$0xff] }
 0x422   :  { %3615 = vmatpush.bf16.msra.mxu2 %v5185_v35  ;;  %v6952_v35 = vld [vmem:[#allocation92_spill] sm:$0xff] }
 0x423   :  { %v2758_v13 = vmax.f32 %v2684_v49, 0.0  ;;  %v6344_v49 = vpop.f32.mrf.mxu2 }
 0x425   :  { %v6333_v42 = vpack.c.bf16 %v2758_v13, %v2756_v2 }
 0x426   :  { %v2597_v63 = vpop.f32.mrf.mxu0 }
 0x427   :  { %v2686_v57 = vpop.f32.mrf.mxu1  ;;  %3152 = vmatmul.bf16.gmra.mxu3 %v6333_v42  ;;  %v2598_v61 = vadd.f32 %v2597_v63, %v6149_v1  ;;  %v5184_v1 = vld [vmem:[#allocation10] sm:$0xff] }
 0x428   :  { %3616 = vmatpush.bf16.msra.mxu2 %v5184_v1 }
 0x429   :  { %2636 = vmatmul.bf16.gmra.mxu0 %v6948_v15  ;;  %v2687_v30 = vadd.f32 %v2686_v57, %v2598_v61  ;;  %v2516_v57 = vadd.f32 %v6951_v31, %v6166_v26  ;;  %v6366_v26 = vld [vmem:[%s6655_s4] sm:$0x3] }
 0x42a   :  { %2725 = vmatmul.bf16.gmra.mxu1 %v6949_v48 }
 0x42b   :  { %3108 = vmatmul.bf16.gmra.mxu2 %v6950_v32  ;;  %v2760_v2 = vmax.f32 %v2687_v30, 0.0  ;;  %v6354_v48 = vpop.f32.mrf.mxu2  ;;  %v6356_v30 = vpop.f32.mrf.mxu3 }
 0x42e   :  { %v2599_v60 = vpop.f32.mrf.mxu0 }
 0x42f   :  { %v2600_v53 = vadd.f32 %v2599_v60, %v2511_v18  ;;  %v2688_v4 = vpop.f32.mrf.mxu1 }
 0x431   :  { %v2689_v25 = vadd.f32 %v2688_v4, %v2600_v53 }
 0x433   :  { %v2762_v13 = vmax.f32 %v2689_v25, 0.0 }
 0x435   :  { %v6346_v33 = vpack.c.bf16 %v2762_v13, %v2760_v2  ;;  %v6371_v13 = vperm.slane %v6366_v26, 0 }
 0x436   :  { %v2602_v63 = vpop.f32.mrf.mxu0 }
 0x437   :  { %v2691_v15 = vpop.f32.mrf.mxu1  ;;  %3157 = vmatmul.bf16.gmra.mxu3 %v6346_v33  ;;  %v2603_v19 = vadd.f32 %v2602_v63, %v6162_v54  ;;  %v5194_v63 = vld [vmem:[#allocation10 + $0x50] sm:$0xff] }
 0x438   :  { %3703 = vmatpush.bf16.msra.mxu3 %v5194_v63 }
 0x439   :  { %3211 = vmatmul.bf16.vlgmr.msra.gmra.mxu0 %v6910_v11  ;;  %v2692_v44 = vadd.f32 %v2691_v15, %v2603_v19  ;;  %v6953_v15 = vld [vmem:[#allocation19_spill] sm:$0xff] }
 0x43a   :  { %3300 = vmatmul.bf16.vlgmr.msra.gmra.mxu1 %v6264_v46  ;;  %v6360_v46 = vpop.f32.mrf.mxu2  ;;  %v2521_v19 = vadd.f32 %v6953_v15, %v6179_v58 }
 0x43b   :  { %v2764_v53 = vmax.f32 %v2692_v44, 0.0 }
 0x43e   :  { %v2604_v61 = vpop.f32.mrf.mxu0 }
 0x43f   :  { %v2605_v18 = vadd.f32 %v2604_v61, %v2516_v57  ;;  %v2693_v37 = vpop.f32.mrf.mxu1  ;;  %v3035_v57 = vadd.f32 %v6262_v10, %v6371_v13 }
 0x441   :  { %v2694_v60 = vadd.f32 %v2693_v37, %v2605_v18 }
 0x442   :  { %v6380_v37 = vpop.f32.mrf.mxu2 }
 0x443   :  { %v2766_v4 = vmax.f32 %v2694_v60, 0.0 }
 0x445   :  { %v6358_v25 = vpack.c.bf16 %v2766_v4, %v2764_v53 }
 0x446   :  { %v2607_v11 = vpop.f32.mrf.mxu0 }
 0x447   :  { %v2696_v54 = vpop.f32.mrf.mxu1  ;;  %3162 = vmatmul.bf16.gmra.mxu3 %v6358_v25  ;;  %v2608_v1 = vadd.f32 %v2607_v11, %v6175_v38 }
 0x449   :  { %3216 = vmatmul.bf16.gmra.mxu0 %v6952_v35  ;;  %v2697_v61 = vadd.f32 %v2696_v54, %v2608_v1  ;;  %v6954_v1 = vld [vmem:[#allocation95_spill] sm:$0xff] }
 0x44a   :  { %3305 = vmatmul.bf16.gmra.mxu1 %v6274_v17  ;;  %v3123_v2 = vpop.f32.mrf.mxu3  ;;  %v3037_v17 = vadd.f32 %v6271_v3, %v6371_v13 }
 0x44b   :  { %v3124_v60 = vadd.f32 %v3123_v2, %v3035_v57  ;;  %v2768_v4 = vmax.f32 %v2697_v61, 0.0  ;;  %v6387_v2 = vpop.f32.mrf.mxu2 }
 0x44d   :  { %v3381_v58 = vmax.f32 %v3124_v60, 0.0 }
 0x44e   :  { %v2609_v31 = vpop.f32.mrf.mxu0 }
 0x44f   :  { %v2610_v44 = vadd.f32 %v2609_v31, %v2521_v19  ;;  %v2698_v18 = vpop.f32.mrf.mxu1  ;;  %v6955_v31 = vld [vmem:[#allocation63_spill] sm:$0xff] }
 0x450   :  { %v2526_v57 = vadd.f32 %v6955_v31, %v6192_v24  ;;  %v6957_v31 = vld [vmem:[#allocation70_spill] sm:$0xff] }
 0x451   :  { %v2699_v53 = vadd.f32 %v2698_v18, %v2610_v44  ;;  %v3040_v44 = vadd.f32 %v6277_v56, %v6371_v13 }
 0x452   :  { %v3125_v38 = vpop.f32.mrf.mxu3 }
 0x453   :  { %v2770_v11 = vmax.f32 %v2699_v53, 0.0  ;;  %v3126_v35 = vadd.f32 %v3125_v38, %v3037_v17  ;;  %v3042_v53 = vadd.f32 %v6284_v28, %v6371_v13 }
 0x455   :  { %v3383_v63 = vmax.f32 %v3126_v35, 0.0  ;;  %v6382_v15 = vpack.c.bf16 %v2770_v11, %v2768_v4 }
 0x456   :  { %v2612_v32 = vpop.f32.mrf.mxu0 }
 0x457   :  { %v3445_v10 = vpack.c.bf16 %v3383_v63, %v3381_v58  ;;  %v2701_v54 = vpop.f32.mrf.mxu1  ;;  %3167 = vmatmul.bf16.gmra.mxu3 %v6382_v15  ;;  %v2613_v19 = vadd.f32 %v2612_v32, %v6188_v8  ;;  %v6396_v8 = vpop.f32.mrf.mxu2 }
 0x459   :  { %3221 = vmatmul.bf16.gmra.mxu0 %v6954_v1  ;;  %3617 = vmatmul.bf16.vlgmr.msra.gmra.mxu2 %v3445_v10  ;;  %v2702_v18 = vadd.f32 %v2701_v54, %v2613_v19  ;;  %v6956_v1 = vld [vmem:[#allocation100_spill] sm:$0xff]  ;;  %v5193_v19 = vld [vmem:[#allocation10 + $0x48] sm:$0xff] }
 0x45a   :  { %3310 = vmatmul.bf16.gmra.mxu1 %v6286_v36  ;;  %v3128_v3 = vpop.f32.mrf.mxu3  ;;  %3704 = vmatpush.bf16.msra.mxu3 %v5193_v19  ;;  %v3050_v19 = vadd.f32 %v6307_v51, %v6371_v13 }
 0x45b   :  { %v3129_v38 = vadd.f32 %v3128_v3, %v3040_v44  ;;  %v2772_v11 = vmax.f32 %v2702_v18, 0.0  ;;  %v3045_v44 = vadd.f32 %v6293_v45, %v6371_v13 }
 0x45d   :  { %v3385_v32 = vmax.f32 %v3129_v38, 0.0 }
 0x45e   :  { %v2614_v61 = vpop.f32.mrf.mxu0 }
 0x45f   :  { %v2615_v17 = vadd.f32 %v2614_v61, %v2526_v57  ;;  %v2703_v60 = vpop.f32.mrf.mxu1  ;;  %v2531_v57 = vadd.f32 %v6957_v31, %v6205_v16  ;;  %v6408_v18 = vpop.f32.mrf.mxu2 }
 0x461   :  { %v2704_v36 = vadd.f32 %v2703_v60, %v2615_v17 }
 0x462   :  { %v3130_v4 = vpop.f32.mrf.mxu3 }
 0x463   :  { %v2774_v35 = vmax.f32 %v2704_v36, 0.0  ;;  %v3131_v58 = vadd.f32 %v3130_v4, %v3042_v53 }
 0x465   :  { %v3387_v24 = vmax.f32 %v3131_v58, 0.0  ;;  %v6398_v63 = vpack.c.bf16 %v2774_v35, %v2772_v11 }
 0x466   :  { %v2617_v10 = vpop.f32.mrf.mxu0 }
 0x467   :  { %v2706_v56 = vpop.f32.mrf.mxu1  ;;  %3172 = vmatmul.bf16.gmra.mxu3 %v6398_v63  ;;  %v3447_v54 = vpack.c.bf16 %v3387_v24, %v3385_v32  ;;  %v2618_v3 = vadd.f32 %v2617_v10, %v6201_v21 }
 0x469   :  { %3226 = vmatmul.bf16.gmra.mxu0 %v6956_v1  ;;  %3622 = vmatmul.bf16.gmra.mxu2 %v3447_v54  ;;  %v2707_v17 = vadd.f32 %v2706_v56, %v2618_v3  ;;  %v6415_v56 = vpop.f32.mrf.mxu2  ;;  %v6958_v54 = vld [vmem:[#allocation105_spill] sm:$0xff] }
 0x46a   :  { %3315 = vmatmul.bf16.gmra.mxu1 %v6296_v62  ;;  %v3133_v28 = vpop.f32.mrf.mxu3  ;;  %v3047_v62 = vadd.f32 %v6298_v12, %v6371_v13 }
 0x46b   :  { %v3134_v38 = vadd.f32 %v3133_v28, %v3045_v44  ;;  %v2776_v4 = vmax.f32 %v2707_v17, 0.0  ;;  %v2536_v28 = vadd.f32 %v6220_v29, %v6218_v59  ;;  %v3052_v44 = vadd.f32 %v6315_v5, %v6371_v13 }
 0x46d   :  { %v3389_v16 = vmax.f32 %v3134_v38, 0.0 }
 0x46e   :  { %v2619_v61 = vpop.f32.mrf.mxu0 }
 0x46f   :  { %v2620_v60 = vadd.f32 %v2619_v61, %v2531_v57  ;;  %v2708_v53 = vpop.f32.mrf.mxu1 }
 0x471   :  { %v2709_v36 = vadd.f32 %v2708_v53, %v2620_v60 }
 0x472   :  { %v3135_v21 = vpop.f32.mrf.mxu3 }
 0x473   :  { %v2778_v11 = vmax.f32 %v2709_v36, 0.0  ;;  %v3136_v35 = vadd.f32 %v3135_v21, %v3047_v62 }
 0x475   :  { %v3391_v58 = vmax.f32 %v3136_v35, 0.0  ;;  %v6412_v32 = vpack.c.bf16 %v2778_v11, %v2776_v4  ;;  %v6959_v11 = vld [vmem:[#allocation107_spill] sm:$0xff] }
 0x476   :  { %v2622_v24 = vpop.f32.mrf.mxu0 }
 0x477   :  { %v2711_v45 = vpop.f32.mrf.mxu1  ;;  %3177 = vmatmul.bf16.gmra.mxu3 %v6412_v32  ;;  %v3449_v10 = vpack.c.bf16 %v3391_v58, %v3389_v16  ;;  %v2623_v1 = vadd.f32 %v2622_v24, %v6214_v23  ;;  %v5192_v16 = vld [vmem:[#allocation10 + $0x40] sm:$0xff] }
 0x478   :  { %v6960_v58 = vld [vmem:[#allocation20_spill] sm:$0xff]  ;;  %3705 = vmatpush.bf16.msra.mxu3 %v5192_v16 }
 0x479   :  { %3231 = vmatmul.bf16.gmra.mxu0 %v6958_v54  ;;  %3627 = vmatmul.bf16.gmra.mxu2 %v3449_v10  ;;  %v2712_v31 = vadd.f32 %v2711_v45, %v2623_v1  ;;  %v2541_v24 = vadd.f32 %v6960_v58, %v6231_v27  ;;  %v3055_v54 = vadd.f32 %v6320_v14, %v6371_v13 }
 0x47a   :  { %3320 = vmatmul.bf16.gmra.mxu1 %v6309_v43  ;;  %v3138_v12 = vpop.f32.mrf.mxu3  ;;  %v6426_v43 = vpop.f32.mrf.mxu2 }
 0x47b   :  { %v3139_v17 = vadd.f32 %v3138_v12, %v3050_v19  ;;  %v2780_v62 = vmax.f32 %v2712_v31, 0.0 }
 0x47d   :  { %v3393_v36 = vmax.f32 %v3139_v17, 0.0 }
 0x47e   :  { %v2624_v3 = vpop.f32.mrf.mxu0 }
 0x47f   :  { %v2625_v57 = vadd.f32 %v2624_v3, %v2536_v28  ;;  %v2713_v61 = vpop.f32.mrf.mxu1 }
 0x481   :  { %v2714_v60 = vadd.f32 %v2713_v61, %v2625_v57 }
 0x482   :  { %v3140_v53 = vpop.f32.mrf.mxu3  ;;  %v6436_v45 = vpop.f32.mrf.mxu2 }
 0x483   :  { %v2782_v23 = vmax.f32 %v2714_v60, 0.0  ;;  %v3141_v38 = vadd.f32 %v3140_v53, %v3052_v44 }
 0x485   :  { %v3395_v59 = vmax.f32 %v3141_v38, 0.0  ;;  %v6428_v29 = vpack.c.bf16 %v2782_v23, %v2780_v62  ;;  %v6961_v23 = vld [vmem:[#allocation110_spill] sm:$0xff] }
 0x486   :  { %v2627_v21 = vpop.f32.mrf.mxu0 }
 0x487   :  { %v2716_v51 = vpop.f32.mrf.mxu1  ;;  %3182 = vmatmul.bf16.gmra.mxu3 %v6428_v29  ;;  %v3451_v4 = vpack.c.bf16 %v3395_v59, %v3393_v36  ;;  %v2628_v35 = vadd.f32 %v2627_v21, %v6227_v41  ;;  %v2546_v36 = vadd.f32 %v6246_v22, %v6244_v50  ;;  %v3060_v21 = vadd.f32 %v6336_v40, %v6371_v13 }
 0x489   :  { %3236 = vmatmul.bf16.gmra.mxu0 %v6959_v11  ;;  %3632 = vmatmul.bf16.gmra.mxu2 %v3451_v4  ;;  %v2717_v12 = vadd.f32 %v2716_v51, %v2628_v35 }
 0x48a   :  { %3325 = vmatmul.bf16.gmra.mxu1 %v6322_v20  ;;  %v3143_v5 = vpop.f32.mrf.mxu3  ;;  %v3057_v20 = vadd.f32 %v6331_v47, %v6371_v13  ;;  %v6444_v53 = vpop.f32.mrf.mxu2 }
 0x48b   :  { %v3144_v3 = vadd.f32 %v3143_v5, %v3055_v54  ;;  %v2784_v31 = vmax.f32 %v2717_v12, 0.0  ;;  %v3062_v5 = vadd.f32 %v6344_v49, %v6371_v13 }
 0x48d   :  { %v3397_v27 = vmax.f32 %v3144_v3, 0.0  ;;  %v2551_v3 = vadd.f32 %v6356_v30, %v6255_v34 }
 0x48e   :  { %v2629_v10 = vpop.f32.mrf.mxu0 }
 0x48f   :  { %v2630_v1 = vadd.f32 %v2629_v10, %v2541_v24  ;;  %v2718_v28 = vpop.f32.mrf.mxu1 }
 0x491   :  { %v2719_v19 = vadd.f32 %v2718_v28, %v2630_v1 }
 0x492   :  { %v3145_v41 = vpop.f32.mrf.mxu3  ;;  %v6456_v35 = vpop.f32.mrf.mxu2 }
 0x493   :  { %v2786_v57 = vmax.f32 %v2719_v19, 0.0  ;;  %v3146_v61 = vadd.f32 %v3145_v41, %v3057_v20  ;;  %v3065_v41 = vadd.f32 %v6354_v48, %v6371_v13  ;;  %v6477_v48 = vperm.slane %v6366_v26, 1 }
 0x495   :  { %v3399_v44 = vmax.f32 %v3146_v61, 0.0  ;;  %v6442_v17 = vpack.c.bf16 %v2786_v57, %v2784_v31 }
 0x496   :  { %v2632_v60 = vpop.f32.mrf.mxu0 }
 0x497   :  { %v2721_v14 = vpop.f32.mrf.mxu1  ;;  %3187 = vmatmul.bf16.gmra.mxu3 %v6442_v17  ;;  %v3453_v62 = vpack.c.bf16 %v3399_v44, %v3397_v27  ;;  %v2633_v38 = vadd.f32 %v2632_v60, %v6240_v6 }
 0x499   :  { %3241 = vmatmul.bf16.gmra.mxu0 %v6961_v23  ;;  %3637 = vmatmul.bf16.gmra.mxu2 %v3453_v62  ;;  %v2722_v51 = vadd.f32 %v2721_v14, %v2633_v38 }
 0x49a   :  { %3330 = vmatmul.bf16.gmra.mxu1 %v6333_v42  ;;  %v3148_v47 = vpop.f32.mrf.mxu3  ;;  %v6463_v28 = vpop.f32.mrf.mxu2 }
 0x49b   :  { %v3149_v16 = vadd.f32 %v3148_v47, %v3060_v21  ;;  %v2788_v24 = vmax.f32 %v2722_v51, 0.0 }
 0x49d   :  { %v3401_v54 = vmax.f32 %v3149_v16, 0.0 }
 0x49e   :  { %v2634_v59 = vpop.f32.mrf.mxu0 }
 0x49f   :  { %v2635_v4 = vadd.f32 %v2634_v59, %v2546_v36  ;;  %v2723_v11 = vpop.f32.mrf.mxu1  ;;  %v6962_v36 = vld [vmem:[#allocation111_spill] sm:$0xff] }
 0x4a1   :  { %v2724_v42 = vadd.f32 %v2723_v11, %v2635_v4  ;;  %v3070_v4 = vadd.f32 %v6380_v37, %v6371_v13 }
 0x4a2   :  { %v3150_v58 = vpop.f32.mrf.mxu3 }
 0x4a3   :  { %v2790_v6 = vmax.f32 %v2724_v42, 0.0  ;;  %v3151_v10 = vadd.f32 %v3150_v58, %v3062_v5  ;;  %v3072_v42 = vadd.f32 %v6387_v2, %v6371_v13 }
 0x4a5   :  { %v3403_v50 = vmax.f32 %v3151_v10, 0.0  ;;  %v6458_v22 = vpack.c.bf16 %v2790_v6, %v2788_v24 }
 0x4a6   :  { %v2637_v12 = vpop.f32.mrf.mxu0 }
 0x4a7   :  { %v2726_v40 = vpop.f32.mrf.mxu1  ;;  %3192 = vmatmul.bf16.gmra.mxu3 %v6458_v22  ;;  %v3455_v1 = vpack.c.bf16 %v3403_v50, %v3401_v54  ;;  %v2638_v20 = vadd.f32 %v2637_v12, %v6253_v0  ;;  %v6472_v0 = vpop.f32.mrf.mxu2 }
 0x4a9   :  { %3246 = vmatmul.bf16.gmra.mxu0 %v5955_v9  ;;  %3642 = vmatmul.bf16.gmra.mxu2 %v3455_v1  ;;  %v2727_v31 = vadd.f32 %v2726_v40, %v2638_v20  ;;  %v3067_v9 = vadd.f32 %v6360_v46, %v6371_v13 }
 0x4aa   :  { %3335 = vmatmul.bf16.gmra.mxu1 %v6346_v33  ;;  %v3153_v49 = vpop.f32.mrf.mxu3 }
 0x4ab   :  { %v3154_v27 = vadd.f32 %v3153_v49, %v3065_v41  ;;  %v2792_v60 = vmax.f32 %v2727_v31, 0.0  ;;  %v3075_v41 = vadd.f32 %v6396_v8, %v6371_v13 }
 0x4ad   :  { %v3405_v23 = vmax.f32 %v3154_v27, 0.0 }
 0x4ae   :  { %v2639_v19 = vpop.f32.mrf.mxu0 }
 0x4af   :  { %v2640_v57 = vadd.f32 %v2639_v19, %v2551_v3  ;;  %v2728_v61 = vpop.f32.mrf.mxu1  ;;  %v6485_v11 = vpop.f32.mrf.mxu2 }
 0x4b1   :  { %v2729_v33 = vadd.f32 %v2728_v61, %v2640_v57 }
 0x4b2   :  { %v3155_v44 = vpop.f32.mrf.mxu3 }
 0x4b3   :  { %v2794_v14 = vmax.f32 %v2729_v33, 0.0  ;;  %v3156_v62 = vadd.f32 %v3155_v44, %v3067_v9  ;;  %v3077_v9 = vadd.f32 %v6408_v18, %v6371_v13 }
 0x4b5   :  { %v3407_v34 = vmax.f32 %v3156_v62, 0.0  ;;  %v6474_v30 = vpack.c.bf16 %v2794_v14, %v2792_v60 }
 0x4b6   :  { %v3212_v47 = vpop.f32.mrf.mxu0 }
 0x4b7   :  { %v3301_v38 = vpop.f32.mrf.mxu1  ;;  %3197 = vmatmul.bf16.gmra.mxu3 %v6474_v30  ;;  %v3457_v46 = vpack.c.bf16 %v3407_v34, %v3405_v23  ;;  %v3213_v21 = vadd.f32 %v3212_v47, %v6477_v48  ;;  %v6490_v20 = vpop.f32.mrf.mxu2 }
 0x4b9   :  { %3251 = vmatmul.bf16.gmra.mxu0 %v6962_v36  ;;  %3647 = vmatmul.bf16.gmra.mxu2 %v3457_v46  ;;  %v3302_v26 = vadd.f32 %v3301_v38, %v3213_v21  ;;  %v6963_v46 = vld [vmem:[#allocation16_spill] sm:$0xff] }
 0x4ba   :  { %3340 = vmatmul.bf16.gmra.mxu1 %v6358_v25  ;;  %v3158_v59 = vpop.f32.mrf.mxu3 }
 0x4bb   :  { %v3159_v58 = vadd.f32 %v3158_v59, %v3070_v4  ;;  %v3382_v25 = vmax.f32 %v3302_v26, 0.0 }
 0x4bd   :  { %v3409_v50 = vmax.f32 %v3159_v58, 0.0 }
 0x4be   :  { %v3214_v51 = vpop.f32.mrf.mxu0 }
 0x4bf   :  { %v3215_v5 = vadd.f32 %v3214_v51, %v6477_v48  ;;  %v3303_v16 = vpop.f32.mrf.mxu1  ;;  %v6500_v44 = vpop.f32.mrf.mxu2  ;;  %v3080_v51 = vadd.f32 %v6415_v56, %v6371_v13 }
 0x4c1   :  { %v3304_v24 = vadd.f32 %v3303_v16, %v3215_v5  ;;  %v3082_v16 = vadd.f32 %v6426_v43, %v6371_v13 }
 0x4c2   :  { %v3160_v6 = vpop.f32.mrf.mxu3 }
 0x4c3   :  { %v3384_v10 = vmax.f32 %v3304_v24, 0.0  ;;  %v3161_v54 = vadd.f32 %v3160_v6, %v3072_v42 }
 0x4c5   :  { %v3446_v12 = vpack.c.bf16 %v3384_v10, %v3382_v25  ;;  %v3411_v40 = vmax.f32 %v3161_v54, 0.0 }
 0x4c6   :  { %v3217_v1 = vpop.f32.mrf.mxu0 }
 0x4c7   :  { %v3306_v37 = vpop.f32.mrf.mxu1  ;;  %3706 = vmatmul.bf16.vlgmr.msra.gmra.mxu3 %v3446_v12  ;;  %v3459_v49 = vpack.c.bf16 %v3411_v40, %v3409_v50  ;;  %v3218_v3 = vadd.f32 %v3217_v1, %v6477_v48  ;;  %v6505_v59 = vpop.f32.mrf.mxu2 }
 0x4c9   :  { %3256 = vmatmul.bf16.gmra.mxu0 %v5979_v55  ;;  %3652 = vmatmul.bf16.gmra.mxu2 %v3459_v49  ;;  %v3307_v31 = vadd.f32 %v3306_v37, %v3218_v3 }
 0x4ca   :  { %3345 = vmatmul.bf16.gmra.mxu1 %v6382_v15  ;;  %v3163_v2 = vpop.f32.mrf.mxu3 }
 0x4cb   :  { %v3164_v27 = vadd.f32 %v3163_v2, %v3075_v41  ;;  %v3386_v15 = vmax.f32 %v3307_v31, 0.0  ;;  %v3085_v2 = vadd.f32 %v6436_v45, %v6371_v13  ;;  %v3087_v31 = vadd.f32 %v6444_v53, %v6371_v13 }
 0x4cd   :  { %v3413_v62 = vmax.f32 %v3164_v27, 0.0 }
 0x4ce   :  { %v3219_v19 = vpop.f32.mrf.mxu0 }
 0x4cf   :  { %v3220_v57 = vadd.f32 %v3219_v19, %v6477_v48  ;;  %v3308_v61 = vpop.f32.mrf.mxu1  ;;  %v6512_v40 = vpop.f32.mrf.mxu2 }
 0x4d1   :  { %v3309_v33 = vadd.f32 %v3308_v61, %v3220_v57 }
 0x4d2   :  { %v3165_v55 = vpop.f32.mrf.mxu3 }
 0x4d3   :  { %v3388_v60 = vmax.f32 %v3309_v33, 0.0  ;;  %v3166_v14 = vadd.f32 %v3165_v55, %v3077_v9 }
 0x4d5   :  { %v3415_v23 = vmax.f32 %v3166_v14, 0.0  ;;  %v3448_v34 = vpack.c.bf16 %v3388_v60, %v3386_v15 }
 0x4d6   :  { %v3222_v47 = vpop.f32.mrf.mxu0 }
 0x4d7   :  { %v3311_v8 = vpop.f32.mrf.mxu1  ;;  %3711 = vmatmul.bf16.gmra.mxu3 %v3448_v34  ;;  %v3461_v38 = vpack.c.bf16 %v3415_v23, %v3413_v62  ;;  %v3223_v36 = vadd.f32 %v3222_v47, %v6477_v48  ;;  %v6522_v57 = vpop.f32.mrf.mxu2  ;;  %v6964_v23 = vld [vmem:[#allocation60_spill] sm:$0xff] }
 0x4d9   :  { %3261 = vmatmul.bf16.gmra.mxu0 %v6963_v46  ;;  %3657 = vmatmul.bf16.gmra.mxu2 %v3461_v38  ;;  %v3312_v4 = vadd.f32 %v3311_v8, %v3223_v36  ;;  %v3090_v38 = vadd.f32 %v6456_v35, %v6371_v13 }
 0x4da   :  { %3350 = vmatmul.bf16.gmra.mxu1 %v6398_v63  ;;  %v3168_v18 = vpop.f32.mrf.mxu3 }
 0x4db   :  { %v3169_v42 = vadd.f32 %v3168_v18, %v3080_v51  ;;  %v3390_v63 = vmax.f32 %v3312_v4, 0.0 }
 0x4dd   :  { %v3417_v10 = vmax.f32 %v3169_v42, 0.0 }
 0x4de   :  { %v3224_v21 = vpop.f32.mrf.mxu0 }
 0x4df   :  { %v3225_v26 = vadd.f32 %v3224_v21, %v6477_v48  ;;  %v3313_v5 = vpop.f32.mrf.mxu1  ;;  %v6526_v34 = vpop.f32.mrf.mxu2  ;;  %v3092_v21 = vadd.f32 %v6463_v28, %v6371_v13 }
 0x4e1   :  { %v3314_v58 = vadd.f32 %v3313_v5, %v3225_v26 }
 0x4e2   :  { %v3170_v24 = vpop.f32.mrf.mxu3 }
 0x4e3   :  { %v3392_v6 = vmax.f32 %v3314_v58, 0.0  ;;  %v3171_v25 = vadd.f32 %v3170_v24, %v3082_v16 }
 0x4e5   :  { %v3419_v54 = vmax.f32 %v3171_v25, 0.0  ;;  %v3450_v50 = vpack.c.bf16 %v3392_v6, %v3390_v63 }
 0x4e6   :  { %v3227_v12 = vpop.f32.mrf.mxu0 }
 0x4e7   :  { %v3316_v56 = vpop.f32.mrf.mxu1  ;;  %3716 = vmatmul.bf16.gmra.mxu3 %v3450_v50  ;;  %v3463_v1 = vpack.c.bf16 %v3419_v54, %v3417_v10  ;;  %v3228_v37 = vadd.f32 %v3227_v12, %v6477_v48  ;;  %v3095_v12 = vadd.f32 %v6472_v0, %v6371_v13 }
 0x4e9   :  { %3266 = vmatmul.bf16.gmra.mxu0 %v6003_v39  ;;  %3662 = vmatmul.bf16.gmra.mxu2 %v3463_v1  ;;  %v3317_v3 = vadd.f32 %v3316_v56, %v3228_v37  ;;  %v3097_v37 = vadd.f32 %v6485_v11, %v6371_v13 }
 0x4ea   :  { %3355 = vmatmul.bf16.gmra.mxu1 %v6412_v32  ;;  %v3173_v43 = vpop.f32.mrf.mxu3 }
 0x4eb   :  { %v3174_v39 = vadd.f32 %v3173_v43, %v3085_v2  ;;  %v3394_v32 = vmax.f32 %v3317_v3, 0.0 }
 0x4ed   :  { %v3421_v55 = vmax.f32 %v3174_v39, 0.0 }
 0x4ee   :  { %v3229_v49 = vpop.f32.mrf.mxu0 }
 0x4ef   :  { %v3230_v19 = vadd.f32 %v3229_v49, %v6477_v48  ;;  %v3318_v41 = vpop.f32.mrf.mxu1 }
 0x4f1   :  { %v3319_v61 = vadd.f32 %v3318_v41, %v3230_v19 }
 0x4f2   :  { %v3175_v9 = vpop.f32.mrf.mxu3 }
 0x4f3   :  { %v3396_v27 = vmax.f32 %v3319_v61, 0.0  ;;  %v3176_v33 = vadd.f32 %v3175_v9, %v3087_v31 }
 0x4f5   :  { %v3423_v15 = vmax.f32 %v3176_v33, 0.0  ;;  %v3452_v60 = vpack.c.bf16 %v3396_v27, %v3394_v32 }
 0x4f6   :  { %v3232_v14 = vpop.f32.mrf.mxu0 }
 0x4f7   :  { %v3321_v45 = vpop.f32.mrf.mxu1  ;;  %3721 = vmatmul.bf16.gmra.mxu3 %v3452_v60  ;;  %v3465_v62 = vpack.c.bf16 %v3423_v15, %v3421_v55  ;;  %v3233_v47 = vadd.f32 %v3232_v14, %v6477_v48  ;;  %v3100_v55 = vadd.f32 %v6490_v20, %v6371_v13 }
 0x4f9   :  { %3271 = vmatmul.bf16.gmra.mxu0 %v6964_v23  ;;  %3667 = vmatmul.bf16.gmra.mxu2 %v3465_v62  ;;  %v3322_v46 = vadd.f32 %v3321_v45, %v3233_v47  ;;  %v3102_v45 = vadd.f32 %v6500_v44, %v6371_v13 }
 0x4fa   :  { %3360 = vmatmul.bf16.gmra.mxu1 %v6428_v29  ;;  %v3178_v53 = vpop.f32.mrf.mxu3  ;;  %v6534_v29 = vpop.f32.mrf.mxu2 }
 0x4fb   :  { %v3179_v51 = vadd.f32 %v3178_v53, %v3090_v38  ;;  %v3398_v5 = vmax.f32 %v3322_v46, 0.0 }
 0x4fd   :  { %v3425_v58 = vmax.f32 %v3179_v51, 0.0  ;;  %v6965_v51 = vld [vmem:[#allocation17_spill] sm:$0xff] }
 0x4fe   :  { %v3234_v8 = vpop.f32.mrf.mxu0 }
 0x4ff   :  { %v3235_v18 = vadd.f32 %v3234_v8, %v6477_v48  ;;  %v3323_v36 = vpop.f32.mrf.mxu1 }
 0x501   :  { %v3324_v4 = vadd.f32 %v3323_v36, %v3235_v18 }
 0x502   :  { %v3180_v26 = vpop.f32.mrf.mxu3  ;;  %v6539_v54 = vpop.f32.mrf.mxu2 }
 0x503   :  { %v3400_v16 = vmax.f32 %v3324_v4, 0.0  ;;  %v3181_v42 = vadd.f32 %v3180_v26, %v3092_v21 }
 0x505   :  { %v3454_v24 = vpack.c.bf16 %v3400_v16, %v3398_v5  ;;  %v3427_v63 = vmax.f32 %v3181_v42, 0.0  ;;  %v3105_v16 = vadd.f32 %v6505_v59, %v6371_v13 }
 0x506   :  { %v3237_v6 = vpop.f32.mrf.mxu0 }
 0x507   :  { %v3326_v35 = vpop.f32.mrf.mxu1  ;;  %3726 = vmatmul.bf16.gmra.mxu3 %v3454_v24  ;;  %v3467_v25 = vpack.c.bf16 %v3427_v63, %v3425_v58  ;;  %v3238_v10 = vadd.f32 %v3237_v6, %v6477_v48  ;;  %v3107_v63 = vadd.f32 %v6512_v40, %v6371_v13 }
 0x509   :  { %3276 = vmatmul.bf16.gmra.mxu0 %v6027_v52  ;;  %3672 = vmatmul.bf16.gmra.mxu2 %v3467_v25  ;;  %v3327_v56 = vadd.f32 %v3326_v35, %v3238_v10 }
 0x50a   :  { %3365 = vmatmul.bf16.gmra.mxu1 %v6442_v17  ;;  %v3183_v28 = vpop.f32.mrf.mxu3  ;;  %v6546_v9 = vpop.f32.mrf.mxu2 }
 0x50b   :  { %v3184_v52 = vadd.f32 %v3183_v28, %v3095_v12  ;;  %v3402_v17 = vmax.f32 %v3327_v56, 0.0 }
 0x50d   :  { %v3429_v41 = vmax.f32 %v3184_v52, 0.0 }
 0x50e   :  { %v3239_v50 = vpop.f32.mrf.mxu0 }
 0x50f   :  { %v3240_v1 = vadd.f32 %v3239_v50, %v6477_v48  ;;  %v3328_v43 = vpop.f32.mrf.mxu1 }
 0x511   :  { %v3329_v49 = vadd.f32 %v3328_v43, %v3240_v1 }
 0x512   :  { %v3185_v2 = vpop.f32.mrf.mxu3  ;;  %v6556_v62 = vpop.f32.mrf.mxu2 }
 0x513   :  { %v3404_v3 = vmax.f32 %v3329_v49, 0.0  ;;  %v3186_v19 = vadd.f32 %v3185_v2, %v3097_v37  ;;  %v3110_v2 = vadd.f32 %v6522_v57, %v6371_v13 }
 0x515   :  { %v3456_v31 = vpack.c.bf16 %v3404_v3, %v3402_v17  ;;  %v3431_v39 = vmax.f32 %v3186_v19, 0.0 }
 0x516   :  { %v3242_v61 = vpop.f32.mrf.mxu0 }
 0x517   :  { %v3331_v0 = vpop.f32.mrf.mxu1  ;;  %3731 = vmatmul.bf16.gmra.mxu3 %v3456_v31  ;;  %v3469_v32 = vpack.c.bf16 %v3431_v39, %v3429_v41  ;;  %v3243_v27 = vadd.f32 %v3242_v61, %v6477_v48  ;;  %v3112_v31 = vadd.f32 %v6526_v34, %v6371_v13 }
 0x519   :  { %3281 = vmatmul.bf16.gmra.mxu0 %v6947_v7  ;;  %3677 = vmatmul.bf16.gmra.mxu2 %v3469_v32  ;;  %v3332_v15 = vadd.f32 %v3331_v0, %v3243_v27 }
 0x51a   :  { %3370 = vmatmul.bf16.gmra.mxu1 %v6458_v22  ;;  %v3188_v11 = vpop.f32.mrf.mxu3  ;;  %v6560_v4 = vpop.f32.mrf.mxu2 }
 0x51b   :  { %v3189_v7 = vadd.f32 %v3188_v11, %v3100_v55  ;;  %v3406_v22 = vmax.f32 %v3332_v15, 0.0 }
 0x51d   :  { %v3433_v38 = vmax.f32 %v3189_v7, 0.0 }
 0x51e   :  { %v3244_v33 = vpop.f32.mrf.mxu0 }
 0x51f   :  { %v3245_v60 = vadd.f32 %v3244_v33, %v6477_v48  ;;  %v3333_v14 = vpop.f32.mrf.mxu1  ;;  %v6581_v33 = vld [vmem:[%s6657_s6] ss:$0 sm:$0xff]  ;;  %s5377_s6 = smov [#allocation11]  }
 0x520   :  { %v3619_v13 = vadd.f32 %v6581_v33, %v6534_v29  ;;  %s3823_s30 = sshll.u32 %s5377_s6, 4  ;;  %s3824_s30 = int_to_ptr.vmem [resolvable:$true] %s3823_s30 }
 0x521   :  { %v3334_v23 = vadd.f32 %v3333_v14, %v3245_v60 }
 0x522   :  { %v3190_v53 = vpop.f32.mrf.mxu3  ;;  %v6568_v50 = vpop.f32.mrf.mxu2 }
 0x523   :  { %v3408_v47 = vmax.f32 %v3334_v23, 0.0  ;;  %v3191_v8 = vadd.f32 %v3190_v53, %v3102_v45 }
 0x525   :  { %v3458_v46 = vpack.c.bf16 %v3408_v47, %v3406_v22  ;;  %v3435_v18 = vmax.f32 %v3191_v8, 0.0 }
 0x526   :  { %v3247_v36 = vpop.f32.mrf.mxu0 }
 0x527   :  { %v3336_v20 = vpop.f32.mrf.mxu1  ;;  %3736 = vmatmul.bf16.gmra.mxu3 %v3458_v46  ;;  %v3471_v21 = vpack.c.bf16 %v3435_v18, %v3433_v38  ;;  %v3248_v26 = vadd.f32 %v3247_v36, %v6477_v48  ;;  %v3621_v46 = vadd.f32 %v6581_v33, %v6539_v54 }
 0x529   :  { %3286 = vmatmul.bf16.gmra.mxu0 %v6965_v51  ;;  %3682 = vmatmul.bf16.gmra.mxu2 %v3471_v21  ;;  %v3337_v42 = vadd.f32 %v3336_v20, %v3248_v26 }
 0x52a   :  { %3375 = vmatmul.bf16.gmra.mxu1 %v6474_v30  ;;  %v3193_v44 = vpop.f32.mrf.mxu3  ;;  %v6573_v17 = vpop.f32.mrf.mxu2 }
 0x52b   :  { %v3194_v6 = vadd.f32 %v3193_v44, %v3105_v16  ;;  %v3410_v30 = vmax.f32 %v3337_v42, 0.0  ;;  %v3624_v16 = vadd.f32 %v6581_v33, %v6546_v9 }
 0x52d   :  { %v3437_v12 = vmax.f32 %v3194_v6, 0.0 }
 0x52e   :  { %v3249_v5 = vpop.f32.mrf.mxu0 }
 0x52f   :  { %v3250_v58 = vadd.f32 %v3249_v5, %v6477_v48  ;;  %v3338_v24 = vpop.f32.mrf.mxu1 }
 0x531   :  { %v3339_v35 = vadd.f32 %v3338_v24, %v3250_v58 }
 0x532   :  { %v3195_v25 = vpop.f32.mrf.mxu3  ;;  %v6585_v34 = vpop.f32.mrf.mxu2 }
 0x533   :  { %v3412_v28 = vmax.f32 %v3339_v35, 0.0  ;;  %v3196_v10 = vadd.f32 %v3195_v25, %v3107_v63  ;;  %v3626_v25 = vadd.f32 %v6581_v33, %v6556_v62 }
 0x535   :  { %v3460_v56 = vpack.c.bf16 %v3412_v28, %v3410_v30  ;;  %v3439_v1 = vmax.f32 %v3196_v10, 0.0 }
 0x536   :  { %v3252_v43 = vpop.f32.mrf.mxu0 }
 0x537   :  { %v3341_v59 = vpop.f32.mrf.mxu1  ;;  %3741 = vmatmul.bf16.gmra.mxu3 %v3460_v56  ;;  %v3473_v37 = vpack.c.bf16 %v3439_v1, %v3437_v12  ;;  %v3253_v49 = vadd.f32 %v3252_v43, %v6477_v48 }
 0x539   :  { %3687 = vmatmul.bf16.gmra.mxu2 %v3473_v37  ;;  %v3342_v3 = vadd.f32 %v3341_v59, %v3253_v49  ;;  %v3629_v37 = vadd.f32 %v6581_v33, %v6560_v4 }
 0x53a   :  { %v3198_v52 = vpop.f32.mrf.mxu3  ;;  %v6591_v5 = vpop.f32.mrf.mxu2 }
 0x53b   :  { %v3199_v39 = vadd.f32 %v3198_v52, %v3110_v2  ;;  %v3414_v32 = vmax.f32 %v3342_v3, 0.0 }
 0x53d   :  { %v3441_v57 = vmax.f32 %v3199_v39, 0.0 }
 0x53e   :  { %v3254_v40 = vpop.f32.mrf.mxu0 }
 0x53f   :  { %v3255_v19 = vadd.f32 %v3254_v40, %v6477_v48  ;;  %v3343_v41 = vpop.f32.mrf.mxu1 }
 0x541   :  { %v3344_v61 = vadd.f32 %v3343_v41, %v3255_v19 }
 0x542   :  { %v3200_v0 = vpop.f32.mrf.mxu3  ;;  %v6599_v28 = vpop.f32.mrf.mxu2 }
 0x543   :  { %v3416_v11 = vmax.f32 %v3344_v61, 0.0  ;;  %v3201_v27 = vadd.f32 %v3200_v0, %v3112_v31  ;;  %v3631_v31 = vadd.f32 %v6581_v33, %v6568_v50 }
 0x545   :  { %v3462_v55 = vpack.c.bf16 %v3416_v11, %v3414_v32  ;;  %v3443_v15 = vmax.f32 %v3201_v27, 0.0 }
 0x546   :  { %v3257_v60 = vpop.f32.mrf.mxu0 }
 0x547   :  { %v3346_v14 = vpop.f32.mrf.mxu1  ;;  %3746 = vmatmul.bf16.gmra.mxu3 %v3462_v55  ;;  %v3475_v45 = vpack.c.bf16 %v3443_v15, %v3441_v57  ;;  %v3258_v23 = vadd.f32 %v3257_v60, %v6477_v48  ;;  %v3634_v15 = vadd.f32 %v6581_v33, %v6573_v17 }
 0x549   :  { %3692 = vmatmul.bf16.gmra.mxu2 %v3475_v45  ;;  %v3347_v47 = vadd.f32 %v3346_v14, %v3258_v23 }
 0x54a   :  { %v3707_v7 = vpop.f32.mrf.mxu3  ;;  %v3643_v62 = vpop.f32.mrf.mxu2 }
 0x54b   :  { %v3708_v53 = vadd.f32 %v3707_v7, %v3619_v13  ;;  %v3418_v20 = vmax.f32 %v3347_v47, 0.0 }
 0x54d   :  { %3787 = vst [vmem:[#allocation11] sm:$0xff] %v3708_v53 }
 0x54e   :  { %v3259_v22 = vpop.f32.mrf.mxu0 }
 0x54f   :  { %v3260_v8 = vadd.f32 %v3259_v22, %v6477_v48  ;;  %v3348_v38 = vpop.f32.mrf.mxu1  ;;  %v3636_v22 = vadd.f32 %v6581_v33, %v6585_v34 }
 0x551   :  { %v3349_v18 = vadd.f32 %v3348_v38, %v3260_v8 }
 0x552   :  { %v3709_v36 = vpop.f32.mrf.mxu3  ;;  %v3645_v27 = vpop.f32.mrf.mxu2 }
 0x553   :  { %v3420_v29 = vmax.f32 %v3349_v18, 0.0  ;;  %v3710_v21 = vadd.f32 %v3709_v36, %v3621_v46 }
 0x555   :  { %v3464_v51 = vpack.c.bf16 %v3420_v29, %v3418_v20  ;;  %3788 = vst [vmem:[#allocation11 + $0x8] sm:$0xff] %v3710_v21  ;;  %v3639_v29 = vadd.f32 %v6581_v33, %v6591_v5 }
 0x556   :  { %v3262_v44 = vpop.f32.mrf.mxu0 }
 0x557   :  { %v3351_v26 = vpop.f32.mrf.mxu1  ;;  %3751 = vmatmul.bf16.gmra.mxu3 %v3464_v51  ;;  %v3263_v58 = vadd.f32 %v3262_v44, %v6477_v48 }
 0x559   :  { %v3352_v63 = vadd.f32 %v3351_v26, %v3263_v58 }
 0x55a   :  { %v3712_v42 = vpop.f32.mrf.mxu3  ;;  %v3648_v53 = vpop.f32.mrf.mxu2 }
 0x55b   :  { %v3713_v24 = vadd.f32 %v3712_v42, %v3624_v16  ;;  %v3422_v12 = vmax.f32 %v3352_v63, 0.0 }
 0x55d   :  { %3789 = vst [vmem:[#allocation11 + $0x10] sm:$0xff] %v3713_v24  ;;  %v3641_v24 = vadd.f32 %v6581_v33, %v6599_v28 }
 0x55e   :  { %v3264_v54 = vpop.f32.mrf.mxu0 }
 0x55f   :  { %v3265_v6 = vadd.f32 %v3264_v54, %v6477_v48  ;;  %v3353_v35 = vpop.f32.mrf.mxu1 }
 0x561   :  { %v3354_v30 = vadd.f32 %v3353_v35, %v3265_v6 }
 0x562   :  { %v3714_v10 = vpop.f32.mrf.mxu3  ;;  %v3650_v21 = vpop.f32.mrf.mxu2 }
 0x563   :  { %v3424_v56 = vmax.f32 %v3354_v30, 0.0  ;;  %v3715_v9 = vadd.f32 %v3714_v10, %v3626_v25 }
 0x565   :  { %v3466_v1 = vpack.c.bf16 %v3424_v56, %v3422_v12  ;;  %3790 = vst [vmem:[#allocation11 + $0x18] sm:$0xff] %v3715_v9  ;;  %v3644_v56 = vadd.f32 %v6581_v33, %v3643_v62 }
 0x566   :  { %v3267_v43 = vpop.f32.mrf.mxu0 }
 0x567   :  { %v3356_v59 = vpop.f32.mrf.mxu1  ;;  %3756 = vmatmul.bf16.gmra.mxu3 %v3466_v1  ;;  %v3268_v49 = vadd.f32 %v3267_v43, %v6477_v48 }
 0x569   :  { %v3357_v3 = vadd.f32 %v3356_v59, %v3268_v49 }
 0x56a   :  { %v3717_v52 = vpop.f32.mrf.mxu3  ;;  %v3653_v5 = vpop.f32.mrf.mxu2 }
 0x56b   :  { %v3718_v40 = vadd.f32 %v3717_v52, %v3629_v37  ;;  %v3426_v0 = vmax.f32 %v3357_v3, 0.0 }
 0x56d   :  { %3791 = vst [vmem:[#allocation11 + $0x20] sm:$0xff] %v3718_v40  ;;  %v3646_v40 = vadd.f32 %v6581_v33, %v3645_v27 }
 0x56e   :  { %v3269_v2 = vpop.f32.mrf.mxu0 }
 0x56f   :  { %v3270_v19 = vadd.f32 %v3269_v2, %v6477_v48  ;;  %v3358_v41 = vpop.f32.mrf.mxu1 }
 0x571   :  { %v3359_v39 = vadd.f32 %v3358_v41, %v3270_v19 }
 0x572   :  { %v3719_v61 = vpop.f32.mrf.mxu3  ;;  %v3655_v59 = vpop.f32.mrf.mxu2 }
 0x573   :  { %v3428_v32 = vmax.f32 %v3359_v39, 0.0  ;;  %v3720_v11 = vadd.f32 %v3719_v61, %v3631_v31 }
 0x575   :  { %v3468_v4 = vpack.c.bf16 %v3428_v32, %v3426_v0  ;;  %3792 = vst [vmem:[#allocation11 + $0x28] sm:$0xff] %v3720_v11  ;;  %v3649_v32 = vadd.f32 %v6581_v33, %v3648_v53  ;;  %v3654_v53 = vadd.f32 %v6581_v33, %v3653_v5 }
 0x576   :  { %v3272_v57 = vpop.f32.mrf.mxu0 }
 0x577   :  { %v3361_v55 = vpop.f32.mrf.mxu1  ;;  %3761 = vmatmul.bf16.gmra.mxu3 %v3468_v4  ;;  %v3273_v14 = vadd.f32 %v3272_v57, %v6477_v48 }
 0x579   :  { %v3362_v13 = vadd.f32 %v3361_v55, %v3273_v14  ;;  %v3651_v14 = vadd.f32 %v6581_v33, %v3650_v21 }
 0x57a   :  { %v3722_v60 = vpop.f32.mrf.mxu3  ;;  %v3658_v0 = vpop.f32.mrf.mxu2 }
 0x57b   :  { %v3723_v45 = vadd.f32 %v3722_v60, %v3634_v15  ;;  %v3430_v38 = vmax.f32 %v3362_v13, 0.0 }
 0x57d   :  { %3793 = vst [vmem:[#allocation11 + $0x30] sm:$0xff] %v3723_v45 }
 0x57e   :  { %v3274_v50 = vpop.f32.mrf.mxu0 }
 0x57f   :  { %v3275_v7 = vadd.f32 %v3274_v50, %v6477_v48  ;;  %v3363_v23 = vpop.f32.mrf.mxu1 }
 0x581   :  { %v3364_v47 = vadd.f32 %v3363_v23, %v3275_v7 }
 0x582   :  { %v3724_v8 = vpop.f32.mrf.mxu3  ;;  %v3660_v50 = vpop.f32.mrf.mxu2 }
 0x583   :  { %v3432_v46 = vmax.f32 %v3364_v47, 0.0  ;;  %v3725_v18 = vadd.f32 %v3724_v8, %v3636_v22 }
 0x585   :  { %v3470_v17 = vpack.c.bf16 %v3432_v46, %v3430_v38  ;;  %3794 = vst [vmem:[#allocation11 + $0x38] sm:$0xff] %v3725_v18 }
 0x586   :  { %v3277_v36 = vpop.f32.mrf.mxu0 }
 0x587   :  { %v3366_v20 = vpop.f32.mrf.mxu1  ;;  %3766 = vmatmul.bf16.gmra.mxu3 %v3470_v17  ;;  %v3278_v44 = vadd.f32 %v3277_v36, %v6477_v48 }
 0x589   :  { %v3367_v16 = vadd.f32 %v3366_v20, %v3278_v44  ;;  %v3659_v20 = vadd.f32 %v6581_v33, %v3658_v0  ;;  %v3661_v44 = vadd.f32 %v6581_v33, %v3660_v50 }
 0x58a   :  { %v3727_v51 = vpop.f32.mrf.mxu3  ;;  %v3663_v46 = vpop.f32.mrf.mxu2 }
 0x58b   :  { %v3728_v26 = vadd.f32 %v3727_v51, %v3639_v29  ;;  %v3434_v6 = vmax.f32 %v3367_v16, 0.0  ;;  %v3664_v16 = vadd.f32 %v6581_v33, %v3663_v46 }
 0x58d   :  { %3795 = vst [vmem:[#allocation11 + $0x40] sm:$0xff] %v3728_v26 }
 0x58e   :  { %v3279_v34 = vpop.f32.mrf.mxu0 }
 0x58f   :  { %v3280_v42 = vadd.f32 %v3279_v34, %v6477_v48  ;;  %v3368_v58 = vpop.f32.mrf.mxu1 }
 0x591   :  { %v3369_v54 = vadd.f32 %v3368_v58, %v3280_v42 }
 0x592   :  { %v3729_v63 = vpop.f32.mrf.mxu3  ;;  %v3665_v36 = vpop.f32.mrf.mxu2 }
 0x593   :  { %v3436_v35 = vmax.f32 %v3369_v54, 0.0  ;;  %v3730_v25 = vadd.f32 %v3729_v63, %v3641_v24  ;;  %v3666_v54 = vadd.f32 %v6581_v33, %v3665_v36 }
 0x595   :  { %v3472_v30 = vpack.c.bf16 %v3436_v35, %v3434_v6  ;;  %3796 = vst [vmem:[#allocation11 + $0x48] sm:$0xff] %v3730_v25 }
 0x596   :  { %v3282_v10 = vpop.f32.mrf.mxu0 }
 0x597   :  { %v3371_v12 = vpop.f32.mrf.mxu1  ;;  %3771 = vmatmul.bf16.gmra.mxu3 %v3472_v30  ;;  %v3283_v1 = vadd.f32 %v3282_v10, %v6477_v48 }
 0x599   :  { %v3372_v37 = vadd.f32 %v3371_v12, %v3283_v1 }
 0x59a   :  { %v3732_v9 = vpop.f32.mrf.mxu3  ;;  %v3668_v51 = vpop.f32.mrf.mxu2 }
 0x59b   :  { %v3733_v43 = vadd.f32 %v3732_v9, %v3644_v56  ;;  %v3438_v19 = vmax.f32 %v3372_v37, 0.0  ;;  %v3669_v25 = vadd.f32 %v6581_v33, %v3668_v51 }
 0x59d   :  { %3797 = vst [vmem:[#allocation11 + $0x50] sm:$0xff] %v3733_v43 }
 0x59e   :  { %v3284_v28 = vpop.f32.mrf.mxu0 }
 0x59f   :  { %v3285_v52 = vadd.f32 %v3284_v28, %v6477_v48  ;;  %v3373_v49 = vpop.f32.mrf.mxu1 }
 0x5a1   :  { %v3374_v2 = vadd.f32 %v3373_v49, %v3285_v52 }
 0x5a2   :  { %v3734_v3 = vpop.f32.mrf.mxu3  ;;  %v3670_v42 = vpop.f32.mrf.mxu2 }
 0x5a3   :  { %v3440_v41 = vmax.f32 %v3374_v2, 0.0  ;;  %v3735_v31 = vadd.f32 %v3734_v3, %v3646_v40  ;;  %v3671_v12 = vadd.f32 %v6581_v33, %v3670_v42 }
 0x5a5   :  { %v3474_v39 = vpack.c.bf16 %v3440_v41, %v3438_v19  ;;  %3798 = vst [vmem:[#allocation11 + $0x58] sm:$0xff] %v3735_v31 }
 0x5a6   :  { %v3287_v62 = vpop.f32.mrf.mxu0 }
 0x5a7   :  { %v3376_v61 = vpop.f32.mrf.mxu1  ;;  %3776 = vmatmul.bf16.gmra.mxu3 %v3474_v39  ;;  %v3288_v4 = vadd.f32 %v3287_v62, %v6477_v48 }
 0x5a9   :  { %v3377_v27 = vadd.f32 %v3376_v61, %v3288_v4 }
 0x5aa   :  { %v3737_v11 = vpop.f32.mrf.mxu3  ;;  %v3673_v35 = vpop.f32.mrf.mxu2 }
 0x5ab   :  { %v3738_v57 = vadd.f32 %v3737_v11, %v3649_v32  ;;  %v3442_v7 = vmax.f32 %v3377_v27, 0.0  ;;  %v3674_v43 = vadd.f32 %v6581_v33, %v3673_v35 }
 0x5ad   :  { %3799 = vst [vmem:[#allocation11 + $0x60] sm:$0xff] %v3738_v57 }
 0x5ae   :  { %v3289_v55 = vpop.f32.mrf.mxu0 }
 0x5af   :  { %v3290_v15 = vadd.f32 %v3289_v55, %v6477_v48  ;;  %v3378_v60 = vpop.f32.mrf.mxu1  ;;  %v3656_v48 = vadd.f32 %v6581_v33, %v3655_v59 }
 0x5b1   :  { %v3379_v45 = vadd.f32 %v3378_v60, %v3290_v15 }
 0x5b2   :  { %v3739_v13 = vpop.f32.mrf.mxu3  ;;  %v3675_v10 = vpop.f32.mrf.mxu2 }
 0x5b3   :  { %v3444_v23 = vmax.f32 %v3379_v45, 0.0  ;;  %v3740_v22 = vadd.f32 %v3739_v13, %v3651_v14  ;;  %v3676_v37 = vadd.f32 %v6581_v33, %v3675_v10 }
 0x5b5   :  { %v3476_v47 = vpack.c.bf16 %v3444_v23, %v3442_v7  ;;  %3800 = vst [vmem:[#allocation11 + $0x68] sm:$0xff] %v3740_v22 }
 0x5b7   :  { %3781 = vmatmul.bf16.gmra.mxu3 %v3476_v47 }
 0x5ba   :  { %v3742_v8 = vpop.f32.mrf.mxu3  ;;  %v3678_v1 = vpop.f32.mrf.mxu2 }
 0x5bb   :  { %v3743_v38 = vadd.f32 %v3742_v8, %v3654_v53  ;;  %v3679_v2 = vadd.f32 %v6581_v33, %v3678_v1 }
 0x5bd   :  { %3801 = vst [vmem:[#allocation11 + $0x70] sm:$0xff] %v3743_v38 }
 0x5c2   :  { %v3744_v18 = vpop.f32.mrf.mxu3  ;;  %v3680_v52 = vpop.f32.mrf.mxu2 }
 0x5c3   :  { %v3745_v17 = vadd.f32 %v3744_v18, %v3656_v48  ;;  %v3681_v31 = vadd.f32 %v6581_v33, %v3680_v52 }
 0x5c5   :  { %3802 = vst [vmem:[#allocation11 + $0x78] sm:$0xff] %v3745_v17 }
 0x5ca   :  { %v3747_v29 = vpop.f32.mrf.mxu3  ;;  %v3683_v41 = vpop.f32.mrf.mxu2 }
 0x5cb   :  { %v3748_v21 = vadd.f32 %v3747_v29, %v3659_v20  ;;  %v3684_v0 = vadd.f32 %v6581_v33, %v3683_v41 }
 0x5cd   :  { %3803 = vst [vmem:[#allocation11 + $0x80] sm:$0xff] %v3748_v21 }
 0x5d2   :  { %v3749_v26 = vpop.f32.mrf.mxu3  ;;  %v3685_v61 = vpop.f32.mrf.mxu2 }
 0x5d3   :  { %v3750_v34 = vadd.f32 %v3749_v26, %v3661_v44  ;;  %v3686_v57 = vadd.f32 %v6581_v33, %v3685_v61 }
 0x5d5   :  { %3804 = vst [vmem:[#allocation11 + $0x88] sm:$0xff] %v3750_v34 }
 0x5da   :  { %v3752_v58 = vpop.f32.mrf.mxu3  ;;  %v3688_v4 = vpop.f32.mrf.mxu2 }
 0x5db   :  { %v3753_v24 = vadd.f32 %v3752_v58, %v3664_v16  ;;  %v3689_v15 = vadd.f32 %v6581_v33, %v3688_v4 }
 0x5dd   :  { %3805 = vst [vmem:[#allocation11 + $0x90] sm:$0xff] %v3753_v24 }
 0x5e2   :  { %v3754_v63 = vpop.f32.mrf.mxu3  ;;  %v3690_v60 = vpop.f32.mrf.mxu2 }
 0x5e3   :  { %v3755_v6 = vadd.f32 %v3754_v63, %v3666_v54  ;;  %v3691_v50 = vadd.f32 %v6581_v33, %v3690_v60 }
 0x5e5   :  { %3806 = vst [vmem:[#allocation11 + $0x98] sm:$0xff] %v3755_v6 }
 0x5ea   :  { %v3757_v5 = vpop.f32.mrf.mxu3  ;;  %v3693_v23 = vpop.f32.mrf.mxu2 }
 0x5eb   :  { %v3758_v30 = vadd.f32 %v3757_v5, %v3669_v25  ;;  %v3694_v22 = vadd.f32 %v6581_v33, %v3693_v23 }
 0x5ed   :  { %3807 = vst [vmem:[#allocation11 + $0xa0] sm:$0xff] %v3758_v30 }
 0x5f2   :  { %v3759_v56 = vpop.f32.mrf.mxu3  ;;  %v3695_v8 = vpop.f32.mrf.mxu2 }
 0x5f3   :  { %v3760_v9 = vadd.f32 %v3759_v56, %v3671_v12  ;;  %v3696_v38 = vadd.f32 %v6581_v33, %v3695_v8 }
 0x5f5   :  { %3808 = vst [vmem:[#allocation11 + $0xa8] sm:$0xff] %v3760_v9 }
 0x5fa   :  { %v3762_v59 = vpop.f32.mrf.mxu3 }
 0x5fb   :  { %v3763_v28 = vadd.f32 %v3762_v59, %v3674_v43 }
 0x5fd   :  { %3809 = vst [vmem:[#allocation11 + $0xb0] sm:$0xff] %v3763_v28 }
 0x602   :  { %v3764_v49 = vpop.f32.mrf.mxu3 }
 0x603   :  { %v3765_v40 = vadd.f32 %v3764_v49, %v3676_v37 }
 0x605   :  { %3810 = vst [vmem:[#allocation11 + $0xb8] sm:$0xff] %v3765_v40 }
 0x60a   :  { %v3767_v3 = vpop.f32.mrf.mxu3 }
 0x60b   :  { %v3768_v19 = vadd.f32 %v3767_v3, %v3679_v2 }
 0x60d   :  { %3811 = vst [vmem:[#allocation11 + $0xc0] sm:$0xff] %v3768_v19 }
 0x612   :  { %v3769_v39 = vpop.f32.mrf.mxu3 }
 0x613   :  { %v3770_v62 = vadd.f32 %v3769_v39, %v3681_v31 }
 0x615   :  { %3812 = vst [vmem:[#allocation11 + $0xc8] sm:$0xff] %v3770_v62 }
 0x61a   :  { %v3772_v32 = vpop.f32.mrf.mxu3 }
 0x61b   :  { %v3773_v11 = vadd.f32 %v3772_v32, %v3684_v0 }
 0x61d   :  { %3813 = vst [vmem:[#allocation11 + $0xd0] sm:$0xff] %v3773_v11 }
 0x622   :  { %v3774_v55 = vpop.f32.mrf.mxu3 }
 0x623   :  { %v3775_v27 = vadd.f32 %v3774_v55, %v3686_v57 }
 0x625   :  { %3814 = vst [vmem:[#allocation11 + $0xd8] sm:$0xff] %v3775_v27 }
 0x62a   :  { %v3777_v14 = vpop.f32.mrf.mxu3 }
 0x62b   :  { %v3778_v45 = vadd.f32 %v3777_v14, %v3689_v15 }
 0x62d   :  { %3815 = vst [vmem:[#allocation11 + $0xe0] sm:$0xff] %v3778_v45 }
 0x632   :  { %v3779_v13 = vpop.f32.mrf.mxu3 }
 0x633   :  { %v3780_v7 = vadd.f32 %v3779_v13, %v3691_v50 }
 0x635   :  { %3816 = vst [vmem:[#allocation11 + $0xe8] sm:$0xff] %v3780_v7 }
 0x63a   :  { %v3782_v47 = vpop.f32.mrf.mxu3 }
 0x63b   :  { %v3783_v53 = vadd.f32 %v3782_v47, %v3694_v22 }
 0x63d   :  { %3817 = vst [vmem:[#allocation11 + $0xf0] sm:$0xff] %v3783_v53 }
 0x642   :  { %v3784_v46 = vpop.f32.mrf.mxu3 }
 0x643   :  { %v3785_v48 = vadd.f32 %v3784_v46, %v3696_v38 }
 0x645   :  { %3818 = vst [vmem:[#allocation11 + $0xf8] sm:$0xff] %v3785_v48 }
 0x646   :  { %3831 = dma.vmem_to_hbm [thread:$0]  %s3824_s30, 4096, %s3826_s12, [#allocation4], %s5367_s9, %s5367_s9, %s5368_s10  }
 0x647   :  { %5364 = dma.done.wait [#allocation4], 4096  }
 0x648   :  { %5365 = vsyncadd [#allocation4], 4294963200 }
 0x649   :  { %3836 = vsyncpa [#allocation3], 1 }
 0x64a   :  { %3837 = vsyncpa [#allocation6], 1 }
 0x64b   :  { %3838 = vsyncpa [#allocation9], 1 }
 0x64c   :  { %3839 = vsyncpa [#allocation4], 1 }

</bundles_post_ra>
